<compile_context>
chip_gen: v7x
topology: tpu7x:2x2x1
jax: 0.10.0
libtpu: 0.0.40
codegen_flags: <defaults>
</compile_context>

<pallas_src>
import functools

import jax
import jax.numpy as jnp
from jax.experimental import pallas as pl
from jax.experimental.pallas import tpu as pltpu

IN_FEATURES = 4096
OUT_FEATURES = 768


def _round_up(x, m):
    return ((x + m - 1) // m) * m


def _linear_kernel(x_ref, w_ref, o_ref):
    # x_ref: [tm, K] f32, w_ref: [K, tn] bf16 (pre-transposed, VMEM-resident),
    # o_ref: [tm, tn] f32.  Cast the activation tile to bf16 so the MXU runs
    # its native bf16 path; accumulate in f32.
    x_bf = x_ref[...].astype(jnp.bfloat16)
    o_ref[...] = jnp.dot(
        x_bf, w_ref[...], preferred_element_type=jnp.float32
    ).astype(o_ref.dtype)


@functools.partial(jax.jit, static_argnames=("tm",))
def linear_pallas(x2d, w_kn, *, tm=256):
    """y = x2d @ w_kn with f32 accumulation.

    x2d:  [M, K] float32
    w_kn: [K, N] bfloat16 (pre-transposed torch weight, see
          prepare_projection_weight).
    """
    M, K = x2d.shape
    K2, N = w_kn.shape
    assert K == K2, (K, K2)

    # bf16 activations want 16-row sublane packing; clamp tm for tiny M.
    tm = min(tm, _round_up(M, 16))
    m_blocks = pl.cdiv(M, tm)

    # Single M block (decode-style): split N in two lane-dense halves so both
    # v7x TensorCores get work.  Otherwise keep the full-width N block so the
    # weight is DMA'd exactly once per call.
    tn = N // 2 if (m_blocks == 1 and N % 256 == 0) else N
    n_blocks = pl.cdiv(N, tn)

    # Grid is (N blocks, M blocks) with N OUTER: the weight block index only
    # depends on j, so the weight stays VMEM-resident across all M blocks and
    # is never re-streamed from HBM.
    grid = (n_blocks, m_blocks)

    cost = pl.CostEstimate(
        flops=2 * M * K * N,
        transcendentals=0,
        # x is (re)read once per N block (n_blocks > 1 only when M is tiny);
        # the bf16 weight is read exactly once; the f32 output written once.
        bytes_accessed=n_blocks * M * K * 4 + K * N * 2 + M * N * 4,
    )

    return pl.pallas_call(
        _linear_kernel,
        out_shape=jax.ShapeDtypeStruct((M, N), jnp.float32),
        grid_spec=pltpu.PrefetchScalarGridSpec(
            num_scalar_prefetch=0,
            grid=grid,
            in_specs=[
                pl.BlockSpec((tm, K), lambda j, i: (i, 0)),
                # Constant index along the M axis -> fetched exactly once.
                # (pipeline_mode=pl.Buffered(1) would drop the unused second
                #  buffer; not needed at this VMEM budget.)
                pl.BlockSpec((K, tn), lambda j, i: (0, j)),
            ],
            out_specs=pl.BlockSpec((tm, tn), lambda j, i: (i, j)),
        ),
        compiler_params=pltpu.CompilerParams(
            dimension_semantics=("parallel", "parallel"),
            vmem_limit_bytes=40 * 1024 * 1024,
        ),
        cost_estimate=cost,
    )(x2d, w_kn)


def prepare_projection_weight(weight):
    """One-time prep: torch-layout [out, in] float weight -> [in, out] bf16.

    Do this once per parameter and cache the result; it amortizes the
    transpose + bf16 cast to zero per forward call.
    """
    weight = jnp.asarray(weight)
    assert weight.ndim == 2, weight.shape
    return weight.T.astype(jnp.bfloat16)


def single_layer_projection(x, weight):
    """Matches torch: y = x @ weight.T  (Linear(4096, 768, bias=False)).

    `weight` may be either the native torch layout [768, 4096] (any float
    dtype; converted per call as a fallback) or the pre-prepared [4096, 768]
    bf16 array from prepare_projection_weight (preferred: zero per-call prep).
    x may have arbitrary leading dims; the projection applies to the last dim.
    """
    K = x.shape[-1]
    if weight.shape[0] == K and weight.dtype == jnp.bfloat16:
        w_kn = weight
    elif weight.shape[-1] == K:
        w_kn = prepare_projection_weight(weight)
    else:
        raise ValueError(f"incompatible weight shape {weight.shape} for K={K}")
    lead = x.shape[:-1]
    x2d = x.reshape(-1, K)
    y2d = linear_pallas(x2d, w_kn)
    return y2d.reshape(*lead, w_kn.shape[1])


if __name__ == "__main__":
    key = jax.random.PRNGKey(0)
    k_w, k_x = jax.random.split(key)

    # Deterministic init mimicking torch.nn.Linear default (uniform +/- 1/sqrt(fan_in)).
    bound = 1.0 / jnp.sqrt(jnp.float32(IN_FEATURES))
    weight = jax.random.uniform(
        k_w, (OUT_FEATURES, IN_FEATURES), dtype=jnp.float32,
        minval=-bound, maxval=bound,
    )

    # Small batch/seq; feature dim is fixed by the module at 4096.
    batch, seq = 2, 8
    x = jax.random.normal(k_x, (batch, seq, IN_FEATURES), dtype=jnp.float32)

    # One-time parameter prep (cached kernel-layout bf16 weight).
    w_prepared = prepare_projection_weight(weight)

    y = single_layer_projection(x, w_prepared)
    y = jax.block_until_ready(y)

    # Reference check in plain JAX (f32).  Kernel rounds operands to bf16 but
    # accumulates in f32 -> relative error ~1e-3; use a matching tolerance.
    y_ref = jnp.einsum("bsk,nk->bsn", x, weight)
    assert y.shape == (batch, seq, OUT_FEATURES), y.shape
    assert jnp.allclose(y, y_ref, atol=1e-2, rtol=1e-2), (
        float(jnp.max(jnp.abs(y - y_ref)))
    )

    print("KERNEL_OK")
</pallas_src>

<mosaic_0001>
module attributes {stable_mosaic.version = 11 : i64} {
  func.func @_linear_kernel(%arg0: i32, %arg1: i32, %arg2: memref<16x4096xf32, #tpu.memory_space<vmem>>, %arg3: memref<4096x384xbf16, #tpu.memory_space<vmem>>, %arg4: memref<16x384xf32, #tpu.memory_space<vmem>>) attributes {dimension_semantics = [#tpu.dimension_semantics<parallel>, #tpu.dimension_semantics<parallel>], iteration_bounds = array<i64: 2, 1>, scalar_prefetch = 0 : i64, scratch_operands = 0 : i64, tpu.core_type = #tpu.core_type<tc>, window_params = [{transform_indices = @transform_0, window_bounds = array<i64: 16, 4096>}, {transform_indices = @transform_1, window_bounds = array<i64: 4096, 384>}, {transform_indices = @transform_2, window_bounds = array<i64: 16, 384>}]} {
    %c0 = arith.constant 0 : index
    %c0_0 = arith.constant 0 : index
    %0 = vector.load %arg2[%c0, %c0_0] : memref<16x4096xf32, #tpu.memory_space<vmem>>, vector<16x4096xf32>
    %1 = arith.truncf %0 : vector<16x4096xf32> to vector<16x4096xbf16>
    %c0_1 = arith.constant 0 : index
    %c0_2 = arith.constant 0 : index
    %2 = vector.load %arg3[%c0_1, %c0_2] : memref<4096x384xbf16, #tpu.memory_space<vmem>>, vector<4096x384xbf16>
    %cst = arith.constant dense<0.000000e+00> : vector<16x384xf32>
    %3 = tpu.matmul %1, %2, %cst {dimension_numbers = #tpu.dot_dimension_numbers<[1], [0], [0], [1], [0, 0, 1, 1], [], []>} : vector<16x4096xbf16>, vector<4096x384xbf16>, vector<16x384xf32> -> vector<16x384xf32>
    %c0_3 = arith.constant 0 : index
    %c0_4 = arith.constant 0 : index
    %4 = vector.load %arg4[%c0_3, %c0_4] : memref<16x384xf32, #tpu.memory_space<vmem>>, vector<16x384xf32>
    tpu.vector_store %arg4[%c0_3, %c0_4], %3 {strides = array<i32>} : memref<16x384xf32, #tpu.memory_space<vmem>>, vector<16x384xf32>,
    return
  }
  func.func @transform_0(%arg0: i32, %arg1: i32) -> (i32, i32) {
    %c0_i32 = arith.constant 0 : i32
    %c0_i32_0 = arith.constant 0 : i32
    return %arg1, %c0_i32 : i32, i32
  }
  func.func @transform_1(%arg0: i32, %arg1: i32) -> (i32, i32) {
    %c0_i32 = arith.constant 0 : i32
    %c0_i32_0 = arith.constant 0 : i32
    return %c0_i32, %arg0 : i32, i32
  }
  func.func @transform_2(%arg0: i32, %arg1: i32) -> (i32, i32) {
    %c0_i32 = arith.constant 0 : i32
    return %arg1, %arg0 : i32, i32
  }
}

</mosaic_0001>

<bundles_post_ra>
// kernel: linear_pallas.1
= control target key start
LH: loop header
LB: loop body
LE: loop exit
PB: predicated region body
PF: predicated region fallthrough
CT: control target
= control target key end

     0   :  { %7 = vsyncpa [#allocation3], 0  ;;  %s10542_s0 = inlined_call_operand.hbm [shape: f32[16,4096], index: 0, kind: input, shape index: {}]   ;;  %s10543_s1 = inlined_call_operand.hbm [shape: bf16[4096,768], index: 1, kind: input, shape index: {}]   ;;  %s10544_s2 = inlined_call_operand.hbm [shape: f32[16,768], index: 2, kind: output, shape index: {}]  }
   0x1   :  { %8 = vsyncpa [#allocation6], 0 }
   0x2   :  { %10 = vsyncpa [#allocation6 + $0x1], 0 }
   0x3   :  { %11 = vsyncpa [#allocation4], 0 }
   0x4   :  { %13 = vsyncpa [#allocation4 + $0x1], 0  ;;  %s9359_s9 = smov 0   ;;  %s9361_s10 = smov 0  }
   0x5   :  { %s9363_s11 = smov 0   ;;  %s9365_s12 = smov 0  }
   0x6   :  { %s9367_s13 = smov 0   ;;  %s9369_s14 = smov 0  }
   0x7 LB: > { %s6886_s15 = sadd.s32 4294967295, %s9331_s14   ;;  %s6887_s16 = sadd.s32 4294967294, %s9331_s14   ;;  %s9331_s14 = sphi %s9369_s14, %s19_s14   ;;  %s9327_s13 = sphi %s9367_s13, %s10572_s13   ;;  %s9323_s12 = sphi %s9365_s12, %s10571_s12   ;;  %s9319_s11 = sphi %s9363_s11, %s10570_s11   ;;  %s9315_s10 = sphi %s9361_s10, %s10569_s10   ;;  %s9311_s9 = sphi %s9359_s9, %s10568_s9  }
   0x8   : > { %s64_s17 = sadd.s32 1, %s9319_s11  ;;  %p71_p0 = scmp.ne.s32.totalorder %s9319_s11, %s9315_s10 }
   0x9   : > { %p72_p1 = scmp.eq.s32.totalorder %s9331_s14, 0  ;;  %p77_p2 = scmp.ne.s32.totalorder %s9315_s10, %s9311_s9 }
   0xa   : > { %p9397_p3 = scmp.eq.s32.totalorder %s6886_s15, 0  ;;  %p103_p4 = scmp.eq.s32.totalorder %s6886_s15, 1 }
   0xb   : > { %p9401_p5 = por %p72_p1, %p71_p0  ;;  %p109_p6 = scmp.eq.s32.totalorder %s6887_s16, 1 }
   0xc   : > { %s10551_s18 = scalar_select %p9397_p3, 1, 0 }
   0xd   : > { %p9407_p7 = por %p9397_p3, %p77_p2  ;;  %p9411_p8 = por %p103_p4, %p71_p0 }
   0xe   : > { %p9415_p9 = por %p109_p6, %p77_p2  ;;  %p6888_p10 = scmp.ge.s32.totalorder %s9331_s14, 1 }
   0xf   : > { %s10553_s20 = scalar_select %p9407_p7, 1, 0 }
  0x10   : > { %s10554_s21 = scalar_select %p9411_p8, 1, 0 }
  0x11   : > { %s10555_s22 = scalar_select %p9415_p9, 1, 0 }
  0x12   : > { %p116_p11 = scmp.lt.s32.totalorder %s9331_s14, 3  ;;  %s9333_s24 = smov [#allocation2]  }
  0x13   : > { %s132_s25 = sshll.u32 %s9333_s24, 4  ;;  %p8103_p1 = scmp.lt.s32.totalorder %s9331_s14, 2  ;;  %s9425_s25 = int_to_ptr.vmem [resolvable:$true] %s132_s25 }
  0x14   : > { %p9421_p12 = pnand %p6888_p10, %p116_p11  ;;  %s31_s28 = sadd.s32 1, %s9327_s13 }
  0x15   : > { %p9439_p4 = pnand %p8103_p1, %p9401_p5  ;;  %p9444_p6 = scmp.ge.s32.totalorder %s31_s28, 2 }
  0x16   : > { %s10556_s23 = scalar_select %p9421_p12, 1, 0 }
  0x17   : > { %p8090_p13 = pneg %p9421_p12  ;;  %s9187_s4 = scalar_lea.hbm %s10542_s0, 8192 }
  0x18   : > { %s10558_s27 = scalar_select %p9439_p4, 1, 0 }
  0x19   : > { %p9433_p2 = pnand %p8090_p13, %p9397_p3  ;;  %p9188_p10 = scmp.ne.s32.totalorder %s10542_s0, %s9187_s4 }
  0x1a   : > { %s10559_s29 = scalar_select %p9444_p6, 1, 0 }
  0x1b   : > { %p9189_p11 = pneg %p9433_p2  ;;  %p9194_p1 = scmp.lt.u32.totalorder %s9187_s4, %s10542_s0 }
  0x1d   : > { %p9190_p13 = pnand %p9189_p11, %p9188_p10 }
  0x1f   : > { %p9191_p5 = pneg %p9190_p13 }
  0x21   : > { %p9196_p0 = pnand %p9194_p1, %p9191_p5 }
  0x23   : > { %9199 = shalt.err (!%p9196_p0)
}
  0x24   : > { %s9200_s15 = scalar_lea.vmem %s9425_s25, 8192  ;;  %p9208_p3 = scmp.lt.s32.totalorder %s9425_s25, %s9425_s25 }
  0x25   : > { %p9201_p9 = scmp.ne.s32.totalorder %s9425_s25, %s9200_s15  ;;  %p9209_p12 = scmp.lt.s32.totalorder %s9200_s15, %s9200_s15 }
  0x27   : > { %p9203_p8 = pnand %p9201_p9, %p9189_p11  ;;  %p9210_p4 = por %p9209_p12, %p9208_p3 }
  0x29   : > { %p9204_p7 = pneg %p9203_p8 }
  0x2b   : > { %p9211_p6 = pnand %p9210_p4, %p9204_p7 }
  0x2d   : > { %9214 = shalt.err (!%p9211_p6)
}
  0x2e   : > { %s9334_s16 = smov 4096   ;;  %s9335_s19 = smov 256  }
  0x2f   : > { %8093 = dma.hbm_to_vmem [thread:$0]  (!%p9433_p2), %s10542_s0, 8192, %s9425_s25, [#allocation3], %s9334_s16, %s9334_s16, %s9335_s19  }
  0x30   : > { %s146_s3 = sand.u32 1, %s9319_s11   ;;  %p10560_p3 = scmp.ne.s32.totalorder %s10559_s29, 0 }
  0x31   : > { %s8079_s4 = smul.u32 6144, %s146_s3  ;;  %s9489_s16 = scalar_lea.sflag [#allocation6], %s146_s3 }
  0x32   : > { %s10574_s28 = smov (%p10560_p3, %s31_s28), 0  ;;  %s7665_s6 = smul.u32 192, %s9327_s13 }
  0x33   : > { %s61_s5 = ssub.s32 %s9327_s13, %s10574_s28  ;;  %s150_s25 = scalar_lea.vmem [#allocation5], %s8079_s4 }
  0x34   : > { %p62_p7 = scmp.eq.s32.totalorder %s61_s5, 0  ;;  %s9480_s15 = scalar_lea.hbm %s10543_s1, %s7665_s6 }
  0x35   : > { %s157_s26 = sshll.u32 %s150_s25, 4  ;;  %s9215_s19 = scalar_lea.hbm %s9480_s15, 98304  ;;  %s9487_s26 = int_to_ptr.vmem [resolvable:$true] %s157_s26 }
  0x36   : > { %s9485_s29 = scalar_select %p62_p7, %s9319_s11, %s64_s17  }
  0x37   : > { %p9216_p8 = scmp.ne.s32.totalorder %s9480_s15, %s9215_s19  ;;  %p10561_p9 = scmp.ne.s32.totalorder %s10558_s27, 0 }
  0x38   : > { %s9220_s4 = scalar_lea.hbm %s10543_s1, 196608  ;;  %p9221_p4 = scmp.lt.u32.totalorder %s9480_s15, %s10543_s1 }
  0x39   : > { %p9217_p12 = pneg %p10561_p9  ;;  %p9222_p6 = scmp.lt.u32.totalorder %s9220_s4, %s9215_s19 }
  0x3a   : > { %p9224_p11 = scmp.lt.u32.totalorder %s9215_s19, %s9480_s15 }
  0x3b   : > { %p9218_p0 = pnand %p9217_p12, %p9216_p8  ;;  %p9223_p10 = por %p9222_p6, %p9221_p4 }
  0x3d   : > { %p9219_p2 = pneg %p9218_p0  ;;  %p9225_p13 = por %p9224_p11, %p9223_p10 }
  0x3f   : > { %p9226_p5 = pnand %p9225_p13, %p9219_p2 }
  0x41   : > { %9229 = shalt.err (!%p9226_p5)
}
  0x42   : > { %s9230_s17 = scalar_lea.vmem %s9487_s26, 98304  ;;  %s9336_s3 = smov [#allocation5]  }
  0x43   : > { %p9231_p1 = scmp.ne.s32.totalorder %s9487_s26, %s9230_s17  ;;  %s9235_s7 = sshll.u32 %s9336_s3, 4  ;;  %s9236_s7 = int_to_ptr.vmem [resolvable:$false] %s9235_s7 }
  0x44   : > { %s9237_s8 = scalar_lea.vmem %s9236_s7, 196608  ;;  %p9238_p8 = scmp.lt.s32.totalorder %s9487_s26, %s9236_s7 }
  0x45   : > { %p9233_p3 = pnand %p9231_p1, %p9217_p12  ;;  %p9239_p0 = scmp.lt.s32.totalorder %s9237_s8, %s9230_s17 }
  0x47   : > { %p9234_p7 = pneg %p9233_p3  ;;  %p9240_p4 = por %p9239_p0, %p9238_p8 }
  0x49   : > { %p9241_p6 = pnand %p9240_p4, %p9234_p7 }
  0x4b   : > { %9244 = shalt.err (!%p9241_p6)
}
  0x4c   : > { %s9337_s25 = smov 384   ;;  %s9338_s19 = smov 192  }
  0x4d   : > { %s9339_s24 = smov 12   ;;  %p10562_p12 = scmp.ne.s32.totalorder %s10556_s23, 0 }
  0x4e   : > { %8097 = dma.hbm_to_vmem [thread:$0]  (!%p10561_p9), %s9480_s15, 98304, %s9487_s26, %s9489_s16, %s9337_s25, %s9338_s19, %s9339_s24  }
  0x4f   : > { %169 = sbr.rel (%p10562_p12) target bundleno = 1096 (0x448), region = 28  ;;  %p10563_p2 = scmp.ne.s32.totalorder (!%p10562_p12), %s10551_s18, 0 }
  0x56   : > { %9298 = dma.done.wait (%p10563_p2), [#allocation3], 8192  }
  0x57   : > { %9300 = vsyncadd (%p10563_p2), [#allocation3], 4294959104  ;;  %s9524_s30 = sand.u32 1, %s9315_s10   ;;  %p10564_p9 = scmp.ne.s32.totalorder %s10553_s20, 0 }
  0x58   : > { %s8080_s4 = smul.u32 6144, %s9524_s30  ;;  %s176_s5 = scalar_lea.sflag [#allocation6], %s9524_s30 }
  0x5a   : > { %s9528_s6 = scalar_lea.vmem [#allocation5], %s8080_s4 }
  0x5b   : > { %9302 = dma.done.wait (%p10564_p9), %s176_s5, 98304  }
  0x5c   : > { %9304 = vsyncadd (%p10564_p9), %s176_s5, 4294868992  ;;  %v8163_v0 = vld [vmem:[%s9528_s6 + $0x4] ss:$12 sps:$4 sm:$0xff]   ;;  %v8167_v2 = vld [vmem:[%s9528_s6] ss:$12 sps:$4 sm:$0xff]   ;;  %s8081_s18 = smul.u32 48, %s9524_s30 }
  0x5d   : > { %v8165_v1 = vld [vmem:[%s9528_s6 + $0x604] ss:$12 sps:$4 sm:$0xff]   ;;  %5421 = vmatprep.subr.bf16.mxu1 %v8163_v0  ;;  %v8168_v3 = vld [vmem:[%s9528_s6 + $0x600] ss:$12 sps:$4 sm:$0xff]   ;;  %v8169_v4 = vld [vmem:[%s9528_s6 + $0x1c] ss:$12 sps:$4 sm:$0xff]  }
  0x5e   : > { %5593 = vmatprep.subr.bf16.mxu0 %v8165_v1  ;;  %5422 = vmatpush1.bf16.msra.mxu1 %v8167_v2  ;;  %v8171_v5 = vld [vmem:[%s9528_s6 + $0x61c] ss:$12 sps:$4 sm:$0xff]   ;;  %v8173_v6 = vld [vmem:[%s9528_s6 + $0x18] ss:$12 sps:$4 sm:$0xff]   ;;  %v8175_v8 = vld [vmem:[%s9528_s6 + $0x34] ss:$12 sps:$4 sm:$0xff]  }
  0x5f   : > { %5594 = vmatpush1.bf16.msra.mxu0 %v8168_v3  ;;  %5423 = vmatprep.subr.bf16.mxu1 %v8169_v4  ;;  %v8174_v7 = vld [vmem:[%s9528_s6 + $0x618] ss:$12 sps:$4 sm:$0xff]   ;;  %v8177_v9 = vld [vmem:[%s9528_s6 + $0x634] ss:$12 sps:$4 sm:$0xff]   ;;  %v8179_v10 = vld [vmem:[%s9528_s6 + $0x30] ss:$12 sps:$4 sm:$0xff]  }
  0x60   : > { %5595 = vmatprep.subr.bf16.mxu0 %v8171_v5  ;;  %v8180_v11 = vld [vmem:[%s9528_s6 + $0x630] ss:$12 sps:$4 sm:$0xff]   ;;  %v8181_v12 = vld [vmem:[%s9528_s6 + $0x4c] ss:$12 sps:$4 sm:$0xff]   ;;  %v8185_v14 = vld [vmem:[%s9528_s6 + $0x48] ss:$12 sps:$4 sm:$0xff]  }
  0x61   : > { %v8183_v13 = vld [vmem:[%s9528_s6 + $0x64c] ss:$12 sps:$4 sm:$0xff]   ;;  %v8186_v15 = vld [vmem:[%s9528_s6 + $0x648] ss:$12 sps:$4 sm:$0xff]   ;;  %v8187_v16 = vld [vmem:[%s9528_s6 + $0x64] ss:$12 sps:$4 sm:$0xff]  }
  0x62   : > { %5424 = vmatpush1.bf16.msra.mxu1 %v8173_v6  ;;  %v8189_v17 = vld [vmem:[%s9528_s6 + $0x664] ss:$12 sps:$4 sm:$0xff]   ;;  %v8191_v18 = vld [vmem:[%s9528_s6 + $0x60] ss:$12 sps:$4 sm:$0xff]   ;;  %v8193_v20 = vld [vmem:[%s9528_s6 + $0x7c] ss:$12 sps:$4 sm:$0xff]  }
  0x63   : > { %5596 = vmatpush1.bf16.msra.mxu0 %v8174_v7  ;;  %5425 = vmatprep.subr.bf16.mxu1 %v8175_v8  ;;  %v8192_v19 = vld [vmem:[%s9528_s6 + $0x660] ss:$12 sps:$4 sm:$0xff]   ;;  %v8195_v21 = vld [vmem:[%s9528_s6 + $0x67c] ss:$12 sps:$4 sm:$0xff]   ;;  %v8197_v22 = vld [vmem:[%s9528_s6 + $0x78] ss:$12 sps:$4 sm:$0xff]  }
  0x64   : > { %5597 = vmatprep.subr.bf16.mxu0 %v8177_v9  ;;  %v8198_v23 = vld [vmem:[%s9528_s6 + $0x678] ss:$12 sps:$4 sm:$0xff]   ;;  %v8199_v24 = vld [vmem:[%s9528_s6 + $0x94] ss:$12 sps:$4 sm:$0xff]   ;;  %v8203_v26 = vld [vmem:[%s9528_s6 + $0x90] ss:$12 sps:$4 sm:$0xff]  }
  0x65   : > { %v8201_v25 = vld [vmem:[%s9528_s6 + $0x694] ss:$12 sps:$4 sm:$0xff]   ;;  %v8204_v27 = vld [vmem:[%s9528_s6 + $0x690] ss:$12 sps:$4 sm:$0xff]   ;;  %v8205_v28 = vld [vmem:[%s9528_s6 + $0xac] ss:$12 sps:$4 sm:$0xff]  }
  0x66   : > { %5426 = vmatpush1.bf16.msra.mxu1 %v8179_v10  ;;  %v8207_v29 = vld [vmem:[%s9528_s6 + $0x6ac] ss:$12 sps:$4 sm:$0xff]   ;;  %v8209_v30 = vld [vmem:[%s9528_s6 + $0xa8] ss:$12 sps:$4 sm:$0xff]   ;;  %v8211_v32 = vld [vmem:[%s9528_s6 + $0xc4] ss:$12 sps:$4 sm:$0xff]  }
  0x67   : > { %5598 = vmatpush1.bf16.msra.mxu0 %v8180_v11  ;;  %5427 = vmatprep.subr.bf16.mxu1 %v8181_v12  ;;  %v8210_v31 = vld [vmem:[%s9528_s6 + $0x6a8] ss:$12 sps:$4 sm:$0xff]   ;;  %v8213_v33 = vld [vmem:[%s9528_s6 + $0x6c4] ss:$12 sps:$4 sm:$0xff]   ;;  %v8215_v34 = vld [vmem:[%s9528_s6 + $0xc0] ss:$12 sps:$4 sm:$0xff]  }
  0x68   : > { %5599 = vmatprep.subr.bf16.mxu0 %v8183_v13  ;;  %v8216_v35 = vld [vmem:[%s9528_s6 + $0x6c0] ss:$12 sps:$4 sm:$0xff]   ;;  %v8217_v36 = vld [vmem:[%s9528_s6 + $0xdc] ss:$12 sps:$4 sm:$0xff]   ;;  %v8221_v38 = vld [vmem:[%s9528_s6 + $0xd8] ss:$12 sps:$4 sm:$0xff]  }
  0x69   : > { %v8219_v37 = vld [vmem:[%s9528_s6 + $0x6dc] ss:$12 sps:$4 sm:$0xff]   ;;  %v8222_v39 = vld [vmem:[%s9528_s6 + $0x6d8] ss:$12 sps:$4 sm:$0xff]   ;;  %v8223_v40 = vld [vmem:[%s9528_s6 + $0xf4] ss:$12 sps:$4 sm:$0xff]  }
  0x6a   : > { %5428 = vmatpush1.bf16.msra.mxu1 %v8185_v14  ;;  %v8225_v41 = vld [vmem:[%s9528_s6 + $0x6f4] ss:$12 sps:$4 sm:$0xff]   ;;  %v8227_v42 = vld [vmem:[%s9528_s6 + $0xf0] ss:$12 sps:$4 sm:$0xff]   ;;  %v8229_v44 = vld [vmem:[%s9528_s6 + $0x10c] ss:$12 sps:$4 sm:$0xff]  }
  0x6b   : > { %5600 = vmatpush1.bf16.msra.mxu0 %v8186_v15  ;;  %5429 = vmatprep.subr.bf16.mxu1 %v8187_v16  ;;  %v8228_v43 = vld [vmem:[%s9528_s6 + $0x6f0] ss:$12 sps:$4 sm:$0xff]   ;;  %v8231_v45 = vld [vmem:[%s9528_s6 + $0x70c] ss:$12 sps:$4 sm:$0xff]   ;;  %v8233_v46 = vld [vmem:[%s9528_s6 + $0x108] ss:$12 sps:$4 sm:$0xff]  }
  0x6c   : > { %5601 = vmatprep.subr.bf16.mxu0 %v8189_v17  ;;  %v8234_v47 = vld [vmem:[%s9528_s6 + $0x708] ss:$12 sps:$4 sm:$0xff]   ;;  %v8235_v50 = vld [vmem:[%s9528_s6 + $0x124] ss:$12 sps:$4 sm:$0xff]   ;;  %v8239_v56 = vld [vmem:[%s9528_s6 + $0x120] ss:$12 sps:$4 sm:$0xff]  }
  0x6d   : > { %v206_v48 = vld [vmem:[#allocation2 + $0x8] sm:$0xff]  ;;  %v8237_v51 = vld [vmem:[%s9528_s6 + $0x724] ss:$12 sps:$4 sm:$0xff]   ;;  %v8247_v62 = vld [vmem:[%s9528_s6 + $0x154] ss:$12 sps:$4 sm:$0xff]   ;;  %s199_s20 = scalar_lea.vmem [#allocation7], %s8081_s18 }
  0x6e   : > { %5430 = vmatpush1.bf16.msra.mxu1 %v8191_v18  ;;  %v238_v49 = vld [vmem:[#allocation2 + $0x108] sm:$0xff]  ;;  %v8245_v60 = vld [vmem:[%s9528_s6 + $0x138] ss:$12 sps:$4 sm:$0xff]   ;;  %v8249_v63 = vld [vmem:[%s9528_s6 + $0x754] ss:$12 sps:$4 sm:$0xff]   ;;  %s6788_s23 = sshll.u32 %s199_s20, 4  ;;  %s10487_s23 = int_to_ptr.vmem [resolvable:$true] %s6788_s23 }
  0x6f   : > { %5602 = vmatpush1.bf16.msra.mxu0 %v8192_v19  ;;  %5431 = vmatprep.subr.bf16.mxu1 %v8193_v20  ;;  %v9584_v52 = vpack.c.bf16 %v238_v49, %v206_v48  ;;  %v214_v53 = vld [vmem:[#allocation2 + $0x48] sm:$0xff]  ;;  %v8246_v61 = vld [vmem:[%s9528_s6 + $0x738] ss:$12 sps:$4 sm:$0xff]   ;;  %v8251_v0 = vld [vmem:[%s9528_s6 + $0x150] ss:$12 sps:$4 sm:$0xff]   ;;  %s7666_s27 = smul.u32 384, %s9323_s12 }
  0x70   : > { %5603 = vmatprep.subr.bf16.mxu0 %v8195_v21  ;;  %v246_v54 = vld [vmem:[#allocation2 + $0x148] sm:$0xff]  ;;  %v8252_v1 = vld [vmem:[%s9528_s6 + $0x750] ss:$12 sps:$4 sm:$0xff]   ;;  %v205_v6 = vld [vmem:[#allocation2] sm:$0xff]  ;;  %s6772_s16 = scalar_lea.sflag [#allocation4], %s9524_s30  ;;  %s9245_s17 = scalar_lea.vmem %s10487_s23, 768 }
  0x71   : > { %5453 = vmatprep.mubr.bf16.mxu1 %v9584_v52  ;;  %v9587_v55 = vpack.c.bf16 %v246_v54, %v214_v53  ;;  %v8240_v57 = vld [vmem:[%s9528_s6 + $0x720] ss:$12 sps:$4 sm:$0xff]   ;;  %v8241_v58 = vld [vmem:[%s9528_s6 + $0x13c] ss:$12 sps:$4 sm:$0xff]   ;;  %v8261_v7 = vld [vmem:[%s9528_s6 + $0x184] ss:$12 sps:$4 sm:$0xff]   ;;  %s10493_s26 = scalar_lea.hbm %s10544_s2, %s7666_s27  ;;  %p9246_p10 = scmp.ne.s32.totalorder %s10487_s23, %s9245_s17 }
  0x72   : > { %5432 = vmatpush1.bf16.msra.mxu1 %v8197_v22  ;;  %v8243_v59 = vld [vmem:[%s9528_s6 + $0x73c] ss:$12 sps:$4 sm:$0xff]   ;;  %v8253_v2 = vld [vmem:[%s9528_s6 + $0x16c] ss:$12 sps:$4 sm:$0xff]   ;;  %v237_v8 = vld [vmem:[#allocation2 + $0x100] sm:$0xff]  ;;  %p10565_p11 = scmp.ne.s32.totalorder %s10554_s21, 0 }
  0x73   : > { %5604 = vmatpush1.bf16.msra.mxu0 %v8198_v23  ;;  %5433 = vmatprep.subr.bf16.mxu1 %v8199_v24  ;;  %v8255_v3 = vld [vmem:[%s9528_s6 + $0x76c] ss:$12 sps:$4 sm:$0xff]   ;;  %v8257_v4 = vld [vmem:[%s9528_s6 + $0x168] ss:$12 sps:$4 sm:$0xff]   ;;  %v213_v9 = vld [vmem:[#allocation2 + $0x40] sm:$0xff]  ;;  %v9608_v14 = vpack.c.bf16 %v237_v8, %v205_v6  ;;  %s9340_s3 = smov [#allocation7]  }
  0x74   : > { %5605 = vmatprep.subr.bf16.mxu0 %v8201_v25  ;;  %5625 = vmatprep.mubr.bf16.mxu0 %v9587_v55  ;;  %v8258_v5 = vld [vmem:[%s9528_s6 + $0x768] ss:$12 sps:$4 sm:$0xff]   ;;  %v245_v10 = vld [vmem:[#allocation2 + $0x140] sm:$0xff]  ;;  %v8271_v22 = vld [vmem:[%s9528_s6 + $0x1b0] ss:$12 sps:$4 sm:$0xff]   ;;  %p9247_p13 = pnand %p9246_p10, %p10565_p11  ;;  %s9249_s7 = sshll.u32 %s9340_s3, 4  ;;  %s9250_s7 = int_to_ptr.vmem [resolvable:$false] %s9249_s7 }
  0x75   : > { %v8264_v11 = vld [vmem:[%s9528_s6 + $0x784] ss:$12 sps:$4 sm:$0xff]   ;;  %v8259_v12 = vld [vmem:[%s9528_s6 + $0x180] ss:$12 sps:$4 sm:$0xff]   ;;  %v9610_v15 = vpack.c.bf16 %v245_v10, %v213_v9  ;;  %v8267_v16 = vld [vmem:[%s9528_s6 + $0x19c] ss:$12 sps:$4 sm:$0xff]   ;;  %p9252_p1 = scmp.lt.s32.totalorder %s10487_s23, %s9250_s7 }
  0x76   : > { %5434 = vmatpush1.bf16.msra.mxu1 %v8203_v26  ;;  %v8262_v13 = vld [vmem:[%s9528_s6 + $0x780] ss:$12 sps:$4 sm:$0xff]   ;;  %v8270_v17 = vld [vmem:[%s9528_s6 + $0x79c] ss:$12 sps:$4 sm:$0xff]   ;;  %v8265_v18 = vld [vmem:[%s9528_s6 + $0x198] ss:$12 sps:$4 sm:$0xff]   ;;  %p9248_p5 = pneg %p9247_p13 }
  0x77   : > { %5606 = vmatpush1.bf16.msra.mxu0 %v8204_v27  ;;  %5435 = vmatprep.subr.bf16.mxu1 %v8205_v28  ;;  %v8268_v19 = vld [vmem:[%s9528_s6 + $0x798] ss:$12 sps:$4 sm:$0xff]   ;;  %v8273_v20 = vld [vmem:[%s9528_s6 + $0x1b4] ss:$12 sps:$4 sm:$0xff]   ;;  %v8274_v23 = vld [vmem:[%s9528_s6 + $0x7b0] ss:$12 sps:$4 sm:$0xff]  }
  0x78   : > { %5607 = vmatprep.subr.bf16.mxu0 %v8207_v29  ;;  %v8276_v21 = vld [vmem:[%s9528_s6 + $0x7b4] ss:$12 sps:$4 sm:$0xff]   ;;  %v8279_v24 = vld [vmem:[%s9528_s6 + $0x1cc] ss:$12 sps:$4 sm:$0xff]   ;;  %v8285_v28 = vld [vmem:[%s9528_s6 + $0x1e4] ss:$12 sps:$4 sm:$0xff]  }
  0x79   : > { %v8282_v25 = vld [vmem:[%s9528_s6 + $0x7cc] ss:$12 sps:$4 sm:$0xff]   ;;  %v8277_v26 = vld [vmem:[%s9528_s6 + $0x1c8] ss:$12 sps:$4 sm:$0xff]   ;;  %v8288_v29 = vld [vmem:[%s9528_s6 + $0x7e4] ss:$12 sps:$4 sm:$0xff]  }
  0x7a   : > { %5436 = vmatpush1.bf16.msra.mxu1 %v8209_v30  ;;  %v8280_v27 = vld [vmem:[%s9528_s6 + $0x7c8] ss:$12 sps:$4 sm:$0xff]   ;;  %v8283_v30 = vld [vmem:[%s9528_s6 + $0x1e0] ss:$12 sps:$4 sm:$0xff]   ;;  %v8337_v10 = vld [vmem:[%s9528_s6 + $0x2b8] ss:$12 sps:$4 sm:$0xff]  }
  0x7b   : > { %5608 = vmatpush1.bf16.msra.mxu0 %v8210_v31  ;;  %5437 = vmatprep.subr.bf16.mxu1 %v8211_v32  ;;  %v8286_v31 = vld [vmem:[%s9528_s6 + $0x7e0] ss:$12 sps:$4 sm:$0xff]   ;;  %v8291_v32 = vld [vmem:[%s9528_s6 + $0x1fc] ss:$12 sps:$4 sm:$0xff]   ;;  %s9251_s8 = scalar_lea.vmem %s9250_s7, 1536 }
  0x7c   : > { %5609 = vmatprep.subr.bf16.mxu0 %v8213_v33  ;;  %v8294_v33 = vld [vmem:[%s9528_s6 + $0x7fc] ss:$12 sps:$4 sm:$0xff]   ;;  %v8307_v53 = vld [vmem:[%s9528_s6 + $0x240] ss:$12 sps:$4 sm:$0xff]   ;;  %p9253_p3 = scmp.lt.s32.totalorder %s9251_s8, %s9245_s17 }
  0x7d   : > { %v8301_v48 = vld [vmem:[%s9528_s6 + $0x228] ss:$12 sps:$4 sm:$0xff]   ;;  %v8310_v54 = vld [vmem:[%s9528_s6 + $0x840] ss:$12 sps:$4 sm:$0xff]  }
  0x7e   : > { %5438 = vmatpush1.bf16.msra.mxu1 %v8215_v34  ;;  %v8289_v34 = vld [vmem:[%s9528_s6 + $0x1f8] ss:$12 sps:$4 sm:$0xff]   ;;  %v8304_v49 = vld [vmem:[%s9528_s6 + $0x828] ss:$12 sps:$4 sm:$0xff]   ;;  %v8331_v6 = vld [vmem:[%s9528_s6 + $0x2a0] ss:$12 sps:$4 sm:$0xff]   ;;  %p9254_p7 = por %p9253_p3, %p9252_p1 }
  0x7f   : > { %5610 = vmatpush1.bf16.msra.mxu0 %v8216_v35  ;;  %5439 = vmatprep.subr.bf16.mxu1 %v8217_v36  ;;  %v8292_v35 = vld [vmem:[%s9528_s6 + $0x7f8] ss:$12 sps:$4 sm:$0xff]   ;;  %v8297_v36 = vld [vmem:[%s9528_s6 + $0x214] ss:$12 sps:$4 sm:$0xff]   ;;  %v8339_v8 = vld [vmem:[%s9528_s6 + $0x2bc] ss:$12 sps:$4 sm:$0xff]  }
  0x80   : > { %5611 = vmatprep.subr.bf16.mxu0 %v8219_v37  ;;  %v8300_v37 = vld [vmem:[%s9528_s6 + $0x814] ss:$12 sps:$4 sm:$0xff]   ;;  %v8342_v9 = vld [vmem:[%s9528_s6 + $0x8bc] ss:$12 sps:$4 sm:$0xff]   ;;  %p9255_p8 = pnand %p9254_p7, %p9248_p5 }
  0x82   : > { %5440 = vmatpush1.bf16.msra.mxu1 %v8221_v38  ;;  %v8295_v38 = vld [vmem:[%s9528_s6 + $0x210] ss:$12 sps:$4 sm:$0xff]  }
  0x83   : > { %5612 = vmatpush1.bf16.msra.mxu0 %v8222_v39  ;;  %5441 = vmatprep.subr.bf16.mxu1 %v8223_v40  ;;  %v8298_v39 = vld [vmem:[%s9528_s6 + $0x810] ss:$12 sps:$4 sm:$0xff]  }
  0x84   : > { %5613 = vmatprep.subr.bf16.mxu0 %v8225_v41  ;;  %v208_v40 = vld [vmem:[#allocation2 + $0x18] sm:$0xff] }
  0x85   : > { %v240_v41 = vld [vmem:[#allocation2 + $0x118] sm:$0xff] }
  0x86   : > { %5442 = vmatpush1.bf16.msra.mxu1 %v8227_v42  ;;  %v8303_v42 = vld [vmem:[%s9528_s6 + $0x22c] ss:$12 sps:$4 sm:$0xff]  }
  0x87   : > { %5614 = vmatpush1.bf16.msra.mxu0 %v8228_v43  ;;  %5443 = vmatprep.subr.bf16.mxu1 %v8229_v44  ;;  %v8306_v43 = vld [vmem:[%s9528_s6 + $0x82c] ss:$12 sps:$4 sm:$0xff]   ;;  %v9640_v44 = vpack.c.bf16 %v240_v41, %v208_v40  ;;  %v8367_v41 = vld [vmem:[%s9528_s6 + $0x330] ss:$12 sps:$4 sm:$0xff]  }
  0x88   : > { %5615 = vmatprep.subr.bf16.mxu0 %v8231_v45  ;;  %v216_v45 = vld [vmem:[#allocation2 + $0x58] sm:$0xff] }
  0x8a   : > { %5444 = vmatpush1.bf16.msra.mxu1 %v8233_v46  ;;  %v248_v46 = vld [vmem:[#allocation2 + $0x158] sm:$0xff] }
  0x8b   : > { %5616 = vmatpush1.bf16.msra.mxu0 %v8234_v47  ;;  %5445 = vmatprep.subr.bf16.mxu1 %v8235_v50  ;;  %v9643_v47 = vpack.c.bf16 %v248_v46, %v216_v45  ;;  %v8309_v50 = vld [vmem:[%s9528_s6 + $0x244] ss:$12 sps:$4 sm:$0xff]  }
  0x8c   : > { %5617 = vmatprep.subr.bf16.mxu0 %v8237_v51  ;;  %v8312_v51 = vld [vmem:[%s9528_s6 + $0x844] ss:$12 sps:$4 sm:$0xff]  }
  0x8d   : > { %v8370_v45 = vld [vmem:[%s9528_s6 + $0x930] ss:$12 sps:$4 sm:$0xff]  }
  0x8e   : > { %5446 = vmatpush1.bf16.msra.mxu1 %v8239_v56  ;;  %v8315_v56 = vld [vmem:[%s9528_s6 + $0x25c] ss:$12 sps:$4 sm:$0xff]  }
  0x8f   : > { %5618 = vmatpush1.bf16.msra.mxu0 %v8240_v57  ;;  %5447 = vmatprep.subr.bf16.mxu1 %v8241_v58  ;;  %v8318_v57 = vld [vmem:[%s9528_s6 + $0x85c] ss:$12 sps:$4 sm:$0xff]   ;;  %v8313_v58 = vld [vmem:[%s9528_s6 + $0x258] ss:$12 sps:$4 sm:$0xff]  }
  0x90   : > { %5619 = vmatprep.subr.bf16.mxu0 %v8243_v59  ;;  %v8316_v59 = vld [vmem:[%s9528_s6 + $0x858] ss:$12 sps:$4 sm:$0xff]  }
  0x92   : > { %5448 = vmatpush1.bf16.msra.mxu1 %v8245_v60  ;;  %v8321_v60 = vld [vmem:[%s9528_s6 + $0x274] ss:$12 sps:$4 sm:$0xff]  }
  0x93   : > { %5620 = vmatpush1.bf16.msra.mxu0 %v8246_v61  ;;  %5449 = vmatprep.subr.bf16.mxu1 %v8247_v62  ;;  %v8324_v61 = vld [vmem:[%s9528_s6 + $0x874] ss:$12 sps:$4 sm:$0xff]   ;;  %v8319_v62 = vld [vmem:[%s9528_s6 + $0x270] ss:$12 sps:$4 sm:$0xff]  }
  0x94   : > { %5621 = vmatprep.subr.bf16.mxu0 %v8249_v63  ;;  %v8322_v63 = vld [vmem:[%s9528_s6 + $0x870] ss:$12 sps:$4 sm:$0xff]  }
  0x96   : > { %5450 = vmatpush1.bf16.msra.mxu1 %v8251_v0  ;;  %v8327_v0 = vld [vmem:[%s9528_s6 + $0x28c] ss:$12 sps:$4 sm:$0xff]  }
  0x97   : > { %5622 = vmatpush1.bf16.msra.mxu0 %v8252_v1  ;;  %5451 = vmatprep.subr.bf16.mxu1 %v8253_v2  ;;  %v8330_v1 = vld [vmem:[%s9528_s6 + $0x88c] ss:$12 sps:$4 sm:$0xff]   ;;  %v8325_v2 = vld [vmem:[%s9528_s6 + $0x288] ss:$12 sps:$4 sm:$0xff]  }
  0x98   : > { %5623 = vmatprep.subr.bf16.mxu0 %v8255_v3  ;;  %v8328_v3 = vld [vmem:[%s9528_s6 + $0x888] ss:$12 sps:$4 sm:$0xff]  }
  0x9a   : > { %5452 = vmatpush1.bf16.msra.mxu1 %v8257_v4  ;;  %v8333_v4 = vld [vmem:[%s9528_s6 + $0x2a4] ss:$12 sps:$4 sm:$0xff]  }
  0x9b   : > { %5624 = vmatpush1.bf16.msra.mxu0 %v8258_v5  ;;  %5464 = vmatprep.subr.bf16.mxu1 %v8261_v7  ;;  %v8336_v5 = vld [vmem:[%s9528_s6 + $0x8a4] ss:$12 sps:$4 sm:$0xff]   ;;  %v8334_v7 = vld [vmem:[%s9528_s6 + $0x8a0] ss:$12 sps:$4 sm:$0xff]  }
  0x9c   : > { %5636 = vmatprep.subr.bf16.mxu0 %v8264_v11  ;;  %v8340_v11 = vld [vmem:[%s9528_s6 + $0x8b8] ss:$12 sps:$4 sm:$0xff]  }
  0x9d   : > { %5454 = vmatmul.mubr.bf16.vlgmr.msra.gmra.mrb[0].mxu1 %v9608_v14 }
  0x9e   : > { %5626 = vmatmul.mubr.bf16.vlgmr.msra.gmra.mrb[0].mxu0 %v9610_v15  ;;  %5465 = vmatpush1.bf16.msra.mxu1 %v8259_v12  ;;  %v8345_v12 = vld [vmem:[%s9528_s6 + $0x2d4] ss:$12 sps:$4 sm:$0xff]  }
  0x9f   : > { %5637 = vmatpush1.bf16.msra.mxu0 %v8262_v13  ;;  %5466 = vmatprep.subr.bf16.mxu1 %v8267_v16  ;;  %v8348_v13 = vld [vmem:[%s9528_s6 + $0x8d4] ss:$12 sps:$4 sm:$0xff]   ;;  %v8343_v16 = vld [vmem:[%s9528_s6 + $0x2d0] ss:$12 sps:$4 sm:$0xff]  }
  0xa0   : > { %5638 = vmatprep.subr.bf16.mxu0 %v8270_v17  ;;  %5496 = vmatprep.mubr.bf16.mxu1 %v9640_v44  ;;  %v8346_v17 = vld [vmem:[%s9528_s6 + $0x8d0] ss:$12 sps:$4 sm:$0xff]  }
  0xa1   : > { %5668 = vmatprep.mubr.bf16.mxu0 %v9643_v47 }
  0xa2   : > { %5467 = vmatpush1.bf16.msra.mxu1 %v8265_v18  ;;  %v8351_v18 = vld [vmem:[%s9528_s6 + $0x2ec] ss:$12 sps:$4 sm:$0xff]  }
  0xa3   : > { %5639 = vmatpush1.bf16.msra.mxu0 %v8268_v19  ;;  %5468 = vmatprep.subr.bf16.mxu1 %v8273_v20  ;;  %v8354_v19 = vld [vmem:[%s9528_s6 + $0x8ec] ss:$12 sps:$4 sm:$0xff]   ;;  %v8349_v20 = vld [vmem:[%s9528_s6 + $0x2e8] ss:$12 sps:$4 sm:$0xff]  }
  0xa4   : > { %5640 = vmatprep.subr.bf16.mxu0 %v8276_v21  ;;  %v8352_v21 = vld [vmem:[%s9528_s6 + $0x8e8] ss:$12 sps:$4 sm:$0xff]  }
  0xa6   : > { %5469 = vmatpush1.bf16.msra.mxu1 %v8271_v22  ;;  %v207_v22 = vld [vmem:[#allocation2 + $0x10] sm:$0xff] }
  0xa7   : > { %5641 = vmatpush1.bf16.msra.mxu0 %v8274_v23  ;;  %5470 = vmatprep.subr.bf16.mxu1 %v8279_v24  ;;  %v8357_v23 = vld [vmem:[%s9528_s6 + $0x304] ss:$12 sps:$4 sm:$0xff]  }
  0xa8   : > { %5642 = vmatprep.subr.bf16.mxu0 %v8282_v25  ;;  %v239_v24 = vld [vmem:[#allocation2 + $0x110] sm:$0xff] }
  0xa9   : > { %v215_v25 = vld [vmem:[#allocation2 + $0x50] sm:$0xff] }
  0xaa   : > { %5471 = vmatpush1.bf16.msra.mxu1 %v8277_v26  ;;  %v247_v26 = vld [vmem:[#allocation2 + $0x150] sm:$0xff] }
  0xab   : > { %5643 = vmatpush1.bf16.msra.mxu0 %v8280_v27  ;;  %5472 = vmatprep.subr.bf16.mxu1 %v8285_v28  ;;  %v8360_v27 = vld [vmem:[%s9528_s6 + $0x904] ss:$12 sps:$4 sm:$0xff]   ;;  %v8355_v28 = vld [vmem:[%s9528_s6 + $0x300] ss:$12 sps:$4 sm:$0xff]  }
  0xac   : > { %5644 = vmatprep.subr.bf16.mxu0 %v8288_v29  ;;  %v8358_v29 = vld [vmem:[%s9528_s6 + $0x900] ss:$12 sps:$4 sm:$0xff]  }
  0xae   : > { %5473 = vmatpush1.bf16.msra.mxu1 %v8283_v30  ;;  %v9684_v30 = vpack.c.bf16 %v239_v24, %v207_v22  ;;  %v8421_v22 = vld [vmem:[%s9528_s6 + $0x408] ss:$12 sps:$4 sm:$0xff]   ;;  %v8429_v24 = vld [vmem:[%s9528_s6 + $0x424] ss:$12 sps:$4 sm:$0xff]  }
  0xaf   : > { %5645 = vmatpush1.bf16.msra.mxu0 %v8286_v31  ;;  %5474 = vmatprep.subr.bf16.mxu1 %v8291_v32  ;;  %v9686_v31 = vpack.c.bf16 %v247_v26, %v215_v25  ;;  %v8363_v32 = vld [vmem:[%s9528_s6 + $0x31c] ss:$12 sps:$4 sm:$0xff]   ;;  %v8432_v25 = vld [vmem:[%s9528_s6 + $0xa24] ss:$12 sps:$4 sm:$0xff]   ;;  %v8427_v26 = vld [vmem:[%s9528_s6 + $0x420] ss:$12 sps:$4 sm:$0xff]  }
  0xb0   : > { %5646 = vmatprep.subr.bf16.mxu0 %v8294_v33  ;;  %v8366_v33 = vld [vmem:[%s9528_s6 + $0x91c] ss:$12 sps:$4 sm:$0xff]  }
  0xb2   : > { %5475 = vmatpush1.bf16.msra.mxu1 %v8289_v34  ;;  %v8361_v34 = vld [vmem:[%s9528_s6 + $0x318] ss:$12 sps:$4 sm:$0xff]  }
  0xb3   : > { %5647 = vmatpush1.bf16.msra.mxu0 %v8292_v35  ;;  %5476 = vmatprep.subr.bf16.mxu1 %v8297_v36  ;;  %v8364_v35 = vld [vmem:[%s9528_s6 + $0x918] ss:$12 sps:$4 sm:$0xff]   ;;  %v8369_v36 = vld [vmem:[%s9528_s6 + $0x334] ss:$12 sps:$4 sm:$0xff]  }
  0xb4   : > { %5648 = vmatprep.subr.bf16.mxu0 %v8300_v37  ;;  %v8372_v37 = vld [vmem:[%s9528_s6 + $0x934] ss:$12 sps:$4 sm:$0xff]  }
  0xb6   : > { %5477 = vmatpush1.bf16.msra.mxu1 %v8295_v38  ;;  %v210_v38 = vld [vmem:[#allocation2 + $0x28] sm:$0xff] }
  0xb7   : > { %5649 = vmatpush1.bf16.msra.mxu0 %v8298_v39  ;;  %5478 = vmatprep.subr.bf16.mxu1 %v8303_v42  ;;  %v242_v39 = vld [vmem:[#allocation2 + $0x128] sm:$0xff] }
  0xb8   : > { %5650 = vmatprep.subr.bf16.mxu0 %v8306_v43  ;;  %v9696_v40 = vpack.c.bf16 %v242_v39, %v210_v38  ;;  %v218_v42 = vld [vmem:[#allocation2 + $0x68] sm:$0xff] }
  0xb9   : > { %v250_v43 = vld [vmem:[#allocation2 + $0x168] sm:$0xff] }
  0xba   : > { %5479 = vmatpush1.bf16.msra.mxu1 %v8301_v48  ;;  %v9700_v46 = vpack.c.bf16 %v250_v43, %v218_v42  ;;  %v8375_v48 = vld [vmem:[%s9528_s6 + $0x34c] ss:$12 sps:$4 sm:$0xff]   ;;  %v8448_v42 = vld [vmem:[%s9528_s6 + $0xa68] ss:$12 sps:$4 sm:$0xff]   ;;  %v209_v43 = vld [vmem:[#allocation2 + $0x20] sm:$0xff] }
  0xbb   : > { %5651 = vmatpush1.bf16.msra.mxu0 %v8304_v49  ;;  %5480 = vmatprep.subr.bf16.mxu1 %v8309_v50  ;;  %v8378_v49 = vld [vmem:[%s9528_s6 + $0x94c] ss:$12 sps:$4 sm:$0xff]   ;;  %v8373_v50 = vld [vmem:[%s9528_s6 + $0x348] ss:$12 sps:$4 sm:$0xff]  }
  0xbc   : > { %5652 = vmatprep.subr.bf16.mxu0 %v8312_v51  ;;  %v8376_v51 = vld [vmem:[%s9528_s6 + $0x948] ss:$12 sps:$4 sm:$0xff]   ;;  %v8447_v38 = vld [vmem:[%s9528_s6 + $0x46c] ss:$12 sps:$4 sm:$0xff]  }
  0xbd   : > { %v8450_v39 = vld [vmem:[%s9528_s6 + $0xa6c] ss:$12 sps:$4 sm:$0xff]  }
  0xbe   : > { %5481 = vmatpush1.bf16.msra.mxu1 %v8307_v53  ;;  %v8381_v53 = vld [vmem:[%s9528_s6 + $0x364] ss:$12 sps:$4 sm:$0xff]  }
  0xbf   : > { %5653 = vmatpush1.bf16.msra.mxu0 %v8310_v54  ;;  %5482 = vmatprep.subr.bf16.mxu1 %v8315_v56  ;;  %v8384_v54 = vld [vmem:[%s9528_s6 + $0x964] ss:$12 sps:$4 sm:$0xff]   ;;  %v8379_v56 = vld [vmem:[%s9528_s6 + $0x360] ss:$12 sps:$4 sm:$0xff]  }
  0xc0   : > { %5654 = vmatprep.subr.bf16.mxu0 %v8318_v57  ;;  %v8382_v57 = vld [vmem:[%s9528_s6 + $0x960] ss:$12 sps:$4 sm:$0xff]  }
  0xc2   : > { %5483 = vmatpush1.bf16.msra.mxu1 %v8313_v58  ;;  %v8387_v58 = vld [vmem:[%s9528_s6 + $0x37c] ss:$12 sps:$4 sm:$0xff]  }
  0xc3   : > { %5655 = vmatpush1.bf16.msra.mxu0 %v8316_v59  ;;  %5484 = vmatprep.subr.bf16.mxu1 %v8321_v60  ;;  %v8390_v59 = vld [vmem:[%s9528_s6 + $0x97c] ss:$12 sps:$4 sm:$0xff]   ;;  %v8385_v60 = vld [vmem:[%s9528_s6 + $0x378] ss:$12 sps:$4 sm:$0xff]  }
  0xc4   : > { %5656 = vmatprep.subr.bf16.mxu0 %v8324_v61  ;;  %v8388_v61 = vld [vmem:[%s9528_s6 + $0x978] ss:$12 sps:$4 sm:$0xff]  }
  0xc6   : > { %5485 = vmatpush1.bf16.msra.mxu1 %v8319_v62  ;;  %v8393_v62 = vld [vmem:[%s9528_s6 + $0x394] ss:$12 sps:$4 sm:$0xff]  }
  0xc7   : > { %5657 = vmatpush1.bf16.msra.mxu0 %v8322_v63  ;;  %5486 = vmatprep.subr.bf16.mxu1 %v8327_v0  ;;  %v8396_v63 = vld [vmem:[%s9528_s6 + $0x994] ss:$12 sps:$4 sm:$0xff]   ;;  %v8391_v0 = vld [vmem:[%s9528_s6 + $0x390] ss:$12 sps:$4 sm:$0xff]  }
  0xc8   : > { %5658 = vmatprep.subr.bf16.mxu0 %v8330_v1  ;;  %v8394_v1 = vld [vmem:[%s9528_s6 + $0x990] ss:$12 sps:$4 sm:$0xff]  }
  0xca   : > { %5487 = vmatpush1.bf16.msra.mxu1 %v8325_v2  ;;  %v8399_v2 = vld [vmem:[%s9528_s6 + $0x3ac] ss:$12 sps:$4 sm:$0xff]  }
  0xcb   : > { %5659 = vmatpush1.bf16.msra.mxu0 %v8328_v3  ;;  %5488 = vmatprep.subr.bf16.mxu1 %v8333_v4  ;;  %v8402_v3 = vld [vmem:[%s9528_s6 + $0x9ac] ss:$12 sps:$4 sm:$0xff]   ;;  %v8397_v4 = vld [vmem:[%s9528_s6 + $0x3a8] ss:$12 sps:$4 sm:$0xff]  }
  0xcc   : > { %5660 = vmatprep.subr.bf16.mxu0 %v8336_v5  ;;  %v8400_v5 = vld [vmem:[%s9528_s6 + $0x9a8] ss:$12 sps:$4 sm:$0xff]  }
  0xce   : > { %5489 = vmatpush1.bf16.msra.mxu1 %v8331_v6  ;;  %v8405_v6 = vld [vmem:[%s9528_s6 + $0x3c4] ss:$12 sps:$4 sm:$0xff]  }
  0xcf   : > { %5661 = vmatpush1.bf16.msra.mxu0 %v8334_v7  ;;  %5490 = vmatprep.subr.bf16.mxu1 %v8339_v8  ;;  %v8408_v7 = vld [vmem:[%s9528_s6 + $0x9c4] ss:$12 sps:$4 sm:$0xff]   ;;  %v8403_v8 = vld [vmem:[%s9528_s6 + $0x3c0] ss:$12 sps:$4 sm:$0xff]  }
  0xd0   : > { %5662 = vmatprep.subr.bf16.mxu0 %v8342_v9  ;;  %v8406_v9 = vld [vmem:[%s9528_s6 + $0x9c0] ss:$12 sps:$4 sm:$0xff]  }
  0xd2   : > { %5491 = vmatpush1.bf16.msra.mxu1 %v8337_v10  ;;  %v8411_v10 = vld [vmem:[%s9528_s6 + $0x3dc] ss:$12 sps:$4 sm:$0xff]  }
  0xd3   : > { %5663 = vmatpush1.bf16.msra.mxu0 %v8340_v11  ;;  %5492 = vmatprep.subr.bf16.mxu1 %v8345_v12  ;;  %v8414_v11 = vld [vmem:[%s9528_s6 + $0x9dc] ss:$12 sps:$4 sm:$0xff]   ;;  %v8409_v12 = vld [vmem:[%s9528_s6 + $0x3d8] ss:$12 sps:$4 sm:$0xff]  }
  0xd4   : > { %5664 = vmatprep.subr.bf16.mxu0 %v8348_v13  ;;  %v8412_v13 = vld [vmem:[%s9528_s6 + $0x9d8] ss:$12 sps:$4 sm:$0xff]  }
  0xd6   : > { %5493 = vmatpush1.bf16.msra.mxu1 %v8343_v16  ;;  %v8417_v16 = vld [vmem:[%s9528_s6 + $0x3f4] ss:$12 sps:$4 sm:$0xff]  }
  0xd7   : > { %5665 = vmatpush1.bf16.msra.mxu0 %v8346_v17  ;;  %5494 = vmatprep.subr.bf16.mxu1 %v8351_v18  ;;  %v8420_v17 = vld [vmem:[%s9528_s6 + $0x9f4] ss:$12 sps:$4 sm:$0xff]   ;;  %v8415_v18 = vld [vmem:[%s9528_s6 + $0x3f0] ss:$12 sps:$4 sm:$0xff]  }
  0xd8   : > { %5666 = vmatprep.subr.bf16.mxu0 %v8354_v19  ;;  %v8418_v19 = vld [vmem:[%s9528_s6 + $0x9f0] ss:$12 sps:$4 sm:$0xff]  }
  0xda   : > { %5495 = vmatpush1.bf16.msra.mxu1 %v8349_v20  ;;  %v8423_v20 = vld [vmem:[%s9528_s6 + $0x40c] ss:$12 sps:$4 sm:$0xff]  }
  0xdb   : > { %5667 = vmatpush1.bf16.msra.mxu0 %v8352_v21  ;;  %5507 = vmatprep.subr.bf16.mxu1 %v8357_v23  ;;  %v8426_v21 = vld [vmem:[%s9528_s6 + $0xa0c] ss:$12 sps:$4 sm:$0xff]   ;;  %v8424_v23 = vld [vmem:[%s9528_s6 + $0xa08] ss:$12 sps:$4 sm:$0xff]  }
  0xdc   : > { %5679 = vmatprep.subr.bf16.mxu0 %v8360_v27  ;;  %v8430_v27 = vld [vmem:[%s9528_s6 + $0xa20] ss:$12 sps:$4 sm:$0xff]  }
  0xdd   : > { %5497 = vmatmul.mubr.bf16.vlgmr.msra.gmra.mrb[0].mxu1 %v9684_v30 }
  0xde   : > { %5669 = vmatmul.mubr.bf16.vlgmr.msra.gmra.mrb[0].mxu0 %v9686_v31  ;;  %5508 = vmatpush1.bf16.msra.mxu1 %v8355_v28  ;;  %v8435_v28 = vld [vmem:[%s9528_s6 + $0x43c] ss:$12 sps:$4 sm:$0xff]  }
  0xdf   : > { %5680 = vmatpush1.bf16.msra.mxu0 %v8358_v29  ;;  %5509 = vmatprep.subr.bf16.mxu1 %v8363_v32  ;;  %v8438_v29 = vld [vmem:[%s9528_s6 + $0xa3c] ss:$12 sps:$4 sm:$0xff]   ;;  %v8433_v32 = vld [vmem:[%s9528_s6 + $0x438] ss:$12 sps:$4 sm:$0xff]  }
  0xe0   : > { %5681 = vmatprep.subr.bf16.mxu0 %v8366_v33  ;;  %5539 = vmatprep.mubr.bf16.mxu1 %v9696_v40  ;;  %v8436_v33 = vld [vmem:[%s9528_s6 + $0xa38] ss:$12 sps:$4 sm:$0xff]  }
  0xe1   : > { %5711 = vmatprep.mubr.bf16.mxu0 %v9700_v46 }
  0xe2   : > { %5510 = vmatpush1.bf16.msra.mxu1 %v8361_v34  ;;  %v8441_v34 = vld [vmem:[%s9528_s6 + $0x454] ss:$12 sps:$4 sm:$0xff]  }
  0xe3   : > { %5682 = vmatpush1.bf16.msra.mxu0 %v8364_v35  ;;  %5511 = vmatprep.subr.bf16.mxu1 %v8369_v36  ;;  %v8444_v35 = vld [vmem:[%s9528_s6 + $0xa54] ss:$12 sps:$4 sm:$0xff]   ;;  %v8439_v36 = vld [vmem:[%s9528_s6 + $0x450] ss:$12 sps:$4 sm:$0xff]  }
  0xe4   : > { %5683 = vmatprep.subr.bf16.mxu0 %v8372_v37  ;;  %v8442_v37 = vld [vmem:[%s9528_s6 + $0xa50] ss:$12 sps:$4 sm:$0xff]  }
  0xe6   : > { %5512 = vmatpush1.bf16.msra.mxu1 %v8367_v41  ;;  %v8445_v41 = vld [vmem:[%s9528_s6 + $0x468] ss:$12 sps:$4 sm:$0xff]  }
  0xe7   : > { %5684 = vmatpush1.bf16.msra.mxu0 %v8370_v45  ;;  %5513 = vmatprep.subr.bf16.mxu1 %v8375_v48  ;;  %v241_v45 = vld [vmem:[#allocation2 + $0x120] sm:$0xff] }
  0xe8   : > { %5685 = vmatprep.subr.bf16.mxu0 %v8378_v49  ;;  %v8453_v48 = vld [vmem:[%s9528_s6 + $0x484] ss:$12 sps:$4 sm:$0xff]  }
  0xe9   : > { %v8456_v49 = vld [vmem:[%s9528_s6 + $0xa84] ss:$12 sps:$4 sm:$0xff]  }
  0xea   : > { %5514 = vmatpush1.bf16.msra.mxu1 %v8373_v50  ;;  %v217_v50 = vld [vmem:[#allocation2 + $0x60] sm:$0xff] }
  0xeb   : > { %5686 = vmatpush1.bf16.msra.mxu0 %v8376_v51  ;;  %5515 = vmatprep.subr.bf16.mxu1 %v8381_v53  ;;  %v249_v51 = vld [vmem:[#allocation2 + $0x160] sm:$0xff]  ;;  %v212_v53 = vld [vmem:[#allocation2 + $0x38] sm:$0xff] }
  0xec   : > { %5687 = vmatprep.subr.bf16.mxu0 %v8384_v54  ;;  %v244_v54 = vld [vmem:[#allocation2 + $0x138] sm:$0xff] }
  0xee   : > { %5516 = vmatpush1.bf16.msra.mxu1 %v8379_v56  ;;  %v8451_v56 = vld [vmem:[%s9528_s6 + $0x480] ss:$12 sps:$4 sm:$0xff]  }
  0xef   : > { %5688 = vmatpush1.bf16.msra.mxu0 %v8382_v57  ;;  %5517 = vmatprep.subr.bf16.mxu1 %v8387_v58  ;;  %v220_v57 = vld [vmem:[#allocation2 + $0x78] sm:$0xff]  ;;  %v9759_v58 = vpack.c.bf16 %v241_v45, %v209_v43 }
  0xf0   : > { %5689 = vmatprep.subr.bf16.mxu0 %v8390_v59  ;;  %v9761_v59 = vpack.c.bf16 %v249_v51, %v217_v50  ;;  %v8511_v43 = vld [vmem:[%s9528_s6 + $0x570] ss:$12 sps:$4 sm:$0xff]   ;;  %v8517_v50 = vld [vmem:[%s9528_s6 + $0x588] ss:$12 sps:$4 sm:$0xff]  }
  0xf1   : > { %v8514_v45 = vld [vmem:[%s9528_s6 + $0xb70] ss:$12 sps:$4 sm:$0xff]   ;;  %v8520_v51 = vld [vmem:[%s9528_s6 + $0xb88] ss:$12 sps:$4 sm:$0xff]  }
  0xf2   : > { %5518 = vmatpush1.bf16.msra.mxu1 %v8385_v60  ;;  %v252_v60 = vld [vmem:[#allocation2 + $0x178] sm:$0xff] }
  0xf3   : > { %5690 = vmatpush1.bf16.msra.mxu0 %v8388_v61  ;;  %5519 = vmatprep.subr.bf16.mxu1 %v8393_v62  ;;  %v8454_v61 = vld [vmem:[%s9528_s6 + $0xa80] ss:$12 sps:$4 sm:$0xff]   ;;  %v8459_v62 = vld [vmem:[%s9528_s6 + $0x49c] ss:$12 sps:$4 sm:$0xff]  }
  0xf4   : > { %5691 = vmatprep.subr.bf16.mxu0 %v8396_v63  ;;  %v8462_v63 = vld [vmem:[%s9528_s6 + $0xa9c] ss:$12 sps:$4 sm:$0xff]  }
  0xf6   : > { %5520 = vmatpush1.bf16.msra.mxu1 %v8391_v0  ;;  %v9766_v0 = vpack.c.bf16 %v244_v54, %v212_v53  ;;  %v8525_v53 = vld [vmem:[%s9528_s6 + $0x5a4] ss:$12 sps:$4 sm:$0xff]  }
  0xf7   : > { %5692 = vmatpush1.bf16.msra.mxu0 %v8394_v1  ;;  %5521 = vmatprep.subr.bf16.mxu1 %v8399_v2  ;;  %v9768_v1 = vpack.c.bf16 %v252_v60, %v220_v57  ;;  %v8457_v2 = vld [vmem:[%s9528_s6 + $0x498] ss:$12 sps:$4 sm:$0xff]   ;;  %v8526_v57 = vld [vmem:[%s9528_s6 + $0xba0] ss:$12 sps:$4 sm:$0xff]   ;;  %v8531_v60 = vld [vmem:[%s9528_s6 + $0x5bc] ss:$12 sps:$4 sm:$0xff]  }
  0xf8   : > { %5693 = vmatprep.subr.bf16.mxu0 %v8402_v3  ;;  %v8460_v3 = vld [vmem:[%s9528_s6 + $0xa98] ss:$12 sps:$4 sm:$0xff]  }
  0xf9   : > { %v8528_v54 = vld [vmem:[%s9528_s6 + $0xba4] ss:$12 sps:$4 sm:$0xff]  }
  0xfa   : > { %5522 = vmatpush1.bf16.msra.mxu1 %v8397_v4  ;;  %v8465_v4 = vld [vmem:[%s9528_s6 + $0x4b4] ss:$12 sps:$4 sm:$0xff]  }
  0xfb   : > { %5694 = vmatpush1.bf16.msra.mxu0 %v8400_v5  ;;  %5523 = vmatprep.subr.bf16.mxu1 %v8405_v6  ;;  %v8468_v5 = vld [vmem:[%s9528_s6 + $0xab4] ss:$12 sps:$4 sm:$0xff]   ;;  %v8463_v6 = vld [vmem:[%s9528_s6 + $0x4b0] ss:$12 sps:$4 sm:$0xff]  }
  0xfc   : > { %5695 = vmatprep.subr.bf16.mxu0 %v8408_v7  ;;  %v8466_v7 = vld [vmem:[%s9528_s6 + $0xab0] ss:$12 sps:$4 sm:$0xff]  }
  0xfe   : > { %5524 = vmatpush1.bf16.msra.mxu1 %v8403_v8  ;;  %v8471_v8 = vld [vmem:[%s9528_s6 + $0x4cc] ss:$12 sps:$4 sm:$0xff]  }
  0xff   : > { %5696 = vmatpush1.bf16.msra.mxu0 %v8406_v9  ;;  %5525 = vmatprep.subr.bf16.mxu1 %v8411_v10  ;;  %v8474_v9 = vld [vmem:[%s9528_s6 + $0xacc] ss:$12 sps:$4 sm:$0xff]   ;;  %v8469_v10 = vld [vmem:[%s9528_s6 + $0x4c8] ss:$12 sps:$4 sm:$0xff]  }
 0x100   : > { %5697 = vmatprep.subr.bf16.mxu0 %v8414_v11  ;;  %v8472_v11 = vld [vmem:[%s9528_s6 + $0xac8] ss:$12 sps:$4 sm:$0xff]  }
 0x102   : > { %5526 = vmatpush1.bf16.msra.mxu1 %v8409_v12  ;;  %v8477_v12 = vld [vmem:[%s9528_s6 + $0x4e4] ss:$12 sps:$4 sm:$0xff]  }
 0x103   : > { %5698 = vmatpush1.bf16.msra.mxu0 %v8412_v13  ;;  %5527 = vmatprep.subr.bf16.mxu1 %v8417_v16  ;;  %v8480_v13 = vld [vmem:[%s9528_s6 + $0xae4] ss:$12 sps:$4 sm:$0xff]   ;;  %v8475_v16 = vld [vmem:[%s9528_s6 + $0x4e0] ss:$12 sps:$4 sm:$0xff]  }
 0x104   : > { %5699 = vmatprep.subr.bf16.mxu0 %v8420_v17  ;;  %v8478_v17 = vld [vmem:[%s9528_s6 + $0xae0] ss:$12 sps:$4 sm:$0xff]  }
 0x106   : > { %5528 = vmatpush1.bf16.msra.mxu1 %v8415_v18  ;;  %v8483_v18 = vld [vmem:[%s9528_s6 + $0x4fc] ss:$12 sps:$4 sm:$0xff]  }
 0x107   : > { %5700 = vmatpush1.bf16.msra.mxu0 %v8418_v19  ;;  %5529 = vmatprep.subr.bf16.mxu1 %v8423_v20  ;;  %v8486_v19 = vld [vmem:[%s9528_s6 + $0xafc] ss:$12 sps:$4 sm:$0xff]   ;;  %v8481_v20 = vld [vmem:[%s9528_s6 + $0x4f8] ss:$12 sps:$4 sm:$0xff]  }
 0x108   : > { %5701 = vmatprep.subr.bf16.mxu0 %v8426_v21  ;;  %v8484_v21 = vld [vmem:[%s9528_s6 + $0xaf8] ss:$12 sps:$4 sm:$0xff]  }
 0x10a   : > { %5530 = vmatpush1.bf16.msra.mxu1 %v8421_v22  ;;  %v8489_v22 = vld [vmem:[%s9528_s6 + $0x514] ss:$12 sps:$4 sm:$0xff]  }
 0x10b   : > { %5702 = vmatpush1.bf16.msra.mxu0 %v8424_v23  ;;  %5531 = vmatprep.subr.bf16.mxu1 %v8429_v24  ;;  %v8492_v23 = vld [vmem:[%s9528_s6 + $0xb14] ss:$12 sps:$4 sm:$0xff]   ;;  %v8487_v24 = vld [vmem:[%s9528_s6 + $0x510] ss:$12 sps:$4 sm:$0xff]  }
 0x10c   : > { %5703 = vmatprep.subr.bf16.mxu0 %v8432_v25  ;;  %v8490_v25 = vld [vmem:[%s9528_s6 + $0xb10] ss:$12 sps:$4 sm:$0xff]  }
 0x10e   : > { %5532 = vmatpush1.bf16.msra.mxu1 %v8427_v26  ;;  %v8495_v26 = vld [vmem:[%s9528_s6 + $0x52c] ss:$12 sps:$4 sm:$0xff]  }
 0x10f   : > { %5704 = vmatpush1.bf16.msra.mxu0 %v8430_v27  ;;  %5533 = vmatprep.subr.bf16.mxu1 %v8435_v28  ;;  %v8498_v27 = vld [vmem:[%s9528_s6 + $0xb2c] ss:$12 sps:$4 sm:$0xff]   ;;  %v8493_v28 = vld [vmem:[%s9528_s6 + $0x528] ss:$12 sps:$4 sm:$0xff]  }
 0x110   : > { %5705 = vmatprep.subr.bf16.mxu0 %v8438_v29  ;;  %v8496_v29 = vld [vmem:[%s9528_s6 + $0xb28] ss:$12 sps:$4 sm:$0xff]  }
 0x112   : > { %5534 = vmatpush1.bf16.msra.mxu1 %v8433_v32  ;;  %v8501_v32 = vld [vmem:[%s9528_s6 + $0x544] ss:$12 sps:$4 sm:$0xff]  }
 0x113   : > { %5706 = vmatpush1.bf16.msra.mxu0 %v8436_v33  ;;  %5535 = vmatprep.subr.bf16.mxu1 %v8441_v34  ;;  %v8504_v33 = vld [vmem:[%s9528_s6 + $0xb44] ss:$12 sps:$4 sm:$0xff]   ;;  %v8499_v34 = vld [vmem:[%s9528_s6 + $0x540] ss:$12 sps:$4 sm:$0xff]  }
 0x114   : > { %5707 = vmatprep.subr.bf16.mxu0 %v8444_v35  ;;  %v8502_v35 = vld [vmem:[%s9528_s6 + $0xb40] ss:$12 sps:$4 sm:$0xff]  }
 0x116   : > { %5536 = vmatpush1.bf16.msra.mxu1 %v8439_v36  ;;  %v8507_v36 = vld [vmem:[%s9528_s6 + $0x55c] ss:$12 sps:$4 sm:$0xff]  }
 0x117   : > { %5708 = vmatpush1.bf16.msra.mxu0 %v8442_v37  ;;  %5537 = vmatprep.subr.bf16.mxu1 %v8447_v38  ;;  %v8510_v37 = vld [vmem:[%s9528_s6 + $0xb5c] ss:$12 sps:$4 sm:$0xff]   ;;  %v8505_v38 = vld [vmem:[%s9528_s6 + $0x558] ss:$12 sps:$4 sm:$0xff]  }
 0x118   : > { %5709 = vmatprep.subr.bf16.mxu0 %v8450_v39  ;;  %v8508_v39 = vld [vmem:[%s9528_s6 + $0xb58] ss:$12 sps:$4 sm:$0xff]  }
 0x11a   : > { %5538 = vmatpush1.bf16.msra.mxu1 %v8445_v41  ;;  %v8513_v41 = vld [vmem:[%s9528_s6 + $0x574] ss:$12 sps:$4 sm:$0xff]  }
 0x11b   : > { %5710 = vmatpush1.bf16.msra.mxu0 %v8448_v42  ;;  %5550 = vmatprep.subr.bf16.mxu1 %v8453_v48  ;;  %v8516_v42 = vld [vmem:[%s9528_s6 + $0xb74] ss:$12 sps:$4 sm:$0xff]   ;;  %v8519_v48 = vld [vmem:[%s9528_s6 + $0x58c] ss:$12 sps:$4 sm:$0xff]  }
 0x11c   : > { %5722 = vmatprep.subr.bf16.mxu0 %v8456_v49  ;;  %v8522_v49 = vld [vmem:[%s9528_s6 + $0xb8c] ss:$12 sps:$4 sm:$0xff]  }
 0x11d   : > { %5540 = vmatmul.mubr.bf16.vlgmr.msra.gmra.mrb[0].mxu1 %v9759_v58 }
 0x11e   : > { %5712 = vmatmul.mubr.bf16.vlgmr.msra.gmra.mrb[0].mxu0 %v9761_v59  ;;  %5551 = vmatpush1.bf16.msra.mxu1 %v8451_v56  ;;  %v8523_v56 = vld [vmem:[%s9528_s6 + $0x5a0] ss:$12 sps:$4 sm:$0xff]  }
 0x11f   : > { %5723 = vmatpush1.bf16.msra.mxu0 %v8454_v61  ;;  %5552 = vmatprep.subr.bf16.mxu1 %v8459_v62  ;;  %v8534_v61 = vld [vmem:[%s9528_s6 + $0xbbc] ss:$12 sps:$4 sm:$0xff]   ;;  %v8529_v62 = vld [vmem:[%s9528_s6 + $0x5b8] ss:$12 sps:$4 sm:$0xff]  }
 0x120   : > { %5724 = vmatprep.subr.bf16.mxu0 %v8462_v63  ;;  %5582 = vmatprep.mubr.bf16.mxu1 %v9766_v0  ;;  %v8532_v63 = vld [vmem:[%s9528_s6 + $0xbb8] ss:$12 sps:$4 sm:$0xff]  }
 0x121   : > { %5754 = vmatprep.mubr.bf16.mxu0 %v9768_v1 }
 0x122   : > { %5553 = vmatpush1.bf16.msra.mxu1 %v8457_v2  ;;  %v8537_v2 = vld [vmem:[%s9528_s6 + $0x5d4] ss:$12 sps:$4 sm:$0xff]  }
 0x123   : > { %5725 = vmatpush1.bf16.msra.mxu0 %v8460_v3  ;;  %5554 = vmatprep.subr.bf16.mxu1 %v8465_v4  ;;  %v8540_v3 = vld [vmem:[%s9528_s6 + $0xbd4] ss:$12 sps:$4 sm:$0xff]   ;;  %v8535_v4 = vld [vmem:[%s9528_s6 + $0x5d0] ss:$12 sps:$4 sm:$0xff]  }
 0x124   : > { %5726 = vmatprep.subr.bf16.mxu0 %v8468_v5  ;;  %v8538_v5 = vld [vmem:[%s9528_s6 + $0xbd0] ss:$12 sps:$4 sm:$0xff]  }
 0x126   : > { %5555 = vmatpush1.bf16.msra.mxu1 %v8463_v6  ;;  %v8543_v6 = vld [vmem:[%s9528_s6 + $0x5ec] ss:$12 sps:$4 sm:$0xff]  }
 0x127   : > { %5727 = vmatpush1.bf16.msra.mxu0 %v8466_v7  ;;  %5556 = vmatprep.subr.bf16.mxu1 %v8471_v8  ;;  %v8546_v7 = vld [vmem:[%s9528_s6 + $0xbec] ss:$12 sps:$4 sm:$0xff]   ;;  %v8541_v8 = vld [vmem:[%s9528_s6 + $0x5e8] ss:$12 sps:$4 sm:$0xff]  }
 0x128   : > { %5728 = vmatprep.subr.bf16.mxu0 %v8474_v9  ;;  %v8544_v9 = vld [vmem:[%s9528_s6 + $0xbe8] ss:$12 sps:$4 sm:$0xff]  }
 0x12a   : > { %5557 = vmatpush1.bf16.msra.mxu1 %v8469_v10  ;;  %v211_v10 = vld [vmem:[#allocation2 + $0x30] sm:$0xff] }
 0x12b   : > { %5729 = vmatpush1.bf16.msra.mxu0 %v8472_v11  ;;  %5558 = vmatprep.subr.bf16.mxu1 %v8477_v12  ;;  %v243_v11 = vld [vmem:[#allocation2 + $0x130] sm:$0xff] }
 0x12c   : > { %5730 = vmatprep.subr.bf16.mxu0 %v8480_v13  ;;  %v219_v12 = vld [vmem:[#allocation2 + $0x70] sm:$0xff] }
 0x12d   : > { %v251_v13 = vld [vmem:[#allocation2 + $0x170] sm:$0xff] }
 0x12e   : > { %5559 = vmatpush1.bf16.msra.mxu1 %v8475_v16  ;;  %v8549_v16 = vld [vmem:[%s9528_s6 + $0xc04] ss:$12 sps:$4 sm:$0xff]  }
 0x12f   : > { %5731 = vmatpush1.bf16.msra.mxu0 %v8478_v17  ;;  %5560 = vmatprep.subr.bf16.mxu1 %v8483_v18  ;;  %v8550_v17 = vld [vmem:[%s9528_s6 + $0xc8] ss:$12 sps:$4 sm:$0xff]   ;;  %v8547_v18 = vld [vmem:[%s9528_s6 + $0xc00] ss:$12 sps:$4 sm:$0xff]  }
 0x130   : > { %5732 = vmatprep.subr.bf16.mxu0 %v8486_v19  ;;  %v8551_v19 = vld [vmem:[%s9528_s6 + $0x8] ss:$12 sps:$4 sm:$0xff]  }
 0x132   : > { %5561 = vmatpush1.bf16.msra.mxu1 %v8481_v20  ;;  %v222_v20 = vld [vmem:[#allocation2 + $0x88] sm:$0xff] }
 0x133   : > { %5733 = vmatpush1.bf16.msra.mxu0 %v8484_v21  ;;  %5562 = vmatprep.subr.bf16.mxu1 %v8489_v22  ;;  %v9836_v21 = vpack.c.bf16 %v243_v11, %v211_v10  ;;  %v9838_v22 = vpack.c.bf16 %v251_v13, %v219_v12  ;;  %v8597_v10 = vld [vmem:[%s9528_s6 + $0xcf0] ss:$12 sps:$4 sm:$0xff]   ;;  %v8601_v11 = vld [vmem:[%s9528_s6 + $0x1b8] ss:$12 sps:$4 sm:$0xff]   ;;  %v8602_v13 = vld [vmem:[%s9528_s6 + $0xd08] ss:$12 sps:$4 sm:$0xff]  }
 0x134   : > { %5734 = vmatprep.subr.bf16.mxu0 %v8492_v23  ;;  %v254_v23 = vld [vmem:[#allocation2 + $0x188] sm:$0xff]  ;;  %v8605_v12 = vld [vmem:[%s9528_s6 + $0x290] ss:$12 sps:$4 sm:$0xff]  }
 0x136   : > { %5563 = vmatpush1.bf16.msra.mxu1 %v8487_v24  ;;  %v8554_v24 = vld [vmem:[%s9528_s6 + $0xc1c] ss:$12 sps:$4 sm:$0xff]  }
 0x137   : > { %5735 = vmatpush1.bf16.msra.mxu0 %v8490_v25  ;;  %5564 = vmatprep.subr.bf16.mxu1 %v8495_v26  ;;  %v8555_v25 = vld [vmem:[%s9528_s6 + $0xe0] ss:$12 sps:$4 sm:$0xff]   ;;  %v9842_v26 = vpack.c.bf16 %v254_v23, %v222_v20  ;;  %v8614_v20 = vld [vmem:[%s9528_s6 + $0xd3c] ss:$12 sps:$4 sm:$0xff]  }
 0x138   : > { %5736 = vmatprep.subr.bf16.mxu0 %v8498_v27  ;;  %v8552_v27 = vld [vmem:[%s9528_s6 + $0xc18] ss:$12 sps:$4 sm:$0xff]   ;;  %v8615_v23 = vld [vmem:[%s9528_s6 + $0x2c0] ss:$12 sps:$4 sm:$0xff]  }
 0x13a   : > { %5565 = vmatpush1.bf16.msra.mxu1 %v8493_v28  ;;  %v8556_v28 = vld [vmem:[%s9528_s6 + $0x20] ss:$12 sps:$4 sm:$0xff]  }
 0x13b   : > { %5737 = vmatpush1.bf16.msra.mxu0 %v8496_v29  ;;  %5566 = vmatprep.subr.bf16.mxu1 %v8501_v32  ;;  %v8559_v29 = vld [vmem:[%s9528_s6 + $0xc34] ss:$12 sps:$4 sm:$0xff]   ;;  %v8560_v32 = vld [vmem:[%s9528_s6 + $0xf8] ss:$12 sps:$4 sm:$0xff]  }
 0x13c   : > { %5738 = vmatprep.subr.bf16.mxu0 %v8504_v33  ;;  %v8557_v33 = vld [vmem:[%s9528_s6 + $0xc30] ss:$12 sps:$4 sm:$0xff]  }
 0x13e   : > { %5567 = vmatpush1.bf16.msra.mxu1 %v8499_v34  ;;  %v8561_v34 = vld [vmem:[%s9528_s6 + $0x38] ss:$12 sps:$4 sm:$0xff]  }
 0x13f   : > { %5739 = vmatpush1.bf16.msra.mxu0 %v8502_v35  ;;  %5568 = vmatprep.subr.bf16.mxu1 %v8507_v36  ;;  %v8564_v35 = vld [vmem:[%s9528_s6 + $0xc4c] ss:$12 sps:$4 sm:$0xff]   ;;  %v8565_v36 = vld [vmem:[%s9528_s6 + $0x110] ss:$12 sps:$4 sm:$0xff]  }
 0x140   : > { %5740 = vmatprep.subr.bf16.mxu0 %v8510_v37  ;;  %v8562_v37 = vld [vmem:[%s9528_s6 + $0xc48] ss:$12 sps:$4 sm:$0xff]  }
 0x142   : > { %5569 = vmatpush1.bf16.msra.mxu1 %v8505_v38  ;;  %v8566_v38 = vld [vmem:[%s9528_s6 + $0x50] ss:$12 sps:$4 sm:$0xff]  }
 0x143   : > { %5741 = vmatpush1.bf16.msra.mxu0 %v8508_v39  ;;  %5570 = vmatprep.subr.bf16.mxu1 %v8513_v41  ;;  %v8570_v39 = vld [vmem:[%s9528_s6 + $0x128] ss:$12 sps:$4 sm:$0xff]   ;;  %v8567_v41 = vld [vmem:[%s9528_s6 + $0xc60] ss:$12 sps:$4 sm:$0xff]  }
 0x144   : > { %5742 = vmatprep.subr.bf16.mxu0 %v8516_v42  ;;  %v8571_v42 = vld [vmem:[%s9528_s6 + $0x68] ss:$12 sps:$4 sm:$0xff]  }
 0x146   : > { %5571 = vmatpush1.bf16.msra.mxu1 %v8511_v43  ;;  %v8574_v43 = vld [vmem:[%s9528_s6 + $0xc7c] ss:$12 sps:$4 sm:$0xff]  }
 0x147   : > { %5743 = vmatpush1.bf16.msra.mxu0 %v8514_v45  ;;  %5572 = vmatprep.subr.bf16.mxu1 %v8519_v48  ;;  %v8575_v45 = vld [vmem:[%s9528_s6 + $0x140] ss:$12 sps:$4 sm:$0xff]   ;;  %v8572_v48 = vld [vmem:[%s9528_s6 + $0xc78] ss:$12 sps:$4 sm:$0xff]  }
 0x148   : > { %5744 = vmatprep.subr.bf16.mxu0 %v8522_v49  ;;  %v8576_v49 = vld [vmem:[%s9528_s6 + $0x80] ss:$12 sps:$4 sm:$0xff]  }
 0x14a   : > { %5573 = vmatpush1.bf16.msra.mxu1 %v8517_v50  ;;  %v8579_v50 = vld [vmem:[%s9528_s6 + $0xc94] ss:$12 sps:$4 sm:$0xff]  }
 0x14b   : > { %5745 = vmatpush1.bf16.msra.mxu0 %v8520_v51  ;;  %5574 = vmatprep.subr.bf16.mxu1 %v8525_v53  ;;  %v8580_v51 = vld [vmem:[%s9528_s6 + $0x158] ss:$12 sps:$4 sm:$0xff]   ;;  %v8577_v53 = vld [vmem:[%s9528_s6 + $0xc90] ss:$12 sps:$4 sm:$0xff]  }
 0x14c   : > { %5746 = vmatprep.subr.bf16.mxu0 %v8528_v54  ;;  %v8581_v54 = vld [vmem:[%s9528_s6 + $0x98] ss:$12 sps:$4 sm:$0xff]  }
 0x14e   : > { %5575 = vmatpush1.bf16.msra.mxu1 %v8523_v56  ;;  %v8584_v56 = vld [vmem:[%s9528_s6 + $0xcac] ss:$12 sps:$4 sm:$0xff]  }
 0x14f   : > { %5747 = vmatpush1.bf16.msra.mxu0 %v8526_v57  ;;  %5576 = vmatprep.subr.bf16.mxu1 %v8531_v60  ;;  %v8585_v57 = vld [vmem:[%s9528_s6 + $0x170] ss:$12 sps:$4 sm:$0xff]   ;;  %v8582_v60 = vld [vmem:[%s9528_s6 + $0xca8] ss:$12 sps:$4 sm:$0xff]  }
 0x150   : > { %5748 = vmatprep.subr.bf16.mxu0 %v8534_v61  ;;  %v8586_v61 = vld [vmem:[%s9528_s6 + $0xb0] ss:$12 sps:$4 sm:$0xff]  }
 0x152   : > { %5577 = vmatpush1.bf16.msra.mxu1 %v8529_v62  ;;  %v8589_v62 = vld [vmem:[%s9528_s6 + $0xcc4] ss:$12 sps:$4 sm:$0xff]  }
 0x153   : > { %5749 = vmatpush1.bf16.msra.mxu0 %v8532_v63  ;;  %5578 = vmatprep.subr.bf16.mxu1 %v8537_v2  ;;  %v8590_v63 = vld [vmem:[%s9528_s6 + $0x248] ss:$12 sps:$4 sm:$0xff]   ;;  %v8587_v2 = vld [vmem:[%s9528_s6 + $0xcc0] ss:$12 sps:$4 sm:$0xff]  }
 0x154   : > { %5750 = vmatprep.subr.bf16.mxu0 %v8540_v3  ;;  %v8591_v3 = vld [vmem:[%s9528_s6 + $0x188] ss:$12 sps:$4 sm:$0xff]  }
 0x156   : > { %5579 = vmatpush1.bf16.msra.mxu1 %v8535_v4  ;;  %v8594_v4 = vld [vmem:[%s9528_s6 + $0xcdc] ss:$12 sps:$4 sm:$0xff]  }
 0x157   : > { %5751 = vmatpush1.bf16.msra.mxu0 %v8538_v5  ;;  %5580 = vmatprep.subr.bf16.mxu1 %v8543_v6  ;;  %v8595_v5 = vld [vmem:[%s9528_s6 + $0x260] ss:$12 sps:$4 sm:$0xff]   ;;  %v8592_v6 = vld [vmem:[%s9528_s6 + $0xcd8] ss:$12 sps:$4 sm:$0xff]  }
 0x158   : > { %5752 = vmatprep.subr.bf16.mxu0 %v8546_v7  ;;  %v8596_v7 = vld [vmem:[%s9528_s6 + $0x1a0] ss:$12 sps:$4 sm:$0xff]  }
 0x15a   : > { %5581 = vmatpush1.bf16.msra.mxu1 %v8541_v8  ;;  %v8599_v8 = vld [vmem:[%s9528_s6 + $0xcf4] ss:$12 sps:$4 sm:$0xff]  }
 0x15b   : > { %5753 = vmatpush1.bf16.msra.mxu0 %v8544_v9  ;;  %7667 = vmatprep.subr.bf16.mxu1 %v8550_v17  ;;  %v8600_v9 = vld [vmem:[%s9528_s6 + $0x278] ss:$12 sps:$4 sm:$0xff]   ;;  %v8610_v17 = vld [vmem:[%s9528_s6 + $0x2a8] ss:$12 sps:$4 sm:$0xff]  }
 0x15c   : > { %5765 = vmatprep.subr.bf16.mxu0 %v8549_v16  ;;  %v8606_v16 = vld [vmem:[%s9528_s6 + $0x1d0] ss:$12 sps:$4 sm:$0xff]  }
 0x15d   : > { %5583 = vmatmul.mubr.bf16.vlgmr.msra.gmra.mrb[0].mxu1 %v9836_v21 }
 0x15e   : > { %5755 = vmatmul.mubr.bf16.vlgmr.msra.gmra.mrb[0].mxu0 %v9838_v22  ;;  %7668 = vmatpush3.bf16.msra.mxu1 %v8551_v19  ;;  %v8611_v19 = vld [vmem:[%s9528_s6 + $0x1e8] ss:$12 sps:$4 sm:$0xff]  }
 0x15f   : > { %5766 = vmatpush1.bf16.msra.mxu0 %v8547_v18  ;;  %7669 = vmatprep.subr.bf16.mxu1 %v8555_v25  ;;  %v8607_v18 = vld [vmem:[%s9528_s6 + $0xd20] ss:$12 sps:$4 sm:$0xff]  }
 0x160   : > { %5767 = vmatprep.subr.bf16.mxu0 %v8554_v24  ;;  %6141 = vmatprep.mubr.bf16.mxu1 %v9584_v52  ;;  %v8569_v52 = vld [vmem:[%s9528_s6 + $0xc64] ss:$12 sps:$4 sm:$0xff]   ;;  %v8616_v25 = vld [vmem:[%s9528_s6 + $0x200] ss:$12 sps:$4 sm:$0xff]  }
 0x161   : > { %5797 = vmatprep.mubr.bf16.mxu0 %v9842_v26  ;;  %v8612_v24 = vld [vmem:[%s9528_s6 + $0xd38] ss:$12 sps:$4 sm:$0xff]  }
 0x162   : > { %7670 = vmatpush3.bf16.msra.mxu1 %v8556_v28  ;;  %v8620_v28 = vld [vmem:[%s9528_s6 + $0x2d8] ss:$12 sps:$4 sm:$0xff]  }
 0x163   : > { %5768 = vmatpush1.bf16.msra.mxu0 %v8552_v27  ;;  %7671 = vmatprep.subr.bf16.mxu1 %v8560_v32  ;;  %v8619_v27 = vld [vmem:[%s9528_s6 + $0xd54] ss:$12 sps:$4 sm:$0xff]   ;;  %v8621_v32 = vld [vmem:[%s9528_s6 + $0x218] ss:$12 sps:$4 sm:$0xff]  }
 0x164   : > { %5769 = vmatprep.subr.bf16.mxu0 %v8559_v29  ;;  %v8617_v29 = vld [vmem:[%s9528_s6 + $0xd50] ss:$12 sps:$4 sm:$0xff]  }
 0x166   : > { %7672 = vmatpush3.bf16.msra.mxu1 %v8561_v34  ;;  %v8625_v34 = vld [vmem:[%s9528_s6 + $0x2f0] ss:$12 sps:$4 sm:$0xff]  }
 0x167   : > { %5770 = vmatpush1.bf16.msra.mxu0 %v8557_v33  ;;  %7673 = vmatprep.subr.bf16.mxu1 %v8565_v36  ;;  %v8624_v33 = vld [vmem:[%s9528_s6 + $0xd6c] ss:$12 sps:$4 sm:$0xff]   ;;  %v8626_v36 = vld [vmem:[%s9528_s6 + $0x230] ss:$12 sps:$4 sm:$0xff]  }
 0x168   : > { %5771 = vmatprep.subr.bf16.mxu0 %v8564_v35  ;;  %v8622_v35 = vld [vmem:[%s9528_s6 + $0xd68] ss:$12 sps:$4 sm:$0xff]  }
 0x16a   : > { %7674 = vmatpush3.bf16.msra.mxu1 %v8566_v38  ;;  %v221_v38 = vld [vmem:[#allocation2 + $0x80] sm:$0xff] }
 0x16b   : > { %5772 = vmatpush1.bf16.msra.mxu0 %v8562_v37  ;;  %7675 = vmatprep.subr.bf16.mxu1 %v8570_v39  ;;  %v8629_v37 = vld [vmem:[%s9528_s6 + $0xd84] ss:$12 sps:$4 sm:$0xff]   ;;  %v8630_v39 = vld [vmem:[%s9528_s6 + $0x3c8] ss:$12 sps:$4 sm:$0xff]  }
 0x16c   : > { %5773 = vmatprep.subr.bf16.mxu0 %v8569_v52  ;;  %v253_v52 = vld [vmem:[#allocation2 + $0x180] sm:$0xff] }
 0x16e   : > { %7676 = vmatpush3.bf16.msra.mxu1 %v8571_v42  ;;  %v224_v42 = vld [vmem:[#allocation2 + $0x98] sm:$0xff] }
 0x16f   : > { %5774 = vmatpush1.bf16.msra.mxu0 %v8567_v41  ;;  %7677 = vmatprep.subr.bf16.mxu1 %v8575_v45  ;;  %v8627_v41 = vld [vmem:[%s9528_s6 + $0xd80] ss:$12 sps:$4 sm:$0xff]   ;;  %v256_v45 = vld [vmem:[#allocation2 + $0x198] sm:$0xff] }
 0x170   : > { %5775 = vmatprep.subr.bf16.mxu0 %v8574_v43  ;;  %v9911_v43 = vpack.c.bf16 %v253_v52, %v221_v38  ;;  %v8690_v38 = vld [vmem:[%s9528_s6 + $0x5a8] ss:$12 sps:$4 sm:$0xff]   ;;  %v8687_v52 = vld [vmem:[%s9528_s6 + $0xea0] ss:$12 sps:$4 sm:$0xff]  }
 0x172   : > { %7678 = vmatpush3.bf16.msra.mxu1 %v8576_v49  ;;  %v8634_v49 = vld [vmem:[%s9528_s6 + $0xd9c] ss:$12 sps:$4 sm:$0xff]  }
 0x173   : > { %5776 = vmatpush1.bf16.msra.mxu0 %v8572_v48  ;;  %7679 = vmatprep.subr.bf16.mxu1 %v8580_v51  ;;  %v8631_v48 = vld [vmem:[%s9528_s6 + $0x308] ss:$12 sps:$4 sm:$0xff]   ;;  %v8632_v51 = vld [vmem:[%s9528_s6 + $0xd98] ss:$12 sps:$4 sm:$0xff]  }
 0x174   : > { %5777 = vmatprep.subr.bf16.mxu0 %v8579_v50  ;;  %v8635_v50 = vld [vmem:[%s9528_s6 + $0x3e0] ss:$12 sps:$4 sm:$0xff]  }
 0x176   : > { %7680 = vmatpush3.bf16.msra.mxu1 %v8581_v54  ;;  %v8636_v54 = vld [vmem:[%s9528_s6 + $0x320] ss:$12 sps:$4 sm:$0xff]  }
 0x177   : > { %5778 = vmatpush1.bf16.msra.mxu0 %v8577_v53  ;;  %7681 = vmatprep.subr.bf16.mxu1 %v8585_v57  ;;  %v9917_v53 = vpack.c.bf16 %v256_v45, %v224_v42  ;;  %v8640_v57 = vld [vmem:[%s9528_s6 + $0x3f8] ss:$12 sps:$4 sm:$0xff]   ;;  %v8695_v42 = vld [vmem:[%s9528_s6 + $0x5c0] ss:$12 sps:$4 sm:$0xff]  }
 0x178   : > { %5779 = vmatprep.subr.bf16.mxu0 %v8584_v56  ;;  %v8639_v56 = vld [vmem:[%s9528_s6 + $0xdb4] ss:$12 sps:$4 sm:$0xff]   ;;  %v8692_v45 = vld [vmem:[%s9528_s6 + $0xeb8] ss:$12 sps:$4 sm:$0xff]  }
 0x17a   : > { %7682 = vmatpush3.bf16.msra.mxu1 %v8586_v61  ;;  %v8644_v61 = vld [vmem:[%s9528_s6 + $0xdcc] ss:$12 sps:$4 sm:$0xff]  }
 0x17b   : > { %5780 = vmatpush1.bf16.msra.mxu0 %v8582_v60  ;;  %7689 = vmatprep.subr.bf16.mxu1 %v8590_v63  ;;  %v8637_v60 = vld [vmem:[%s9528_s6 + $0xdb0] ss:$12 sps:$4 sm:$0xff]   ;;  %v8642_v63 = vld [vmem:[%s9528_s6 + $0xdc8] ss:$12 sps:$4 sm:$0xff]  }
 0x17c   : > { %5781 = vmatprep.subr.bf16.mxu0 %v8589_v62  ;;  %v8645_v62 = vld [vmem:[%s9528_s6 + $0x410] ss:$12 sps:$4 sm:$0xff]  }
 0x17d   : > { %6142 = vmatmul.mubr.bf16.vlgmr.msra.gmra.mrb[4].mxu1 %v9608_v14  ;;  %v8604_v14 = vld [vmem:[%s9528_s6 + $0xd0c] ss:$12 sps:$4 sm:$0xff]  }
 0x17e   : > { %7690 = vmatpush3.bf16.msra.mxu1 %v8591_v3  ;;  %6182 = vmatprep.mubr.bf16.mxu1 %v9640_v44  ;;  %v8609_v44 = vld [vmem:[%s9528_s6 + $0xd24] ss:$12 sps:$4 sm:$0xff]   ;;  %v8650_v3 = vld [vmem:[%s9528_s6 + $0x428] ss:$12 sps:$4 sm:$0xff]  }
 0x17f   : > { %5782 = vmatpush1.bf16.msra.mxu0 %v8587_v2  ;;  %7691 = vmatprep.subr.bf16.mxu1 %v8595_v5  ;;  %v8646_v2 = vld [vmem:[%s9528_s6 + $0x350] ss:$12 sps:$4 sm:$0xff]   ;;  %v8651_v5 = vld [vmem:[%s9528_s6 + $0x368] ss:$12 sps:$4 sm:$0xff]  }
 0x180   : > { %5783 = vmatprep.subr.bf16.mxu0 %v8594_v4  ;;  %v8647_v4 = vld [vmem:[%s9528_s6 + $0xde0] ss:$12 sps:$4 sm:$0xff]  }
 0x182   : > { %7692 = vmatpush3.bf16.msra.mxu1 %v8596_v7  ;;  %v8655_v7 = vld [vmem:[%s9528_s6 + $0x440] ss:$12 sps:$4 sm:$0xff]  }
 0x183   : > { %5784 = vmatpush1.bf16.msra.mxu0 %v8592_v6  ;;  %7693 = vmatprep.subr.bf16.mxu1 %v8600_v9  ;;  %v8654_v6 = vld [vmem:[%s9528_s6 + $0xdfc] ss:$12 sps:$4 sm:$0xff]   ;;  %v8656_v9 = vld [vmem:[%s9528_s6 + $0x380] ss:$12 sps:$4 sm:$0xff]  }
 0x184   : > { %5785 = vmatprep.subr.bf16.mxu0 %v8599_v8  ;;  %v8652_v8 = vld [vmem:[%s9528_s6 + $0xdf8] ss:$12 sps:$4 sm:$0xff]  }
 0x186   : > { %7694 = vmatpush3.bf16.msra.mxu1 %v8601_v11  ;;  %v8660_v11 = vld [vmem:[%s9528_s6 + $0x458] ss:$12 sps:$4 sm:$0xff]  }
 0x187   : > { %5786 = vmatpush1.bf16.msra.mxu0 %v8597_v10  ;;  %7695 = vmatprep.subr.bf16.mxu1 %v8605_v12  ;;  %v8659_v10 = vld [vmem:[%s9528_s6 + $0xe14] ss:$12 sps:$4 sm:$0xff]   ;;  %v8661_v12 = vld [vmem:[%s9528_s6 + $0x398] ss:$12 sps:$4 sm:$0xff]  }
 0x188   : > { %5787 = vmatprep.subr.bf16.mxu0 %v8604_v14  ;;  %v8657_v14 = vld [vmem:[%s9528_s6 + $0xe10] ss:$12 sps:$4 sm:$0xff]  }
 0x18a   : > { %7696 = vmatpush3.bf16.msra.mxu1 %v8606_v16  ;;  %v8665_v16 = vld [vmem:[%s9528_s6 + $0x470] ss:$12 sps:$4 sm:$0xff]  }
 0x18b   : > { %5788 = vmatpush1.bf16.msra.mxu0 %v8602_v13  ;;  %7697 = vmatprep.subr.bf16.mxu1 %v8610_v17  ;;  %v8664_v13 = vld [vmem:[%s9528_s6 + $0xe2c] ss:$12 sps:$4 sm:$0xff]   ;;  %v8666_v17 = vld [vmem:[%s9528_s6 + $0x3b0] ss:$12 sps:$4 sm:$0xff]  }
 0x18c   : > { %5789 = vmatprep.subr.bf16.mxu0 %v8609_v44  ;;  %v8662_v44 = vld [vmem:[%s9528_s6 + $0xe28] ss:$12 sps:$4 sm:$0xff]  }
 0x18e   : > { %7698 = vmatpush3.bf16.msra.mxu1 %v8611_v19  ;;  %v8670_v19 = vld [vmem:[%s9528_s6 + $0x548] ss:$12 sps:$4 sm:$0xff]  }
 0x18f   : > { %5790 = vmatpush1.bf16.msra.mxu0 %v8607_v18  ;;  %7699 = vmatprep.subr.bf16.mxu1 %v8615_v23  ;;  %v8669_v18 = vld [vmem:[%s9528_s6 + $0xe44] ss:$12 sps:$4 sm:$0xff]   ;;  %v8671_v23 = vld [vmem:[%s9528_s6 + $0x488] ss:$12 sps:$4 sm:$0xff]  }
 0x190   : > { %5791 = vmatprep.subr.bf16.mxu0 %v8614_v20  ;;  %v8667_v20 = vld [vmem:[%s9528_s6 + $0xe40] ss:$12 sps:$4 sm:$0xff]  }
 0x192   : > { %7700 = vmatpush3.bf16.msra.mxu1 %v8616_v25  ;;  %v8675_v25 = vld [vmem:[%s9528_s6 + $0x560] ss:$12 sps:$4 sm:$0xff]  }
 0x193   : > { %5792 = vmatpush1.bf16.msra.mxu0 %v8612_v24  ;;  %7701 = vmatprep.subr.bf16.mxu1 %v8620_v28  ;;  %v8674_v24 = vld [vmem:[%s9528_s6 + $0xe5c] ss:$12 sps:$4 sm:$0xff]   ;;  %v8676_v28 = vld [vmem:[%s9528_s6 + $0x4a0] ss:$12 sps:$4 sm:$0xff]  }
 0x194   : > { %5793 = vmatprep.subr.bf16.mxu0 %v8619_v27  ;;  %v8672_v27 = vld [vmem:[%s9528_s6 + $0xe58] ss:$12 sps:$4 sm:$0xff]  }
 0x196   : > { %7702 = vmatpush3.bf16.msra.mxu1 %v8621_v32  ;;  %v8680_v32 = vld [vmem:[%s9528_s6 + $0x578] ss:$12 sps:$4 sm:$0xff]  }
 0x197   : > { %5794 = vmatpush1.bf16.msra.mxu0 %v8617_v29  ;;  %7703 = vmatprep.subr.bf16.mxu1 %v8625_v34  ;;  %v8679_v29 = vld [vmem:[%s9528_s6 + $0xe74] ss:$12 sps:$4 sm:$0xff]   ;;  %v8681_v34 = vld [vmem:[%s9528_s6 + $0x4b8] ss:$12 sps:$4 sm:$0xff]  }
 0x198   : > { %5795 = vmatprep.subr.bf16.mxu0 %v8624_v33  ;;  %v8677_v33 = vld [vmem:[%s9528_s6 + $0xe70] ss:$12 sps:$4 sm:$0xff]  }
 0x19a   : > { %7704 = vmatpush3.bf16.msra.mxu1 %v8626_v36  ;;  %v8682_v36 = vld [vmem:[%s9528_s6 + $0xe88] ss:$12 sps:$4 sm:$0xff]  }
 0x19b   : > { %5796 = vmatpush1.bf16.msra.mxu0 %v8622_v35  ;;  %7711 = vmatprep.subr.bf16.mxu1 %v8630_v39  ;;  %v8685_v35 = vld [vmem:[%s9528_s6 + $0x590] ss:$12 sps:$4 sm:$0xff]   ;;  %v8691_v39 = vld [vmem:[%s9528_s6 + $0x4e8] ss:$12 sps:$4 sm:$0xff]  }
 0x19c   : > { %5808 = vmatprep.subr.bf16.mxu0 %v8629_v37  ;;  %v8686_v37 = vld [vmem:[%s9528_s6 + $0x4d0] ss:$12 sps:$4 sm:$0xff]  }
 0x19d   : > { %6183 = vmatmul.mubr.bf16.vlgmr.msra.gmra.mrb[8].mxu1 %v9684_v30  ;;  %v8641_v30 = vld [vmem:[%s9528_s6 + $0x338] ss:$12 sps:$4 sm:$0xff]  }
 0x19e   : > { %5798 = vmatmul.mubr.bf16.vlgmr.msra.gmra.mrb[0].mxu0 %v9911_v43  ;;  %7712 = vmatpush3.bf16.msra.mxu1 %v8631_v48  ;;  %v8696_v48 = vld [vmem:[%s9528_s6 + $0x500] ss:$12 sps:$4 sm:$0xff]  }
 0x19f   : > { %5809 = vmatpush1.bf16.msra.mxu0 %v8627_v41  ;;  %7713 = vmatprep.subr.bf16.mxu1 %v8635_v50  ;;  %v8694_v41 = vld [vmem:[%s9528_s6 + $0xebc] ss:$12 sps:$4 sm:$0xff]   ;;  %v8700_v50 = vld [vmem:[%s9528_s6 + $0x5d8] ss:$12 sps:$4 sm:$0xff]  }
 0x1a0   : > { %5810 = vmatprep.subr.bf16.mxu0 %v8634_v49  ;;  %6223 = vmatprep.mubr.bf16.mxu1 %v9696_v40  ;;  %v8649_v40 = vld [vmem:[%s9528_s6 + $0xde4] ss:$12 sps:$4 sm:$0xff]   ;;  %v8699_v49 = vld [vmem:[%s9528_s6 + $0xed4] ss:$12 sps:$4 sm:$0xff]  }
 0x1a1   : > { %5840 = vmatprep.mubr.bf16.mxu0 %v9917_v53 }
 0x1a2   : > { %7714 = vmatpush3.bf16.msra.mxu1 %v8636_v54  ;;  %v8701_v54 = vld [vmem:[%s9528_s6 + $0x518] ss:$12 sps:$4 sm:$0xff]  }
 0x1a3   : > { %5811 = vmatpush1.bf16.msra.mxu0 %v8632_v51  ;;  %7715 = vmatprep.subr.bf16.mxu1 %v8640_v57  ;;  %v8697_v51 = vld [vmem:[%s9528_s6 + $0xed0] ss:$12 sps:$4 sm:$0xff]  }
 0x1a4   : > { %5812 = vmatprep.subr.bf16.mxu0 %v8639_v56  ;;  %v8704_v56 = vld [vmem:[%s9528_s6 + $0xeec] ss:$12 sps:$4 sm:$0xff]   ;;  %v8705_v57 = vld [vmem:[%s9528_s6 + $0x5f0] ss:$12 sps:$4 sm:$0xff]  }
 0x1a6   : > { %7716 = vmatpush3.bf16.msra.mxu1 %v8641_v30  ;;  %v8706_v30 = vld [vmem:[%s9528_s6 + $0x530] ss:$12 sps:$4 sm:$0xff]  }
 0x1a7   : > { %5813 = vmatpush1.bf16.msra.mxu0 %v8637_v60  ;;  %7717 = vmatprep.subr.bf16.mxu1 %v8645_v62  ;;  %v8702_v60 = vld [vmem:[%s9528_s6 + $0xee8] ss:$12 sps:$4 sm:$0xff]  }
 0x1a8   : > { %5814 = vmatprep.subr.bf16.mxu0 %v8644_v61  ;;  %v8709_v61 = vld [vmem:[%s9528_s6 + $0xf04] ss:$12 sps:$4 sm:$0xff]  }
 0x1a9   : > { %v223_v62 = vld [vmem:[#allocation2 + $0x90] sm:$0xff] }
 0x1aa   : > { %7718 = vmatpush3.bf16.msra.mxu1 %v8646_v2  ;;  %v8710_v2 = vld [vmem:[%s9528_s6 + $0x6c8] ss:$12 sps:$4 sm:$0xff]  }
 0x1ab   : > { %5815 = vmatpush1.bf16.msra.mxu0 %v8642_v63  ;;  %7719 = vmatprep.subr.bf16.mxu1 %v8650_v3  ;;  %v255_v63 = vld [vmem:[#allocation2 + $0x190] sm:$0xff] }
 0x1ac   : > { %5816 = vmatprep.subr.bf16.mxu0 %v8649_v40  ;;  %v8707_v40 = vld [vmem:[%s9528_s6 + $0xf00] ss:$12 sps:$4 sm:$0xff]   ;;  %v8711_v3 = vld [vmem:[%s9528_s6 + $0x608] ss:$12 sps:$4 sm:$0xff]  }
 0x1ae   : > { %7720 = vmatpush3.bf16.msra.mxu1 %v8651_v5  ;;  %v9986_v5 = vpack.c.bf16 %v255_v63, %v223_v62  ;;  %v8771_v62 = vld [vmem:[%s9528_s6 + $0x7e8] ss:$12 sps:$4 sm:$0xff]  }
 0x1af   : > { %5817 = vmatpush1.bf16.msra.mxu0 %v8647_v4  ;;  %7721 = vmatprep.subr.bf16.mxu1 %v8655_v7  ;;  %v226_v4 = vld [vmem:[#allocation2 + $0xa8] sm:$0xff] }
 0x1b0   : > { %5818 = vmatprep.subr.bf16.mxu0 %v8654_v6  ;;  %v258_v6 = vld [vmem:[#allocation2 + $0x1a8] sm:$0xff] }
 0x1b1   : > { %v8714_v7 = vld [vmem:[%s9528_s6 + $0xf1c] ss:$12 sps:$4 sm:$0xff]  }
 0x1b2   : > { %7722 = vmatpush3.bf16.msra.mxu1 %v8656_v9  ;;  %v9990_v9 = vpack.c.bf16 %v258_v6, %v226_v4  ;;  %v8774_v63 = vld [vmem:[%s9528_s6 + $0x103c] ss:$12 sps:$4 sm:$0xff]   ;;  %v8779_v4 = vld [vmem:[%s9528_s6 + $0x1054] ss:$12 sps:$4 sm:$0xff]   ;;  %v8780_v6 = vld [vmem:[%s9528_s6 + $0x8d8] ss:$12 sps:$4 sm:$0xff]  }
 0x1b3   : > { %5819 = vmatpush1.bf16.msra.mxu0 %v8652_v8  ;;  %7723 = vmatprep.subr.bf16.mxu1 %v8660_v11  ;;  %v8715_v8 = vld [vmem:[%s9528_s6 + $0x6e0] ss:$12 sps:$4 sm:$0xff]  }
 0x1b4   : > { %5820 = vmatprep.subr.bf16.mxu0 %v8659_v10  ;;  %v8712_v10 = vld [vmem:[%s9528_s6 + $0xf18] ss:$12 sps:$4 sm:$0xff]   ;;  %v8716_v11 = vld [vmem:[%s9528_s6 + $0x620] ss:$12 sps:$4 sm:$0xff]  }
 0x1b6   : > { %7724 = vmatpush3.bf16.msra.mxu1 %v8661_v12  ;;  %v8720_v12 = vld [vmem:[%s9528_s6 + $0x6f8] ss:$12 sps:$4 sm:$0xff]  }
 0x1b7   : > { %5821 = vmatpush1.bf16.msra.mxu0 %v8657_v14  ;;  %7725 = vmatprep.subr.bf16.mxu1 %v8665_v16  ;;  %v8719_v14 = vld [vmem:[%s9528_s6 + $0xf34] ss:$12 sps:$4 sm:$0xff]   ;;  %v8724_v16 = vld [vmem:[%s9528_s6 + $0xf4c] ss:$12 sps:$4 sm:$0xff]  }
 0x1b8   : > { %5822 = vmatprep.subr.bf16.mxu0 %v8664_v13  ;;  %v8717_v13 = vld [vmem:[%s9528_s6 + $0xf30] ss:$12 sps:$4 sm:$0xff]  }
 0x1ba   : > { %7726 = vmatpush3.bf16.msra.mxu1 %v8666_v17  ;;  %v8722_v17 = vld [vmem:[%s9528_s6 + $0xf48] ss:$12 sps:$4 sm:$0xff]  }
 0x1bb   : > { %5823 = vmatpush1.bf16.msra.mxu0 %v8662_v44  ;;  %7733 = vmatprep.subr.bf16.mxu1 %v8670_v19  ;;  %v8725_v44 = vld [vmem:[%s9528_s6 + $0x710] ss:$12 sps:$4 sm:$0xff]   ;;  %v8730_v19 = vld [vmem:[%s9528_s6 + $0x728] ss:$12 sps:$4 sm:$0xff]  }
 0x1bc   : > { %5824 = vmatprep.subr.bf16.mxu0 %v8669_v18  ;;  %v8726_v18 = vld [vmem:[%s9528_s6 + $0x650] ss:$12 sps:$4 sm:$0xff]  }
 0x1bd   : > { %6224 = vmatmul.mubr.bf16.vlgmr.msra.gmra.mrb[12].mxu1 %v9759_v58  ;;  %v8684_v58 = vld [vmem:[%s9528_s6 + $0xe8c] ss:$12 sps:$4 sm:$0xff]  }
 0x1be   : > { %7734 = vmatpush3.bf16.msra.mxu1 %v8671_v23  ;;  %6264 = vmatprep.mubr.bf16.mxu1 %v9766_v0  ;;  %v8689_v0 = vld [vmem:[%s9528_s6 + $0xea4] ss:$12 sps:$4 sm:$0xff]   ;;  %v8731_v23 = vld [vmem:[%s9528_s6 + $0x668] ss:$12 sps:$4 sm:$0xff]  }
 0x1bf   : > { %5825 = vmatpush1.bf16.msra.mxu0 %v8667_v20  ;;  %7735 = vmatprep.subr.bf16.mxu1 %v8675_v25  ;;  %v8727_v20 = vld [vmem:[%s9528_s6 + $0xf60] ss:$12 sps:$4 sm:$0xff]  }
 0x1c0   : > { %5826 = vmatprep.subr.bf16.mxu0 %v8674_v24  ;;  %v8734_v24 = vld [vmem:[%s9528_s6 + $0xf7c] ss:$12 sps:$4 sm:$0xff]   ;;  %v8735_v25 = vld [vmem:[%s9528_s6 + $0x740] ss:$12 sps:$4 sm:$0xff]  }
 0x1c2   : > { %7736 = vmatpush3.bf16.msra.mxu1 %v8676_v28  ;;  %v8736_v28 = vld [vmem:[%s9528_s6 + $0x680] ss:$12 sps:$4 sm:$0xff]  }
 0x1c3   : > { %5827 = vmatpush1.bf16.msra.mxu0 %v8672_v27  ;;  %7737 = vmatprep.subr.bf16.mxu1 %v8680_v32  ;;  %v8732_v27 = vld [vmem:[%s9528_s6 + $0xf78] ss:$12 sps:$4 sm:$0xff]  }
 0x1c4   : > { %5828 = vmatprep.subr.bf16.mxu0 %v8679_v29  ;;  %v8739_v29 = vld [vmem:[%s9528_s6 + $0xf94] ss:$12 sps:$4 sm:$0xff]   ;;  %v8740_v32 = vld [vmem:[%s9528_s6 + $0x758] ss:$12 sps:$4 sm:$0xff]  }
 0x1c6   : > { %7738 = vmatpush3.bf16.msra.mxu1 %v8681_v34  ;;  %v8741_v34 = vld [vmem:[%s9528_s6 + $0x698] ss:$12 sps:$4 sm:$0xff]  }
 0x1c7   : > { %5829 = vmatpush1.bf16.msra.mxu0 %v8677_v33  ;;  %7739 = vmatprep.subr.bf16.mxu1 %v8685_v35  ;;  %v8737_v33 = vld [vmem:[%s9528_s6 + $0xf90] ss:$12 sps:$4 sm:$0xff]  }
 0x1c8   : > { %5830 = vmatprep.subr.bf16.mxu0 %v8684_v58  ;;  %v8744_v58 = vld [vmem:[%s9528_s6 + $0xfac] ss:$12 sps:$4 sm:$0xff]   ;;  %v8745_v35 = vld [vmem:[%s9528_s6 + $0x770] ss:$12 sps:$4 sm:$0xff]  }
 0x1ca   : > { %7740 = vmatpush3.bf16.msra.mxu1 %v8686_v37  ;;  %v8746_v37 = vld [vmem:[%s9528_s6 + $0x6b0] ss:$12 sps:$4 sm:$0xff]  }
 0x1cb   : > { %5831 = vmatpush1.bf16.msra.mxu0 %v8682_v36  ;;  %7741 = vmatprep.subr.bf16.mxu1 %v8690_v38  ;;  %v8742_v36 = vld [vmem:[%s9528_s6 + $0xfa8] ss:$12 sps:$4 sm:$0xff]  }
 0x1cc   : > { %5832 = vmatprep.subr.bf16.mxu0 %v8689_v0  ;;  %v8749_v0 = vld [vmem:[%s9528_s6 + $0xfc4] ss:$12 sps:$4 sm:$0xff]   ;;  %v8750_v38 = vld [vmem:[%s9528_s6 + $0x848] ss:$12 sps:$4 sm:$0xff]  }
 0x1ce   : > { %7742 = vmatpush3.bf16.msra.mxu1 %v8691_v39  ;;  %v8751_v39 = vld [vmem:[%s9528_s6 + $0x788] ss:$12 sps:$4 sm:$0xff]  }
 0x1cf   : > { %5833 = vmatpush1.bf16.msra.mxu0 %v8687_v52  ;;  %7743 = vmatprep.subr.bf16.mxu1 %v8695_v42  ;;  %v8747_v52 = vld [vmem:[%s9528_s6 + $0xfc0] ss:$12 sps:$4 sm:$0xff]  }
 0x1d0   : > { %5834 = vmatprep.subr.bf16.mxu0 %v8694_v41  ;;  %v8754_v41 = vld [vmem:[%s9528_s6 + $0xfdc] ss:$12 sps:$4 sm:$0xff]   ;;  %v8755_v42 = vld [vmem:[%s9528_s6 + $0x860] ss:$12 sps:$4 sm:$0xff]  }
 0x1d2   : > { %7744 = vmatpush3.bf16.msra.mxu1 %v8696_v48  ;;  %v8756_v48 = vld [vmem:[%s9528_s6 + $0x7a0] ss:$12 sps:$4 sm:$0xff]  }
 0x1d3   : > { %5835 = vmatpush1.bf16.msra.mxu0 %v8692_v45  ;;  %7745 = vmatprep.subr.bf16.mxu1 %v8700_v50  ;;  %v8752_v45 = vld [vmem:[%s9528_s6 + $0xfd8] ss:$12 sps:$4 sm:$0xff]  }
 0x1d4   : > { %5836 = vmatprep.subr.bf16.mxu0 %v8699_v49  ;;  %v8759_v49 = vld [vmem:[%s9528_s6 + $0xff4] ss:$12 sps:$4 sm:$0xff]   ;;  %v8760_v50 = vld [vmem:[%s9528_s6 + $0x878] ss:$12 sps:$4 sm:$0xff]  }
 0x1d6   : > { %7746 = vmatpush3.bf16.msra.mxu1 %v8701_v54  ;;  %v8764_v54 = vld [vmem:[%s9528_s6 + $0x100c] ss:$12 sps:$4 sm:$0xff]  }
 0x1d7   : > { %5837 = vmatpush1.bf16.msra.mxu0 %v8697_v51  ;;  %7747 = vmatprep.subr.bf16.mxu1 %v8705_v57  ;;  %v8757_v51 = vld [vmem:[%s9528_s6 + $0xff0] ss:$12 sps:$4 sm:$0xff]   ;;  %v8762_v57 = vld [vmem:[%s9528_s6 + $0x1008] ss:$12 sps:$4 sm:$0xff]  }
 0x1d8   : > { %5838 = vmatprep.subr.bf16.mxu0 %v8704_v56  ;;  %v8765_v56 = vld [vmem:[%s9528_s6 + $0x890] ss:$12 sps:$4 sm:$0xff]  }
 0x1da   : > { %7748 = vmatpush3.bf16.msra.mxu1 %v8706_v30  ;;  %v8770_v30 = vld [vmem:[%s9528_s6 + $0x8a8] ss:$12 sps:$4 sm:$0xff]  }
 0x1db   : > { %5839 = vmatpush1.bf16.msra.mxu0 %v8702_v60  ;;  %7755 = vmatprep.subr.bf16.mxu1 %v8710_v2  ;;  %v8766_v60 = vld [vmem:[%s9528_s6 + $0x7d0] ss:$12 sps:$4 sm:$0xff]   ;;  %v8775_v2 = vld [vmem:[%s9528_s6 + $0x8c0] ss:$12 sps:$4 sm:$0xff]  }
 0x1dc   : > { %5851 = vmatprep.subr.bf16.mxu0 %v8709_v61  ;;  %v8767_v61 = vld [vmem:[%s9528_s6 + $0x1020] ss:$12 sps:$4 sm:$0xff]  }
 0x1dd   : > { %6265 = vmatmul.mubr.bf16.vlgmr.msra.gmra.mrb[16].mxu1 %v9836_v21  ;;  %v8721_v21 = vld [vmem:[%s9528_s6 + $0x638] ss:$12 sps:$4 sm:$0xff]  }
 0x1de   : > { %5841 = vmatmul.mubr.bf16.vlgmr.msra.gmra.mrb[0].mxu0 %v9986_v5  ;;  %7756 = vmatpush3.bf16.msra.mxu1 %v8711_v3  ;;  %v8776_v3 = vld [vmem:[%s9528_s6 + $0x800] ss:$12 sps:$4 sm:$0xff]  }
 0x1df   : > { %5852 = vmatpush1.bf16.msra.mxu0 %v8707_v40  ;;  %7757 = vmatprep.subr.bf16.mxu1 %v8715_v8  ;;  %v8772_v40 = vld [vmem:[%s9528_s6 + $0x1038] ss:$12 sps:$4 sm:$0xff]  }
 0x1e0   : > { %5853 = vmatprep.subr.bf16.mxu0 %v8714_v7  ;;  %6305 = vmatprep.mubr.bf16.mxu1 %v9587_v55  ;;  %v8729_v55 = vld [vmem:[%s9528_s6 + $0xf64] ss:$12 sps:$4 sm:$0xff]  }
 0x1e1   : > { %5883 = vmatprep.mubr.bf16.mxu0 %v9990_v9  ;;  %v8777_v7 = vld [vmem:[%s9528_s6 + $0x1050] ss:$12 sps:$4 sm:$0xff]   ;;  %v8781_v8 = vld [vmem:[%s9528_s6 + $0x818] ss:$12 sps:$4 sm:$0xff]  }
 0x1e2   : > { %7758 = vmatpush3.bf16.msra.mxu1 %v8716_v11  ;;  %v8785_v11 = vld [vmem:[%s9528_s6 + $0x8f0] ss:$12 sps:$4 sm:$0xff]  }
 0x1e3   : > { %5854 = vmatpush1.bf16.msra.mxu0 %v8712_v10  ;;  %7759 = vmatprep.subr.bf16.mxu1 %v8720_v12  ;;  %v8784_v10 = vld [vmem:[%s9528_s6 + $0x106c] ss:$12 sps:$4 sm:$0xff]   ;;  %v8786_v12 = vld [vmem:[%s9528_s6 + $0x830] ss:$12 sps:$4 sm:$0xff]  }
 0x1e4   : > { %5855 = vmatprep.subr.bf16.mxu0 %v8719_v14  ;;  %v8782_v14 = vld [vmem:[%s9528_s6 + $0x1068] ss:$12 sps:$4 sm:$0xff]  }
 0x1e6   : > { %7760 = vmatpush3.bf16.msra.mxu1 %v8721_v21  ;;  %v225_v21 = vld [vmem:[#allocation2 + $0xa0] sm:$0xff] }
 0x1e7   : > { %5856 = vmatpush1.bf16.msra.mxu0 %v8717_v13  ;;  %7761 = vmatprep.subr.bf16.mxu1 %v8725_v44  ;;  %v8789_v13 = vld [vmem:[%s9528_s6 + $0x1084] ss:$12 sps:$4 sm:$0xff]   ;;  %v8790_v44 = vld [vmem:[%s9528_s6 + $0x9c8] ss:$12 sps:$4 sm:$0xff]  }
 0x1e8   : > { %5857 = vmatprep.subr.bf16.mxu0 %v8724_v16  ;;  %v257_v16 = vld [vmem:[#allocation2 + $0x1a0] sm:$0xff] }
 0x1ea   : > { %7762 = vmatpush3.bf16.msra.mxu1 %v8726_v18  ;;  %v8791_v18 = vld [vmem:[%s9528_s6 + $0x908] ss:$12 sps:$4 sm:$0xff]  }
 0x1eb   : > { %5858 = vmatpush1.bf16.msra.mxu0 %v8722_v17  ;;  %7763 = vmatprep.subr.bf16.mxu1 %v8730_v19  ;;  %v8787_v17 = vld [vmem:[%s9528_s6 + $0x1080] ss:$12 sps:$4 sm:$0xff]   ;;  %v228_v19 = vld [vmem:[#allocation2 + $0xb8] sm:$0xff] }
 0x1ec   : > { %5859 = vmatprep.subr.bf16.mxu0 %v8729_v55  ;;  %v10060_v55 = vpack.c.bf16 %v257_v16, %v225_v21  ;;  %v8849_v21 = vld [vmem:[%s9528_s6 + $0x11a4] ss:$12 sps:$4 sm:$0xff]   ;;  %v8847_v16 = vld [vmem:[%s9528_s6 + $0x11a0] ss:$12 sps:$4 sm:$0xff]  }
 0x1ee   : > { %7764 = vmatpush3.bf16.msra.mxu1 %v8731_v23  ;;  %v8794_v23 = vld [vmem:[%s9528_s6 + $0x109c] ss:$12 sps:$4 sm:$0xff]  }
 0x1ef   : > { %5860 = vmatpush1.bf16.msra.mxu0 %v8727_v20  ;;  %7765 = vmatprep.subr.bf16.mxu1 %v8735_v25  ;;  %v260_v20 = vld [vmem:[#allocation2 + $0x1b8] sm:$0xff] }
 0x1f0   : > { %5861 = vmatprep.subr.bf16.mxu0 %v8734_v24  ;;  %v8795_v24 = vld [vmem:[%s9528_s6 + $0x9e0] ss:$12 sps:$4 sm:$0xff]   ;;  %v10064_v25 = vpack.c.bf16 %v260_v20, %v228_v19  ;;  %v8852_v19 = vld [vmem:[%s9528_s6 + $0x11b8] ss:$12 sps:$4 sm:$0xff]  }
 0x1f1   : > { %v8856_v20 = vld [vmem:[%s9528_s6 + $0xb00] ss:$12 sps:$4 sm:$0xff]  }
 0x1f2   : > { %7766 = vmatpush3.bf16.msra.mxu1 %v8736_v28  ;;  %v8796_v28 = vld [vmem:[%s9528_s6 + $0x920] ss:$12 sps:$4 sm:$0xff]  }
 0x1f3   : > { %5862 = vmatpush1.bf16.msra.mxu0 %v8732_v27  ;;  %7767 = vmatprep.subr.bf16.mxu1 %v8740_v32  ;;  %v8792_v27 = vld [vmem:[%s9528_s6 + $0x1098] ss:$12 sps:$4 sm:$0xff]  }
 0x1f4   : > { %5863 = vmatprep.subr.bf16.mxu0 %v8739_v29  ;;  %v8799_v29 = vld [vmem:[%s9528_s6 + $0x10b4] ss:$12 sps:$4 sm:$0xff]   ;;  %v8800_v32 = vld [vmem:[%s9528_s6 + $0x9f8] ss:$12 sps:$4 sm:$0xff]  }
 0x1f6   : > { %7768 = vmatpush3.bf16.msra.mxu1 %v8741_v34  ;;  %v8804_v34 = vld [vmem:[%s9528_s6 + $0x10cc] ss:$12 sps:$4 sm:$0xff]  }
 0x1f7   : > { %5864 = vmatpush1.bf16.msra.mxu0 %v8737_v33  ;;  %7769 = vmatprep.subr.bf16.mxu1 %v8745_v35  ;;  %v8801_v33 = vld [vmem:[%s9528_s6 + $0x938] ss:$12 sps:$4 sm:$0xff]   ;;  %v8802_v35 = vld [vmem:[%s9528_s6 + $0x10c8] ss:$12 sps:$4 sm:$0xff]  }
 0x1f8   : > { %5865 = vmatprep.subr.bf16.mxu0 %v8744_v58  ;;  %v8805_v58 = vld [vmem:[%s9528_s6 + $0xa10] ss:$12 sps:$4 sm:$0xff]  }
 0x1fa   : > { %7770 = vmatpush3.bf16.msra.mxu1 %v8746_v37  ;;  %v8810_v37 = vld [vmem:[%s9528_s6 + $0xa28] ss:$12 sps:$4 sm:$0xff]  }
 0x1fb   : > { %5866 = vmatpush1.bf16.msra.mxu0 %v8742_v36  ;;  %7777 = vmatprep.subr.bf16.mxu1 %v8750_v38  ;;  %v8806_v36 = vld [vmem:[%s9528_s6 + $0x950] ss:$12 sps:$4 sm:$0xff]   ;;  %v8811_v38 = vld [vmem:[%s9528_s6 + $0x968] ss:$12 sps:$4 sm:$0xff]  }
 0x1fc   : > { %5867 = vmatprep.subr.bf16.mxu0 %v8749_v0  ;;  %v8807_v0 = vld [vmem:[%s9528_s6 + $0x10e0] ss:$12 sps:$4 sm:$0xff]  }
 0x1fd   : > { %6306 = vmatmul.mubr.bf16.vlgmr.msra.gmra.mrb[20].mxu1 %v9610_v15  ;;  %v8761_v15 = vld [vmem:[%s9528_s6 + $0x7b8] ss:$12 sps:$4 sm:$0xff]  }
 0x1fe   : > { %7778 = vmatpush3.bf16.msra.mxu1 %v8751_v39  ;;  %6346 = vmatprep.mubr.bf16.mxu1 %v9643_v47  ;;  %v8769_v47 = vld [vmem:[%s9528_s6 + $0x1024] ss:$12 sps:$4 sm:$0xff]   ;;  %v8815_v39 = vld [vmem:[%s9528_s6 + $0xa40] ss:$12 sps:$4 sm:$0xff]  }
 0x1ff   : > { %5868 = vmatpush1.bf16.msra.mxu0 %v8747_v52  ;;  %7779 = vmatprep.subr.bf16.mxu1 %v8755_v42  ;;  %v8814_v52 = vld [vmem:[%s9528_s6 + $0x10fc] ss:$12 sps:$4 sm:$0xff]   ;;  %v8816_v42 = vld [vmem:[%s9528_s6 + $0x980] ss:$12 sps:$4 sm:$0xff]  }
 0x200   : > { %5869 = vmatprep.subr.bf16.mxu0 %v8754_v41  ;;  %v8812_v41 = vld [vmem:[%s9528_s6 + $0x10f8] ss:$12 sps:$4 sm:$0xff]  }
 0x202   : > { %7780 = vmatpush3.bf16.msra.mxu1 %v8756_v48  ;;  %v8820_v48 = vld [vmem:[%s9528_s6 + $0xa58] ss:$12 sps:$4 sm:$0xff]  }
 0x203   : > { %5870 = vmatpush1.bf16.msra.mxu0 %v8752_v45  ;;  %7781 = vmatprep.subr.bf16.mxu1 %v8760_v50  ;;  %v8819_v45 = vld [vmem:[%s9528_s6 + $0x1114] ss:$12 sps:$4 sm:$0xff]   ;;  %v8817_v50 = vld [vmem:[%s9528_s6 + $0x1110] ss:$12 sps:$4 sm:$0xff]  }
 0x204   : > { %5871 = vmatprep.subr.bf16.mxu0 %v8759_v49 }
 0x206   : > { %7782 = vmatpush3.bf16.msra.mxu1 %v8761_v15  ;;  %v8821_v15 = vld [vmem:[%s9528_s6 + $0x998] ss:$12 sps:$4 sm:$0xff]  }
 0x207   : > { %5872 = vmatpush1.bf16.msra.mxu0 %v8757_v51  ;;  %7783 = vmatprep.subr.bf16.mxu1 %v8765_v56  ;;  %v8824_v56 = vld [vmem:[%s9528_s6 + $0x112c] ss:$12 sps:$4 sm:$0xff]  }
 0x208   : > { %5873 = vmatprep.subr.bf16.mxu0 %v8764_v54 }
 0x20a   : > { %7784 = vmatpush3.bf16.msra.mxu1 %v8766_v60 }
 0x20b   : > { %5874 = vmatpush1.bf16.msra.mxu0 %v8762_v57  ;;  %7785 = vmatprep.subr.bf16.mxu1 %v8770_v30  ;;  %v8825_v57 = vld [vmem:[%s9528_s6 + $0xa70] ss:$12 sps:$4 sm:$0xff]  }
 0x20c   : > { %5875 = vmatprep.subr.bf16.mxu0 %v8769_v47  ;;  %v8822_v47 = vld [vmem:[%s9528_s6 + $0x1128] ss:$12 sps:$4 sm:$0xff]   ;;  %v8826_v30 = vld [vmem:[%s9528_s6 + $0x9b0] ss:$12 sps:$4 sm:$0xff]  }
 0x20e   : > { %7786 = vmatpush3.bf16.msra.mxu1 %v8771_v62  ;;  %v8830_v62 = vld [vmem:[%s9528_s6 + $0xb48] ss:$12 sps:$4 sm:$0xff]  }
 0x20f   : > { %5876 = vmatpush1.bf16.msra.mxu0 %v8767_v61  ;;  %7787 = vmatprep.subr.bf16.mxu1 %v8775_v2  ;;  %v8829_v61 = vld [vmem:[%s9528_s6 + $0x1144] ss:$12 sps:$4 sm:$0xff]   ;;  %v8831_v2 = vld [vmem:[%s9528_s6 + $0xa88] ss:$12 sps:$4 sm:$0xff]  }
 0x210   : > { %5877 = vmatprep.subr.bf16.mxu0 %v8774_v63  ;;  %v8827_v63 = vld [vmem:[%s9528_s6 + $0x1140] ss:$12 sps:$4 sm:$0xff]  }
 0x212   : > { %7788 = vmatpush3.bf16.msra.mxu1 %v8776_v3  ;;  %v8835_v3 = vld [vmem:[%s9528_s6 + $0xb60] ss:$12 sps:$4 sm:$0xff]  }
 0x213   : > { %5878 = vmatpush1.bf16.msra.mxu0 %v8772_v40  ;;  %7789 = vmatprep.subr.bf16.mxu1 %v8780_v6  ;;  %v8834_v40 = vld [vmem:[%s9528_s6 + $0x115c] ss:$12 sps:$4 sm:$0xff]   ;;  %v8836_v6 = vld [vmem:[%s9528_s6 + $0xaa0] ss:$12 sps:$4 sm:$0xff]  }
 0x214   : > { %5879 = vmatprep.subr.bf16.mxu0 %v8779_v4  ;;  %v8832_v4 = vld [vmem:[%s9528_s6 + $0x1158] ss:$12 sps:$4 sm:$0xff]  }
 0x216   : > { %7790 = vmatpush3.bf16.msra.mxu1 %v8781_v8  ;;  %v8840_v8 = vld [vmem:[%s9528_s6 + $0xb78] ss:$12 sps:$4 sm:$0xff]  }
 0x217   : > { %5880 = vmatpush1.bf16.msra.mxu0 %v8777_v7  ;;  %7791 = vmatprep.subr.bf16.mxu1 %v8785_v11  ;;  %v8839_v7 = vld [vmem:[%s9528_s6 + $0x1174] ss:$12 sps:$4 sm:$0xff]   ;;  %v8841_v11 = vld [vmem:[%s9528_s6 + $0xab8] ss:$12 sps:$4 sm:$0xff]  }
 0x218   : > { %5881 = vmatprep.subr.bf16.mxu0 %v8784_v10  ;;  %v8837_v10 = vld [vmem:[%s9528_s6 + $0x1170] ss:$12 sps:$4 sm:$0xff]  }
 0x21a   : > { %7792 = vmatpush3.bf16.msra.mxu1 %v8786_v12  ;;  %v8842_v12 = vld [vmem:[%s9528_s6 + $0x1188] ss:$12 sps:$4 sm:$0xff]  }
 0x21b   : > { %5882 = vmatpush1.bf16.msra.mxu0 %v8782_v14  ;;  %7799 = vmatprep.subr.bf16.mxu1 %v8790_v44  ;;  %v8845_v14 = vld [vmem:[%s9528_s6 + $0xb90] ss:$12 sps:$4 sm:$0xff]   ;;  %v8851_v44 = vld [vmem:[%s9528_s6 + $0xae8] ss:$12 sps:$4 sm:$0xff]  }
 0x21c   : > { %5894 = vmatprep.subr.bf16.mxu0 %v8789_v13  ;;  %v8846_v13 = vld [vmem:[%s9528_s6 + $0xad0] ss:$12 sps:$4 sm:$0xff]  }
 0x21d   : > { %6347 = vmatmul.mubr.bf16.vlgmr.msra.gmra.mrb[24].mxu1 %v9686_v31  ;;  %v8797_v31 = vld [vmem:[%s9528_s6 + $0x10b0] ss:$12 sps:$4 sm:$0xff]  }
 0x21e   : > { %5884 = vmatmul.mubr.bf16.vlgmr.msra.gmra.mrb[0].mxu0 %v10060_v55  ;;  %7800 = vmatpush3.bf16.msra.mxu1 %v8791_v18  ;;  %v8855_v18 = vld [vmem:[%s9528_s6 + $0xbc0] ss:$12 sps:$4 sm:$0xff]  }
 0x21f   : > { %5895 = vmatpush1.bf16.msra.mxu0 %v8787_v17  ;;  %7801 = vmatprep.subr.bf16.mxu1 %v8795_v24  ;;  %v8854_v17 = vld [vmem:[%s9528_s6 + $0x11bc] ss:$12 sps:$4 sm:$0xff]   ;;  %v8860_v24 = vld [vmem:[%s9528_s6 + $0xbd8] ss:$12 sps:$4 sm:$0xff]  }
 0x220   : > { %5896 = vmatprep.subr.bf16.mxu0 %v8794_v23  ;;  %6387 = vmatprep.mubr.bf16.mxu1 %v9700_v46  ;;  %v8809_v46 = vld [vmem:[%s9528_s6 + $0x10e4] ss:$12 sps:$4 sm:$0xff]   ;;  %v8859_v23 = vld [vmem:[%s9528_s6 + $0x11d4] ss:$12 sps:$4 sm:$0xff]  }
 0x221   : > { %5926 = vmatprep.mubr.bf16.mxu0 %v10064_v25 }
 0x222   : > { %7802 = vmatpush3.bf16.msra.mxu1 %v8796_v28  ;;  %v8857_v28 = vld [vmem:[%s9528_s6 + $0x11d0] ss:$12 sps:$4 sm:$0xff]  }
 0x223   : > { %5897 = vmatpush1.bf16.msra.mxu0 %v8792_v27  ;;  %7803 = vmatprep.subr.bf16.mxu1 %v8800_v32 }
 0x224   : > { %5898 = vmatprep.subr.bf16.mxu0 %v8799_v29  ;;  %v8861_v29 = vld [vmem:[%s9528_s6 + $0xb18] ss:$12 sps:$4 sm:$0xff]  }
 0x226   : > { %7804 = vmatpush3.bf16.msra.mxu1 %v8801_v33 }
 0x227   : > { %5899 = vmatpush1.bf16.msra.mxu0 %v8797_v31  ;;  %7805 = vmatprep.subr.bf16.mxu1 %v8805_v58  ;;  %v8864_v58 = vld [vmem:[%s9528_s6 + $0x11ec] ss:$12 sps:$4 sm:$0xff]  }
 0x228   : > { %5900 = vmatprep.subr.bf16.mxu0 %v8804_v34 }
 0x22a   : > { %7806 = vmatpush3.bf16.msra.mxu1 %v8806_v36 }
 0x22b   : > { %5901 = vmatpush1.bf16.msra.mxu0 %v8802_v35  ;;  %7807 = vmatprep.subr.bf16.mxu1 %v8810_v37  ;;  %v8865_v35 = vld [vmem:[%s9528_s6 + $0xbf0] ss:$12 sps:$4 sm:$0xff]  }
 0x22c   : > { %5902 = vmatprep.subr.bf16.mxu0 %v8809_v46  ;;  %v8862_v46 = vld [vmem:[%s9528_s6 + $0x11e8] ss:$12 sps:$4 sm:$0xff]   ;;  %v8866_v37 = vld [vmem:[%s9528_s6 + $0xb30] ss:$12 sps:$4 sm:$0xff]  }
 0x22e   : > { %7808 = vmatpush3.bf16.msra.mxu1 %v8811_v38  ;;  %v8870_v38 = vld [vmem:[%s9528_s6 + $0xcc8] ss:$12 sps:$4 sm:$0xff]  }
 0x22f   : > { %5903 = vmatpush1.bf16.msra.mxu0 %v8807_v0  ;;  %7809 = vmatprep.subr.bf16.mxu1 %v8815_v39  ;;  %v8869_v0 = vld [vmem:[%s9528_s6 + $0x1204] ss:$12 sps:$4 sm:$0xff]  }
 0x230   : > { %5904 = vmatprep.subr.bf16.mxu0 %v8814_v52  ;;  %v10090_v49 = vpop.f32.mrb[0].mxu1  ;;  %v227_v52 = vld [vmem:[#allocation2 + $0xb0] sm:$0xff] }
 0x231   : > { %v10093_v51 = vpop.f32.mrb[1].mxu1  ;;  %v259_v39 = vld [vmem:[#allocation2 + $0x1b0] sm:$0xff] }
 0x232   : > { %v10096_v54 = vpop.f32.mrb[2].mxu1  ;;  %7810 = vmatpush3.bf16.msra.mxu1 %v8816_v42  ;;  %v262_v42 = vld [vmem:[#allocation2 + $0x1c8] sm:$0xff] }
 0x233   : > { %5905 = vmatpush1.bf16.msra.mxu0 %v8812_v41  ;;  %v10100_v60 = vpop.f32.mrb[3].mxu1  ;;  %7811 = vmatprep.subr.bf16.mxu1 %v8820_v48  ;;  %v230_v41 = vld [vmem:[#allocation2 + $0xc8] sm:$0xff] }
 0x234   : > { %5906 = vmatprep.subr.bf16.mxu0 %v8819_v45  ;;  %v10144_v45 = vpack.c.bf16 %v259_v39, %v227_v52  ;;  %v8867_v48 = vld [vmem:[%s9528_s6 + $0x1200] ss:$12 sps:$4 sm:$0xff]   ;;  %v8917_v52 = vld [vmem:[%s9528_s6 + $0x12f0] ss:$12 sps:$4 sm:$0xff]   ;;  %v8921_v39 = vld [vmem:[%s9528_s6 + $0xdb8] ss:$12 sps:$4 sm:$0xff]  }
 0x236   : > { %7812 = vmatpush3.bf16.msra.mxu1 %v8821_v15  ;;  %v8874_v15 = vld [vmem:[%s9528_s6 + $0x121c] ss:$12 sps:$4 sm:$0xff]  }
 0x237   : > { %5907 = vmatpush1.bf16.msra.mxu0 %v8817_v50  ;;  %7813 = vmatprep.subr.bf16.mxu1 %v8825_v57  ;;  %v8871_v50 = vld [vmem:[%s9528_s6 + $0xc08] ss:$12 sps:$4 sm:$0xff]   ;;  %v8872_v57 = vld [vmem:[%s9528_s6 + $0x1218] ss:$12 sps:$4 sm:$0xff]  }
 0x238   : > { %5908 = vmatprep.subr.bf16.mxu0 %v8824_v56  ;;  %v8875_v56 = vld [vmem:[%s9528_s6 + $0xce0] ss:$12 sps:$4 sm:$0xff]  }
 0x23a   : > { %7814 = vmatpush3.bf16.msra.mxu1 %v8826_v30  ;;  %v8876_v30 = vld [vmem:[%s9528_s6 + $0xc20] ss:$12 sps:$4 sm:$0xff]  }
 0x23b   : > { %5909 = vmatpush1.bf16.msra.mxu0 %v8822_v47  ;;  %7821 = vmatprep.subr.bf16.mxu1 %v8830_v62  ;;  %v10151_v47 = vpack.c.bf16 %v262_v42, %v230_v41  ;;  %v8880_v62 = vld [vmem:[%s9528_s6 + $0xcf8] ss:$12 sps:$4 sm:$0xff]   ;;  %v8925_v41 = vld [vmem:[%s9528_s6 + $0xe90] ss:$12 sps:$4 sm:$0xff]   ;;  %v8922_v42 = vld [vmem:[%s9528_s6 + $0x1308] ss:$12 sps:$4 sm:$0xff]  }
 0x23c   : > { %5910 = vmatprep.subr.bf16.mxu0 %v8829_v61  ;;  %v8879_v61 = vld [vmem:[%s9528_s6 + $0x1234] ss:$12 sps:$4 sm:$0xff]  }
 0x23d   : > { %6388 = vmatmul.mubr.bf16.vlgmr.msra.gmra.mrb[28].mxu1 %v9761_v59  ;;  %v8844_v59 = vld [vmem:[%s9528_s6 + $0x118c] ss:$12 sps:$4 sm:$0xff]  }
 0x23e   : > { %7822 = vmatpush3.bf16.msra.mxu1 %v8831_v2  ;;  %6428 = vmatprep.mubr.bf16.mxu1 %v9768_v1  ;;  %v8850_v1 = vld [vmem:[%s9528_s6 + $0xba8] ss:$12 sps:$4 sm:$0xff]   ;;  %v8884_v2 = vld [vmem:[%s9528_s6 + $0x124c] ss:$12 sps:$4 sm:$0xff]  }
 0x23f   : > { %5911 = vmatpush1.bf16.msra.mxu0 %v8827_v63  ;;  %7823 = vmatprep.subr.bf16.mxu1 %v8835_v3  ;;  %v8877_v63 = vld [vmem:[%s9528_s6 + $0x1230] ss:$12 sps:$4 sm:$0xff]   ;;  %v8882_v3 = vld [vmem:[%s9528_s6 + $0x1248] ss:$12 sps:$4 sm:$0xff]  }
 0x240   : > { %5912 = vmatprep.subr.bf16.mxu0 %v8834_v40  ;;  %v8885_v40 = vld [vmem:[%s9528_s6 + $0xd10] ss:$12 sps:$4 sm:$0xff]  }
 0x242   : > { %7824 = vmatpush3.bf16.msra.mxu1 %v8836_v6  ;;  %v8890_v6 = vld [vmem:[%s9528_s6 + $0xd28] ss:$12 sps:$4 sm:$0xff]  }
 0x243   : > { %5913 = vmatpush1.bf16.msra.mxu0 %v8832_v4  ;;  %7825 = vmatprep.subr.bf16.mxu1 %v8840_v8  ;;  %v8889_v4 = vld [vmem:[%s9528_s6 + $0x1264] ss:$12 sps:$4 sm:$0xff]   ;;  %v8891_v8 = vld [vmem:[%s9528_s6 + $0xc68] ss:$12 sps:$4 sm:$0xff]  }
 0x244   : > { %5914 = vmatprep.subr.bf16.mxu0 %v8839_v7  ;;  %v8887_v7 = vld [vmem:[%s9528_s6 + $0x1260] ss:$12 sps:$4 sm:$0xff]  }
 0x246   : > { %7826 = vmatpush3.bf16.msra.mxu1 %v8841_v11  ;;  %v8895_v11 = vld [vmem:[%s9528_s6 + $0xd40] ss:$12 sps:$4 sm:$0xff]  }
 0x247   : > { %5915 = vmatpush1.bf16.msra.mxu0 %v8837_v10  ;;  %7827 = vmatprep.subr.bf16.mxu1 %v8845_v14  ;;  %v8894_v10 = vld [vmem:[%s9528_s6 + $0x127c] ss:$12 sps:$4 sm:$0xff]   ;;  %v8896_v14 = vld [vmem:[%s9528_s6 + $0xc80] ss:$12 sps:$4 sm:$0xff]  }
 0x248   : > { %5916 = vmatprep.subr.bf16.mxu0 %v8844_v59  ;;  %v8892_v59 = vld [vmem:[%s9528_s6 + $0x1278] ss:$12 sps:$4 sm:$0xff]  }
 0x24a   : > { %7828 = vmatpush3.bf16.msra.mxu1 %v8846_v13  ;;  %v8900_v13 = vld [vmem:[%s9528_s6 + $0xd58] ss:$12 sps:$4 sm:$0xff]  }
 0x24b   : > { %5917 = vmatpush1.bf16.msra.mxu0 %v8842_v12  ;;  %7829 = vmatprep.subr.bf16.mxu1 %v8850_v1  ;;  %v8899_v12 = vld [vmem:[%s9528_s6 + $0x1294] ss:$12 sps:$4 sm:$0xff]   ;;  %v8897_v1 = vld [vmem:[%s9528_s6 + $0x1290] ss:$12 sps:$4 sm:$0xff]  }
 0x24c   : > { %5918 = vmatprep.subr.bf16.mxu0 %v8849_v21 }
 0x24e   : > { %7830 = vmatpush3.bf16.msra.mxu1 %v8851_v44 }
 0x24f   : > { %5919 = vmatpush1.bf16.msra.mxu0 %v8847_v16  ;;  %7831 = vmatprep.subr.bf16.mxu1 %v8855_v18  ;;  %v8901_v16 = vld [vmem:[%s9528_s6 + $0xc98] ss:$12 sps:$4 sm:$0xff]  }
 0x250   : > { %5920 = vmatprep.subr.bf16.mxu0 %v8854_v17  ;;  %v7683_v27 = vpop.f32.mrb[4].mxu1 }
 0x251   : > { %v7684_v32 = vpop.f32.mrb[5].mxu1 }
 0x252   : > { %v10134_v31 = vadd.f32 %v7684_v32, %v7683_v27  ;;  %v7686_v33 = vpop.f32.mrb[6].mxu1  ;;  %7832 = vmatpush3.bf16.msra.mxu1 %v8856_v20  ;;  %v8904_v20 = vld [vmem:[%s9528_s6 + $0x12ac] ss:$12 sps:$4 sm:$0xff]   ;;  %v8906_v32 = vld [vmem:[%s9528_s6 + $0xcb0] ss:$12 sps:$4 sm:$0xff]  }
 0x253   : > { %5921 = vmatpush1.bf16.msra.mxu0 %v8852_v19  ;;  %v7687_v34 = vpop.f32.mrb[7].mxu1  ;;  %7833 = vmatprep.subr.bf16.mxu1 %v8860_v24 }
 0x254   : > { %5922 = vmatprep.subr.bf16.mxu0 %v8859_v23  ;;  %v10138_v36 = vadd.f32 %v7687_v34, %v7686_v33  ;;  %v8905_v23 = vld [vmem:[%s9528_s6 + $0xd70] ss:$12 sps:$4 sm:$0xff]   ;;  %v8910_v34 = vld [vmem:[%s9528_s6 + $0xe48] ss:$12 sps:$4 sm:$0xff]  }
 0x255   : > { %v8909_v33 = vld [vmem:[%s9528_s6 + $0x12c4] ss:$12 sps:$4 sm:$0xff]  }
 0x256   : > { %7834 = vmatpush3.bf16.msra.mxu1 %v8861_v29 }
 0x257   : > { %5923 = vmatpush1.bf16.msra.mxu0 %v8857_v28  ;;  %7835 = vmatprep.subr.bf16.mxu1 %v8865_v35  ;;  %v8902_v28 = vld [vmem:[%s9528_s6 + $0x12a8] ss:$12 sps:$4 sm:$0xff]  }
 0x258   : > { %5924 = vmatprep.subr.bf16.mxu0 %v8864_v58  ;;  %v8907_v58 = vld [vmem:[%s9528_s6 + $0x12c0] ss:$12 sps:$4 sm:$0xff]   ;;  %v8914_v35 = vld [vmem:[%s9528_s6 + $0x12dc] ss:$12 sps:$4 sm:$0xff]  }
 0x25a   : > { %7836 = vmatpush3.bf16.msra.mxu1 %v8866_v37  ;;  %v8916_v37 = vld [vmem:[%s9528_s6 + $0xda0] ss:$12 sps:$4 sm:$0xff]  }
 0x25b   : > { %5925 = vmatpush1.bf16.msra.mxu0 %v8862_v46  ;;  %7843 = vmatprep.subr.bf16.mxu1 %v8870_v38  ;;  %v8912_v46 = vld [vmem:[%s9528_s6 + $0x12d8] ss:$12 sps:$4 sm:$0xff]  }
 0x25c   : > { %5937 = vmatprep.subr.bf16.mxu0 %v8869_v0  ;;  %v8919_v0 = vld [vmem:[%s9528_s6 + $0x12f4] ss:$12 sps:$4 sm:$0xff]   ;;  %v8920_v38 = vld [vmem:[%s9528_s6 + $0xe78] ss:$12 sps:$4 sm:$0xff]  }
 0x25d   : > { %6429 = vmatmul.mubr.bf16.vlgmr.msra.gmra.mrb[32].mxu1 %v9838_v22  ;;  %v8881_v22 = vld [vmem:[%s9528_s6 + $0xc38] ss:$12 sps:$4 sm:$0xff]  }
 0x25e   : > { %5927 = vmatmul.mubr.bf16.vlgmr.msra.gmra.mrb[0].mxu0 %v10144_v45  ;;  %7844 = vmatpush3.bf16.msra.mxu1 %v8871_v50  ;;  %v8929_v50 = vld [vmem:[%s9528_s6 + $0x1324] ss:$12 sps:$4 sm:$0xff]  }
 0x25f   : > { %5938 = vmatpush1.bf16.msra.mxu0 %v8867_v48  ;;  %7845 = vmatprep.subr.bf16.mxu1 %v8875_v56  ;;  %v8926_v48 = vld [vmem:[%s9528_s6 + $0xdd0] ss:$12 sps:$4 sm:$0xff]   ;;  %v8931_v56 = vld [vmem:[%s9528_s6 + $0xde8] ss:$12 sps:$4 sm:$0xff]  }
 0x260   : > { %5939 = vmatprep.subr.bf16.mxu0 %v8874_v15  ;;  %6469 = vmatprep.mubr.bf16.mxu1 %v9842_v26  ;;  %v8886_v26 = vld [vmem:[%s9528_s6 + $0xc50] ss:$12 sps:$4 sm:$0xff]   ;;  %v8927_v15 = vld [vmem:[%s9528_s6 + $0x1320] ss:$12 sps:$4 sm:$0xff]  }
 0x261   : > { %5969 = vmatprep.mubr.bf16.mxu0 %v10151_v47 }
 0x262   : > { %7846 = vmatpush3.bf16.msra.mxu1 %v8876_v30  ;;  %v8935_v30 = vld [vmem:[%s9528_s6 + $0xec0] ss:$12 sps:$4 sm:$0xff]  }
 0x263   : > { %5940 = vmatpush1.bf16.msra.mxu0 %v8872_v57  ;;  %7847 = vmatprep.subr.bf16.mxu1 %v8880_v62  ;;  %v8934_v57 = vld [vmem:[%s9528_s6 + $0x133c] ss:$12 sps:$4 sm:$0xff]   ;;  %v8936_v62 = vld [vmem:[%s9528_s6 + $0xe00] ss:$12 sps:$4 sm:$0xff]  }
 0x264   : > { %5941 = vmatprep.subr.bf16.mxu0 %v8879_v61  ;;  %v8932_v61 = vld [vmem:[%s9528_s6 + $0x1338] ss:$12 sps:$4 sm:$0xff]  }
 0x266   : > { %7848 = vmatpush3.bf16.msra.mxu1 %v8881_v22  ;;  %v8940_v22 = vld [vmem:[%s9528_s6 + $0xed8] ss:$12 sps:$4 sm:$0xff]  }
 0x267   : > { %5942 = vmatpush1.bf16.msra.mxu0 %v8877_v63  ;;  %7849 = vmatprep.subr.bf16.mxu1 %v8885_v40  ;;  %v8939_v63 = vld [vmem:[%s9528_s6 + $0x1354] ss:$12 sps:$4 sm:$0xff]   ;;  %v8937_v40 = vld [vmem:[%s9528_s6 + $0x1350] ss:$12 sps:$4 sm:$0xff]  }
 0x268   : > { %5943 = vmatprep.subr.bf16.mxu0 %v8884_v2 }
 0x26a   : > { %7850 = vmatpush3.bf16.msra.mxu1 %v8886_v26 }
 0x26b   : > { %5944 = vmatpush1.bf16.msra.mxu0 %v8882_v3  ;;  %7851 = vmatprep.subr.bf16.mxu1 %v8890_v6  ;;  %v8941_v3 = vld [vmem:[%s9528_s6 + $0xe18] ss:$12 sps:$4 sm:$0xff]  }
 0x26c   : > { %5945 = vmatprep.subr.bf16.mxu0 %v8889_v4 }
 0x26e   : > { %7852 = vmatpush3.bf16.msra.mxu1 %v8891_v8  ;;  %v8944_v8 = vld [vmem:[%s9528_s6 + $0x136c] ss:$12 sps:$4 sm:$0xff]  }
 0x26f   : > { %5946 = vmatpush1.bf16.msra.mxu0 %v8887_v7  ;;  %7853 = vmatprep.subr.bf16.mxu1 %v8895_v11 }
 0x270   : > { %5947 = vmatprep.subr.bf16.mxu0 %v8894_v10  ;;  %v7705_v21 = vpop.f32.mrb[8].mxu1  ;;  %v8945_v10 = vld [vmem:[%s9528_s6 + $0xef0] ss:$12 sps:$4 sm:$0xff]  }
 0x271   : > { %v7706_v44 = vpop.f32.mrb[9].mxu1 }
 0x272   : > { %v7707_v17 = vadd.f32 %v7706_v44, %v7705_v21  ;;  %v7708_v18 = vpop.f32.mrb[10].mxu1  ;;  %7854 = vmatpush3.bf16.msra.mxu1 %v8896_v14  ;;  %v8942_v14 = vld [vmem:[%s9528_s6 + $0x1368] ss:$12 sps:$4 sm:$0xff]   ;;  %v261_v44 = vld [vmem:[#allocation2 + $0x1c0] sm:$0xff] }
 0x273   : > { %5948 = vmatpush1.bf16.msra.mxu0 %v8892_v59  ;;  %v7709_v19 = vpop.f32.mrb[11].mxu1  ;;  %7855 = vmatprep.subr.bf16.mxu1 %v8900_v13  ;;  %v8949_v13 = vld [vmem:[%s9528_s6 + $0x1384] ss:$12 sps:$4 sm:$0xff]   ;;  %v8950_v21 = vld [vmem:[%s9528_s6 + $0xfc8] ss:$12 sps:$4 sm:$0xff]  }
 0x274   : > { %5949 = vmatprep.subr.bf16.mxu0 %v8899_v12  ;;  %v10181_v24 = vadd.f32 %v7707_v17, %v10134_v31  ;;  %v7710_v27 = vadd.f32 %v7709_v19, %v7708_v18  ;;  %v8911_v31 = vld [vmem:[%s9528_s6 + $0xd88] ss:$12 sps:$4 sm:$0xff]   ;;  %v8946_v12 = vld [vmem:[%s9528_s6 + $0xe30] ss:$12 sps:$4 sm:$0xff]  }
 0x275   : > { %v232_v17 = vld [vmem:[#allocation2 + $0xd8] sm:$0xff] }
 0x276   : > { %v10185_v29 = vadd.f32 %v7710_v27, %v10138_v36  ;;  %7856 = vmatpush3.bf16.msra.mxu1 %v8901_v16  ;;  %v8915_v36 = vld [vmem:[%s9528_s6 + $0xe60] ss:$12 sps:$4 sm:$0xff]   ;;  %v264_v18 = vld [vmem:[#allocation2 + $0x1d8] sm:$0xff] }
 0x277   : > { %5950 = vmatpush1.bf16.msra.mxu0 %v8897_v1  ;;  %7857 = vmatprep.subr.bf16.mxu1 %v8905_v23  ;;  %v229_v16 = vld [vmem:[#allocation2 + $0xc0] sm:$0xff]  ;;  %v8951_v23 = vld [vmem:[%s9528_s6 + $0xf08] ss:$12 sps:$4 sm:$0xff]  }
 0x278   : > { %5951 = vmatprep.subr.bf16.mxu0 %v8904_v20  ;;  %v10230_v19 = vpack.c.bf16 %v261_v44, %v229_v16  ;;  %v8947_v20 = vld [vmem:[%s9528_s6 + $0x1380] ss:$12 sps:$4 sm:$0xff]   ;;  %v9005_v16 = vld [vmem:[%s9528_s6 + $0x1190] ss:$12 sps:$4 sm:$0xff]   ;;  %v9002_v44 = vld [vmem:[%s9528_s6 + $0x1488] ss:$12 sps:$4 sm:$0xff]  }
 0x279   : > { %v8955_v27 = vld [vmem:[%s9528_s6 + $0xfe0] ss:$12 sps:$4 sm:$0xff]  }
 0x27a   : > { %7858 = vmatpush3.bf16.msra.mxu1 %v8906_v32  ;;  %v8956_v32 = vld [vmem:[%s9528_s6 + $0xf20] ss:$12 sps:$4 sm:$0xff]  }
 0x27b   : > { %5952 = vmatpush1.bf16.msra.mxu0 %v8902_v28  ;;  %7865 = vmatprep.subr.bf16.mxu1 %v8910_v34  ;;  %v8952_v28 = vld [vmem:[%s9528_s6 + $0x1398] ss:$12 sps:$4 sm:$0xff]  }
 0x27c   : > { %5953 = vmatprep.subr.bf16.mxu0 %v8909_v33  ;;  %v8959_v33 = vld [vmem:[%s9528_s6 + $0x13b4] ss:$12 sps:$4 sm:$0xff]   ;;  %v8960_v34 = vld [vmem:[%s9528_s6 + $0xff8] ss:$12 sps:$4 sm:$0xff]  }
 0x27d   : > { %6470 = vmatmul.mubr.bf16.vlgmr.msra.gmra.mrb[36].mxu1 %v9911_v43  ;;  %v8924_v43 = vld [vmem:[%s9528_s6 + $0x130c] ss:$12 sps:$4 sm:$0xff]  }
 0x27e   : > { %7866 = vmatpush3.bf16.msra.mxu1 %v8911_v31  ;;  %6510 = vmatprep.mubr.bf16.mxu1 %v9917_v53  ;;  %v8930_v53 = vld [vmem:[%s9528_s6 + $0xea8] ss:$12 sps:$4 sm:$0xff]   ;;  %v8964_v31 = vld [vmem:[%s9528_s6 + $0x13cc] ss:$12 sps:$4 sm:$0xff]  }
 0x27f   : > { %5954 = vmatpush1.bf16.msra.mxu0 %v8907_v58  ;;  %7867 = vmatprep.subr.bf16.mxu1 %v8915_v36  ;;  %v8957_v58 = vld [vmem:[%s9528_s6 + $0x13b0] ss:$12 sps:$4 sm:$0xff]   ;;  %v8962_v36 = vld [vmem:[%s9528_s6 + $0x13c8] ss:$12 sps:$4 sm:$0xff]  }
 0x280   : > { %5955 = vmatprep.subr.bf16.mxu0 %v8914_v35  ;;  %v8965_v35 = vld [vmem:[%s9528_s6 + $0x1010] ss:$12 sps:$4 sm:$0xff]  }
 0x282   : > { %7868 = vmatpush3.bf16.msra.mxu1 %v8916_v37  ;;  %v8970_v37 = vld [vmem:[%s9528_s6 + $0x1028] ss:$12 sps:$4 sm:$0xff]  }
 0x283   : > { %5956 = vmatpush1.bf16.msra.mxu0 %v8912_v46  ;;  %7869 = vmatprep.subr.bf16.mxu1 %v8920_v38  ;;  %v8969_v46 = vld [vmem:[%s9528_s6 + $0x13e4] ss:$12 sps:$4 sm:$0xff]   ;;  %v8971_v38 = vld [vmem:[%s9528_s6 + $0xf68] ss:$12 sps:$4 sm:$0xff]  }
 0x284   : > { %5957 = vmatprep.subr.bf16.mxu0 %v8919_v0  ;;  %v8967_v0 = vld [vmem:[%s9528_s6 + $0x13e0] ss:$12 sps:$4 sm:$0xff]  }
 0x286   : > { %7870 = vmatpush3.bf16.msra.mxu1 %v8921_v39  ;;  %v8975_v39 = vld [vmem:[%s9528_s6 + $0x1040] ss:$12 sps:$4 sm:$0xff]  }
 0x287   : > { %5958 = vmatpush1.bf16.msra.mxu0 %v8917_v52  ;;  %7871 = vmatprep.subr.bf16.mxu1 %v8925_v41  ;;  %v8974_v52 = vld [vmem:[%s9528_s6 + $0x13fc] ss:$12 sps:$4 sm:$0xff]   ;;  %v8976_v41 = vld [vmem:[%s9528_s6 + $0xf80] ss:$12 sps:$4 sm:$0xff]  }
 0x288   : > { %5959 = vmatprep.subr.bf16.mxu0 %v8924_v43  ;;  %v8972_v43 = vld [vmem:[%s9528_s6 + $0x13f8] ss:$12 sps:$4 sm:$0xff]  }
 0x28a   : > { %7872 = vmatpush3.bf16.msra.mxu1 %v8926_v48  ;;  %v8980_v48 = vld [vmem:[%s9528_s6 + $0x1058] ss:$12 sps:$4 sm:$0xff]  }
 0x28b   : > { %5960 = vmatpush1.bf16.msra.mxu0 %v8922_v42  ;;  %7873 = vmatprep.subr.bf16.mxu1 %v8930_v53  ;;  %v8979_v42 = vld [vmem:[%s9528_s6 + $0x1414] ss:$12 sps:$4 sm:$0xff]   ;;  %v8977_v53 = vld [vmem:[%s9528_s6 + $0x1410] ss:$12 sps:$4 sm:$0xff]  }
 0x28c   : > { %5961 = vmatprep.subr.bf16.mxu0 %v8929_v50 }
 0x28e   : > { %7874 = vmatpush3.bf16.msra.mxu1 %v8931_v56 }
 0x28f   : > { %5962 = vmatpush1.bf16.msra.mxu0 %v8927_v15  ;;  %7875 = vmatprep.subr.bf16.mxu1 %v8935_v30  ;;  %v8981_v15 = vld [vmem:[%s9528_s6 + $0xf98] ss:$12 sps:$4 sm:$0xff]  }
 0x290   : > { %5963 = vmatprep.subr.bf16.mxu0 %v8934_v57  ;;  %v7727_v2 = vpop.f32.mrb[12].mxu1 }
 0x291   : > { %v7728_v26 = vpop.f32.mrb[13].mxu1 }
 0x292   : > { %v7729_v4 = vadd.f32 %v7728_v26, %v7727_v2  ;;  %v7730_v6 = vpop.f32.mrb[14].mxu1  ;;  %7876 = vmatpush3.bf16.msra.mxu1 %v8936_v62  ;;  %v8984_v62 = vld [vmem:[%s9528_s6 + $0x142c] ss:$12 sps:$4 sm:$0xff]   ;;  %v8986_v26 = vld [vmem:[%s9528_s6 + $0xfb0] ss:$12 sps:$4 sm:$0xff]  }
 0x293   : > { %5964 = vmatpush1.bf16.msra.mxu0 %v8932_v61  ;;  %v7731_v7 = vpop.f32.mrb[15].mxu1  ;;  %7877 = vmatprep.subr.bf16.mxu1 %v8940_v22 }
 0x294   : > { %5965 = vmatprep.subr.bf16.mxu0 %v8939_v63  ;;  %v10221_v11 = vadd.f32 %v7729_v4, %v10181_v24  ;;  %v7732_v59 = vadd.f32 %v7731_v7, %v7730_v6  ;;  %v8954_v24 = vld [vmem:[%s9528_s6 + $0x139c] ss:$12 sps:$4 sm:$0xff]   ;;  %v8989_v4 = vld [vmem:[%s9528_s6 + $0x1444] ss:$12 sps:$4 sm:$0xff]   ;;  %v8987_v7 = vld [vmem:[%s9528_s6 + $0x1440] ss:$12 sps:$4 sm:$0xff]  }
 0x295   : > { %v8985_v63 = vld [vmem:[%s9528_s6 + $0x1070] ss:$12 sps:$4 sm:$0xff]   ;;  %v8990_v6 = vld [vmem:[%s9528_s6 + $0x1148] ss:$12 sps:$4 sm:$0xff]  }
 0x296   : > { %v10228_v1 = vadd.f32 %v7732_v59, %v10185_v29  ;;  %7878 = vmatpush3.bf16.msra.mxu1 %v8941_v3  ;;  %v10237_v29 = vpack.c.bf16 %v264_v18, %v232_v17  ;;  %v8992_v59 = vld [vmem:[%s9528_s6 + $0x1458] ss:$12 sps:$4 sm:$0xff]   ;;  %v9006_v17 = vld [vmem:[%s9528_s6 + $0x10d0] ss:$12 sps:$4 sm:$0xff]   ;;  %v9010_v18 = vld [vmem:[%s9528_s6 + $0x11a8] ss:$12 sps:$4 sm:$0xff]  }
 0x297   : > { %5966 = vmatpush1.bf16.msra.mxu0 %v8937_v40  ;;  %7879 = vmatprep.subr.bf16.mxu1 %v8945_v10  ;;  %v8982_v40 = vld [vmem:[%s9528_s6 + $0x1428] ss:$12 sps:$4 sm:$0xff]  }
 0x298   : > { %5967 = vmatprep.subr.bf16.mxu0 %v8944_v8  ;;  %v8991_v8 = vld [vmem:[%s9528_s6 + $0x1088] ss:$12 sps:$4 sm:$0xff]  }
 0x299   : > { %v8994_v10 = vld [vmem:[%s9528_s6 + $0x145c] ss:$12 sps:$4 sm:$0xff]  }
 0x29a   : > { %7880 = vmatpush3.bf16.msra.mxu1 %v8946_v12  ;;  %v8999_v12 = vld [vmem:[%s9528_s6 + $0x1474] ss:$12 sps:$4 sm:$0xff]  }
 0x29b   : > { %5968 = vmatpush1.bf16.msra.mxu0 %v8942_v14  ;;  %7887 = vmatprep.subr.bf16.mxu1 %v8950_v21  ;;  %v8996_v14 = vld [vmem:[%s9528_s6 + $0x10a0] ss:$12 sps:$4 sm:$0xff]   ;;  %v8997_v21 = vld [vmem:[%s9528_s6 + $0x1470] ss:$12 sps:$4 sm:$0xff]  }
 0x29c   : > { %5980 = vmatprep.subr.bf16.mxu0 %v8949_v13  ;;  %v9000_v13 = vld [vmem:[%s9528_s6 + $0x1178] ss:$12 sps:$4 sm:$0xff]  }
 0x29d   : > { %6511 = vmatmul.mubr.bf16.vlgmr.msra.gmra.mrb[40].mxu1 %v9986_v5  ;;  %v8961_v5 = vld [vmem:[%s9528_s6 + $0xf38] ss:$12 sps:$4 sm:$0xff]  }
 0x29e   : > { %5970 = vmatmul.mubr.bf16.vlgmr.msra.gmra.mrb[0].mxu0 %v10230_v19  ;;  %7888 = vmatpush3.bf16.msra.mxu1 %v8951_v23  ;;  %v9011_v23 = vld [vmem:[%s9528_s6 + $0x10e8] ss:$12 sps:$4 sm:$0xff]  }
 0x29f   : > { %5981 = vmatpush1.bf16.msra.mxu0 %v8947_v20  ;;  %7889 = vmatprep.subr.bf16.mxu1 %v8955_v27  ;;  %v9007_v20 = vld [vmem:[%s9528_s6 + $0x14a0] ss:$12 sps:$4 sm:$0xff]  }
 0x2a0   : > { %5982 = vmatprep.subr.bf16.mxu0 %v8954_v24  ;;  %6551 = vmatprep.mubr.bf16.mxu1 %v9990_v9  ;;  %v8966_v9 = vld [vmem:[%s9528_s6 + $0xf50] ss:$12 sps:$4 sm:$0xff]   ;;  %v9015_v27 = vld [vmem:[%s9528_s6 + $0x11c0] ss:$12 sps:$4 sm:$0xff]  }
 0x2a1   : > { %6012 = vmatprep.mubr.bf16.mxu0 %v10237_v29  ;;  %v9014_v24 = vld [vmem:[%s9528_s6 + $0x14bc] ss:$12 sps:$4 sm:$0xff]  }
 0x2a2   : > { %7890 = vmatpush3.bf16.msra.mxu1 %v8956_v32  ;;  %v9016_v32 = vld [vmem:[%s9528_s6 + $0x1100] ss:$12 sps:$4 sm:$0xff]  }
 0x2a3   : > { %5983 = vmatpush1.bf16.msra.mxu0 %v8952_v28  ;;  %7891 = vmatprep.subr.bf16.mxu1 %v8960_v34  ;;  %v9012_v28 = vld [vmem:[%s9528_s6 + $0x14b8] ss:$12 sps:$4 sm:$0xff]  }
 0x2a4   : > { %5984 = vmatprep.subr.bf16.mxu0 %v8959_v33  ;;  %v9019_v33 = vld [vmem:[%s9528_s6 + $0x14d4] ss:$12 sps:$4 sm:$0xff]   ;;  %v9020_v34 = vld [vmem:[%s9528_s6 + $0x11d8] ss:$12 sps:$4 sm:$0xff]  }
 0x2a6   : > { %7892 = vmatpush3.bf16.msra.mxu1 %v8961_v5 }
 0x2a7   : > { %5985 = vmatpush1.bf16.msra.mxu0 %v8957_v58  ;;  %7893 = vmatprep.subr.bf16.mxu1 %v8965_v35 }
 0x2a8   : > { %5986 = vmatprep.subr.bf16.mxu0 %v8964_v31 }
 0x2aa   : > { %7894 = vmatpush3.bf16.msra.mxu1 %v8966_v9  ;;  %v9021_v9 = vld [vmem:[%s9528_s6 + $0x1118] ss:$12 sps:$4 sm:$0xff]  }
 0x2ab   : > { %5987 = vmatpush1.bf16.msra.mxu0 %v8962_v36  ;;  %7895 = vmatprep.subr.bf16.mxu1 %v8970_v37  ;;  %v9017_v36 = vld [vmem:[%s9528_s6 + $0x14d0] ss:$12 sps:$4 sm:$0xff]   ;;  %v9024_v37 = vld [vmem:[%s9528_s6 + $0x14ec] ss:$12 sps:$4 sm:$0xff]  }
 0x2ac   : > { %5988 = vmatprep.subr.bf16.mxu0 %v8969_v46 }
 0x2ae   : > { %7896 = vmatpush3.bf16.msra.mxu1 %v8971_v38 }
 0x2af   : > { %5989 = vmatpush1.bf16.msra.mxu0 %v8967_v0  ;;  %7897 = vmatprep.subr.bf16.mxu1 %v8975_v39  ;;  %v9025_v0 = vld [vmem:[%s9528_s6 + $0x11f0] ss:$12 sps:$4 sm:$0xff]   ;;  %v9022_v39 = vld [vmem:[%s9528_s6 + $0x14e8] ss:$12 sps:$4 sm:$0xff]  }
 0x2b0   : > { %5990 = vmatprep.subr.bf16.mxu0 %v8974_v52  ;;  %v7749_v50 = vpop.f32.mrb[16].mxu1 }
 0x2b1   : > { %v7750_v56 = vpop.f32.mrb[17].mxu1 }
 0x2b2   : > { %v7751_v57 = vadd.f32 %v7750_v56, %v7749_v50  ;;  %v7752_v30 = vpop.f32.mrb[18].mxu1  ;;  %7898 = vmatpush3.bf16.msra.mxu1 %v8976_v41  ;;  %v9026_v41 = vld [vmem:[%s9528_s6 + $0x1130] ss:$12 sps:$4 sm:$0xff]   ;;  %v234_v56 = vld [vmem:[#allocation2 + $0xe8] sm:$0xff] }
 0x2b3   : > { %5991 = vmatpush1.bf16.msra.mxu0 %v8972_v43  ;;  %v7753_v61 = vpop.f32.mrb[19].mxu1  ;;  %7899 = vmatprep.subr.bf16.mxu1 %v8980_v48  ;;  %v263_v48 = vld [vmem:[#allocation2 + $0x1d0] sm:$0xff] }
 0x2b4   : > { %5992 = vmatprep.subr.bf16.mxu0 %v8979_v42  ;;  %v10267_v22 = vadd.f32 %v7751_v57, %v10221_v11  ;;  %v7754_v2 = vadd.f32 %v7753_v61, %v7752_v30  ;;  %v8995_v11 = vld [vmem:[%s9528_s6 + $0x1160] ss:$12 sps:$4 sm:$0xff]   ;;  %v231_v42 = vld [vmem:[#allocation2 + $0xd0] sm:$0xff] }
 0x2b5   : > { %v9029_v50 = vld [vmem:[%s9528_s6 + $0x1504] ss:$12 sps:$4 sm:$0xff]   ;;  %v266_v57 = vld [vmem:[#allocation2 + $0x1e8] sm:$0xff] }
 0x2b6   : > { %v10271_v3 = vadd.f32 %v7754_v2, %v10228_v1  ;;  %7900 = vmatpush3.bf16.msra.mxu1 %v8981_v15  ;;  %v9004_v1 = vld [vmem:[%s9528_s6 + $0x148c] ss:$12 sps:$4 sm:$0xff]   ;;  %v10316_v15 = vpack.c.bf16 %v263_v48, %v231_v42  ;;  %v9031_v61 = vld [vmem:[%s9528_s6 + $0x1208] ss:$12 sps:$4 sm:$0xff]   ;;  %v9085_v42 = vld [vmem:[%s9528_s6 + $0x1490] ss:$12 sps:$4 sm:$0xff]  }
 0x2b7   : > { %5993 = vmatpush1.bf16.msra.mxu0 %v8977_v53  ;;  %7901 = vmatprep.subr.bf16.mxu1 %v8985_v63  ;;  %v9030_v53 = vld [vmem:[%s9528_s6 + $0x12c8] ss:$12 sps:$4 sm:$0xff]   ;;  %v9027_v30 = vld [vmem:[%s9528_s6 + $0x1500] ss:$12 sps:$4 sm:$0xff]   ;;  %v9032_v2 = vld [vmem:[%s9528_s6 + $0x1518] ss:$12 sps:$4 sm:$0xff]  }
 0x2b8   : > { %5994 = vmatprep.subr.bf16.mxu0 %v8984_v62  ;;  %v9034_v62 = vld [vmem:[%s9528_s6 + $0x151c] ss:$12 sps:$4 sm:$0xff]   ;;  %v9035_v63 = vld [vmem:[%s9528_s6 + $0x12e0] ss:$12 sps:$4 sm:$0xff]  }
 0x2b9   : > { %v9082_v48 = vld [vmem:[%s9528_s6 + $0x1608] ss:$12 sps:$4 sm:$0xff]  }
 0x2ba   : > { %7902 = vmatpush3.bf16.msra.mxu1 %v8986_v26  ;;  %v9040_v26 = vld [vmem:[%s9528_s6 + $0x12f8] ss:$12 sps:$4 sm:$0xff]  }
 0x2bb   : > { %5995 = vmatpush1.bf16.msra.mxu0 %v8982_v40  ;;  %7909 = vmatprep.subr.bf16.mxu1 %v8990_v6  ;;  %v9036_v40 = vld [vmem:[%s9528_s6 + $0x1220] ss:$12 sps:$4 sm:$0xff]  }
 0x2bc   : > { %5996 = vmatprep.subr.bf16.mxu0 %v8989_v4  ;;  %v9041_v4 = vld [vmem:[%s9528_s6 + $0x1238] ss:$12 sps:$4 sm:$0xff]  }
 0x2bd   : > { %6552 = vmatmul.mubr.bf16.vlgmr.msra.gmra.mrb[44].mxu1 %v10060_v55  ;;  %v9001_v55 = vld [vmem:[%s9528_s6 + $0x10b8] ss:$12 sps:$4 sm:$0xff]  }
 0x2be   : > { %7910 = vmatpush3.bf16.msra.mxu1 %v8991_v8  ;;  %6592 = vmatprep.mubr.bf16.mxu1 %v10064_v25  ;;  %v9009_v25 = vld [vmem:[%s9528_s6 + $0x14a4] ss:$12 sps:$4 sm:$0xff]   ;;  %v9044_v6 = vld [vmem:[%s9528_s6 + $0x154c] ss:$12 sps:$4 sm:$0xff]   ;;  %v9042_v8 = vld [vmem:[%s9528_s6 + $0x1548] ss:$12 sps:$4 sm:$0xff]  }
 0x2bf   : > { %5997 = vmatpush1.bf16.msra.mxu0 %v8987_v7  ;;  %7911 = vmatprep.subr.bf16.mxu1 %v8995_v11  ;;  %v9045_v7 = vld [vmem:[%s9528_s6 + $0x1310] ss:$12 sps:$4 sm:$0xff]   ;;  %v9050_v11 = vld [vmem:[%s9528_s6 + $0x1328] ss:$12 sps:$4 sm:$0xff]  }
 0x2c0   : > { %5998 = vmatprep.subr.bf16.mxu0 %v8994_v10  ;;  %v9049_v10 = vld [vmem:[%s9528_s6 + $0x1564] ss:$12 sps:$4 sm:$0xff]  }
 0x2c2   : > { %7912 = vmatpush3.bf16.msra.mxu1 %v8996_v14  ;;  %v9051_v14 = vld [vmem:[%s9528_s6 + $0x1268] ss:$12 sps:$4 sm:$0xff]  }
 0x2c3   : > { %5999 = vmatpush1.bf16.msra.mxu0 %v8992_v59  ;;  %7913 = vmatprep.subr.bf16.mxu1 %v9000_v13  ;;  %v9047_v59 = vld [vmem:[%s9528_s6 + $0x1560] ss:$12 sps:$4 sm:$0xff]  }
 0x2c4   : > { %6000 = vmatprep.subr.bf16.mxu0 %v8999_v12  ;;  %v9054_v12 = vld [vmem:[%s9528_s6 + $0x157c] ss:$12 sps:$4 sm:$0xff]   ;;  %v9055_v13 = vld [vmem:[%s9528_s6 + $0x1340] ss:$12 sps:$4 sm:$0xff]  }
 0x2c6   : > { %7914 = vmatpush3.bf16.msra.mxu1 %v9001_v55  ;;  %v9056_v55 = vld [vmem:[%s9528_s6 + $0x1280] ss:$12 sps:$4 sm:$0xff]  }
 0x2c7   : > { %6001 = vmatpush1.bf16.msra.mxu0 %v8997_v21  ;;  %7915 = vmatprep.subr.bf16.mxu1 %v9005_v16  ;;  %v9052_v21 = vld [vmem:[%s9528_s6 + $0x1578] ss:$12 sps:$4 sm:$0xff]  }
 0x2c8   : > { %6002 = vmatprep.subr.bf16.mxu0 %v9004_v1  ;;  %v9059_v1 = vld [vmem:[%s9528_s6 + $0x1594] ss:$12 sps:$4 sm:$0xff]   ;;  %v9060_v16 = vld [vmem:[%s9528_s6 + $0x1358] ss:$12 sps:$4 sm:$0xff]  }
 0x2ca   : > { %7916 = vmatpush3.bf16.msra.mxu1 %v9006_v17 }
 0x2cb   : > { %6003 = vmatpush1.bf16.msra.mxu0 %v9002_v44  ;;  %7917 = vmatprep.subr.bf16.mxu1 %v9010_v18 }
 0x2cc   : > { %6004 = vmatprep.subr.bf16.mxu0 %v9009_v25 }
 0x2ce   : > { %7918 = vmatpush3.bf16.msra.mxu1 %v9011_v23  ;;  %v9061_v23 = vld [vmem:[%s9528_s6 + $0x1298] ss:$12 sps:$4 sm:$0xff]  }
 0x2cf   : > { %6005 = vmatpush1.bf16.msra.mxu0 %v9007_v20  ;;  %7919 = vmatprep.subr.bf16.mxu1 %v9015_v27  ;;  %v9057_v20 = vld [vmem:[%s9528_s6 + $0x1590] ss:$12 sps:$4 sm:$0xff]   ;;  %v9064_v27 = vld [vmem:[%s9528_s6 + $0x15ac] ss:$12 sps:$4 sm:$0xff]  }
 0x2d0   : > { %6006 = vmatprep.subr.bf16.mxu0 %v9014_v24  ;;  %v7771_v58 = vpop.f32.mrb[20].mxu1 }
 0x2d1   : > { %v7772_v5 = vpop.f32.mrb[21].mxu1 }
 0x2d2   : > { %v7773_v31 = vadd.f32 %v7772_v5, %v7771_v58  ;;  %v7774_v35 = vpop.f32.mrb[22].mxu1  ;;  %7920 = vmatpush3.bf16.msra.mxu1 %v9016_v32  ;;  %v9062_v58 = vld [vmem:[%s9528_s6 + $0x15a8] ss:$12 sps:$4 sm:$0xff]   ;;  %v9066_v5 = vld [vmem:[%s9528_s6 + $0x12b0] ss:$12 sps:$4 sm:$0xff]  }
 0x2d3   : > { %6007 = vmatpush1.bf16.msra.mxu0 %v9012_v28  ;;  %v7775_v46 = vpop.f32.mrb[23].mxu1  ;;  %7921 = vmatprep.subr.bf16.mxu1 %v9020_v34  ;;  %v9065_v28 = vld [vmem:[%s9528_s6 + $0x1370] ss:$12 sps:$4 sm:$0xff]  }
 0x2d4   : > { %6008 = vmatprep.subr.bf16.mxu0 %v9019_v33  ;;  %v10307_v38 = vadd.f32 %v7773_v31, %v10267_v22  ;;  %v7776_v52 = vadd.f32 %v7775_v46, %v7774_v35  ;;  %v10322_v22 = vpack.c.bf16 %v266_v57, %v234_v56  ;;  %v9069_v31 = vld [vmem:[%s9528_s6 + $0x15c4] ss:$12 sps:$4 sm:$0xff]   ;;  %v9070_v35 = vld [vmem:[%s9528_s6 + $0x1448] ss:$12 sps:$4 sm:$0xff]   ;;  %v9087_v56 = vld [vmem:[%s9528_s6 + $0x1620] ss:$12 sps:$4 sm:$0xff]  }
 0x2d5   : > { %v9074_v46 = vld [vmem:[%s9528_s6 + $0x15dc] ss:$12 sps:$4 sm:$0xff]  }
 0x2d6   : > { %v10311_v43 = vadd.f32 %v7776_v52, %v10271_v3  ;;  %7922 = vmatpush3.bf16.msra.mxu1 %v9021_v9  ;;  %v9039_v3 = vld [vmem:[%s9528_s6 + $0x1534] ss:$12 sps:$4 sm:$0xff]  }
 0x2d7   : > { %6009 = vmatpush1.bf16.msra.mxu0 %v9017_v36  ;;  %7923 = vmatprep.subr.bf16.mxu1 %v9025_v0  ;;  %v9067_v36 = vld [vmem:[%s9528_s6 + $0x15c0] ss:$12 sps:$4 sm:$0xff]   ;;  %v9071_v9 = vld [vmem:[%s9528_s6 + $0x1388] ss:$12 sps:$4 sm:$0xff]   ;;  %v9072_v0 = vld [vmem:[%s9528_s6 + $0x15d8] ss:$12 sps:$4 sm:$0xff]  }
 0x2d8   : > { %6010 = vmatprep.subr.bf16.mxu0 %v9024_v37  ;;  %v9075_v37 = vld [vmem:[%s9528_s6 + $0x1460] ss:$12 sps:$4 sm:$0xff]   ;;  %v9091_v57 = vld [vmem:[%s9528_s6 + $0x13e8] ss:$12 sps:$4 sm:$0xff]  }
 0x2d9   : > { %v9079_v52 = vld [vmem:[%s9528_s6 + $0x15f4] ss:$12 sps:$4 sm:$0xff]  }
 0x2da   : > { %7924 = vmatpush3.bf16.msra.mxu1 %v9026_v41  ;;  %v9084_v41 = vld [vmem:[%s9528_s6 + $0x160c] ss:$12 sps:$4 sm:$0xff]  }
 0x2db   : > { %6011 = vmatpush1.bf16.msra.mxu0 %v9022_v39  ;;  %7931 = vmatprep.subr.bf16.mxu1 %v9030_v53  ;;  %v9080_v39 = vld [vmem:[%s9528_s6 + $0x1478] ss:$12 sps:$4 sm:$0xff]   ;;  %v9090_v53 = vld [vmem:[%s9528_s6 + $0x14a8] ss:$12 sps:$4 sm:$0xff]  }
 0x2dc   : > { %6023 = vmatprep.subr.bf16.mxu0 %v9029_v50  ;;  %v9086_v50 = vld [vmem:[%s9528_s6 + $0x13d0] ss:$12 sps:$4 sm:$0xff]  }
 0x2dd   : > { %6593 = vmatmul.mubr.bf16.vlgmr.msra.gmra.mrb[48].mxu1 %v10144_v45  ;;  %v9037_v45 = vld [vmem:[%s9528_s6 + $0x1530] ss:$12 sps:$4 sm:$0xff]  }
 0x2de   : > { %6013 = vmatmul.mubr.bf16.vlgmr.msra.gmra.mrb[0].mxu0 %v10316_v15  ;;  %7932 = vmatpush3.bf16.msra.mxu1 %v9031_v61  ;;  %v9095_v61 = vld [vmem:[%s9528_s6 + $0x14c0] ss:$12 sps:$4 sm:$0xff]  }
 0x2df   : > { %6024 = vmatpush1.bf16.msra.mxu0 %v9027_v30  ;;  %7933 = vmatprep.subr.bf16.mxu1 %v9035_v63  ;;  %v9094_v30 = vld [vmem:[%s9528_s6 + $0x163c] ss:$12 sps:$4 sm:$0xff]   ;;  %v9096_v63 = vld [vmem:[%s9528_s6 + $0x1400] ss:$12 sps:$4 sm:$0xff]  }
 0x2e0   : > { %6025 = vmatprep.subr.bf16.mxu0 %v9034_v62  ;;  %6633 = vmatprep.mubr.bf16.mxu1 %v10151_v47  ;;  %v9046_v47 = vld [vmem:[%s9528_s6 + $0x1250] ss:$12 sps:$4 sm:$0xff]   ;;  %v9092_v62 = vld [vmem:[%s9528_s6 + $0x1638] ss:$12 sps:$4 sm:$0xff]  }
 0x2e1   : > { %6055 = vmatprep.mubr.bf16.mxu0 %v10322_v22 }
 0x2e2   : > { %7934 = vmatpush3.bf16.msra.mxu1 %v9036_v40  ;;  %v9100_v40 = vld [vmem:[%s9528_s6 + $0x14d8] ss:$12 sps:$4 sm:$0xff]  }
 0x2e3   : > { %6026 = vmatpush1.bf16.msra.mxu0 %v9032_v2  ;;  %7935 = vmatprep.subr.bf16.mxu1 %v9040_v26  ;;  %v9099_v2 = vld [vmem:[%s9528_s6 + $0x1654] ss:$12 sps:$4 sm:$0xff]  }
 0x2e4   : > { %6027 = vmatprep.subr.bf16.mxu0 %v9039_v3 }
 0x2e6   : > { %7936 = vmatpush3.bf16.msra.mxu1 %v9041_v4 }
 0x2e7   : > { %6028 = vmatpush1.bf16.msra.mxu0 %v9037_v45  ;;  %7937 = vmatprep.subr.bf16.mxu1 %v9045_v7  ;;  %v9101_v7 = vld [vmem:[%s9528_s6 + $0x1418] ss:$12 sps:$4 sm:$0xff]  }
 0x2e8   : > { %6029 = vmatprep.subr.bf16.mxu0 %v9044_v6  ;;  %v9097_v6 = vld [vmem:[%s9528_s6 + $0x1650] ss:$12 sps:$4 sm:$0xff]  }
 0x2ea   : > { %7938 = vmatpush3.bf16.msra.mxu1 %v9046_v47  ;;  %v9104_v47 = vld [vmem:[%s9528_s6 + $0x166c] ss:$12 sps:$4 sm:$0xff]  }
 0x2eb   : > { %6030 = vmatpush1.bf16.msra.mxu0 %v9042_v8  ;;  %7939 = vmatprep.subr.bf16.mxu1 %v9050_v11 }
 0x2ec   : > { %6031 = vmatprep.subr.bf16.mxu0 %v9049_v10  ;;  %v9105_v10 = vld [vmem:[%s9528_s6 + $0x14f0] ss:$12 sps:$4 sm:$0xff]  }
 0x2ee   : > { %7940 = vmatpush3.bf16.msra.mxu1 %v9051_v14  ;;  %v9102_v14 = vld [vmem:[%s9528_s6 + $0x1668] ss:$12 sps:$4 sm:$0xff]  }
 0x2ef   : > { %6032 = vmatpush1.bf16.msra.mxu0 %v9047_v59  ;;  %7941 = vmatprep.subr.bf16.mxu1 %v9055_v13  ;;  %v9106_v13 = vld [vmem:[%s9528_s6 + $0x1430] ss:$12 sps:$4 sm:$0xff]  }
 0x2f0   : > { %6033 = vmatprep.subr.bf16.mxu0 %v9054_v12  ;;  %v7793_v44 = vpop.f32.mrb[24].mxu1 }
 0x2f1   : > { %v7794_v17 = vpop.f32.mrb[25].mxu1 }
 0x2f2   : > { %v7795_v25 = vadd.f32 %v7794_v17, %v7793_v44  ;;  %v7796_v18 = vpop.f32.mrb[26].mxu1  ;;  %7942 = vmatpush3.bf16.msra.mxu1 %v9056_v55  ;;  %v265_v55 = vld [vmem:[#allocation2 + $0x1e0] sm:$0xff]  ;;  %v236_v17 = vld [vmem:[#allocation2 + $0xf8] sm:$0xff] }
 0x2f3   : > { %6034 = vmatpush1.bf16.msra.mxu0 %v9052_v21  ;;  %v7797_v24 = vpop.f32.mrb[27].mxu1  ;;  %7943 = vmatprep.subr.bf16.mxu1 %v9060_v16  ;;  %v233_v21 = vld [vmem:[#allocation2 + $0xe0] sm:$0xff]  ;;  %v9110_v16 = vld [vmem:[%s9528_s6 + $0x15c8] ss:$12 sps:$4 sm:$0xff]  }
 0x2f4   : > { %6035 = vmatprep.subr.bf16.mxu0 %v9059_v1  ;;  %v10353_v32 = vadd.f32 %v7795_v25, %v10307_v38  ;;  %v7798_v33 = vadd.f32 %v7797_v24, %v7796_v18  ;;  %v9076_v38 = vld [vmem:[%s9528_s6 + $0x13a0] ss:$12 sps:$4 sm:$0xff]   ;;  %v9109_v1 = vld [vmem:[%s9528_s6 + $0x1684] ss:$12 sps:$4 sm:$0xff]   ;;  %v10402_v44 = vpack.c.bf16 %v265_v55, %v233_v21  ;;  %v268_v25 = vld [vmem:[#allocation2 + $0x1f8] sm:$0xff] }
 0x2f5   : > { %v9107_v18 = vld [vmem:[%s9528_s6 + $0x1680] ss:$12 sps:$4 sm:$0xff]   ;;  %v9162_v21 = vld [vmem:[%s9528_s6 + $0x1788] ss:$12 sps:$4 sm:$0xff]   ;;  %v9166_v55 = vld [vmem:[%s9528_s6 + $0x16d0] ss:$12 sps:$4 sm:$0xff]  }
 0x2f6   : > { %v10356_v34 = vadd.f32 %v7798_v33, %v10311_v43  ;;  %7944 = vmatpush3.bf16.msra.mxu1 %v9061_v23  ;;  %v9077_v43 = vld [vmem:[%s9528_s6 + $0x15f0] ss:$12 sps:$4 sm:$0xff]   ;;  %v9115_v24 = vld [vmem:[%s9528_s6 + $0x15e0] ss:$12 sps:$4 sm:$0xff]  }
 0x2f7   : > { %6036 = vmatpush1.bf16.msra.mxu0 %v9057_v20  ;;  %7945 = vmatprep.subr.bf16.mxu1 %v9065_v28  ;;  %v9111_v20 = vld [vmem:[%s9528_s6 + $0x1508] ss:$12 sps:$4 sm:$0xff]   ;;  %v9112_v28 = vld [vmem:[%s9528_s6 + $0x1698] ss:$12 sps:$4 sm:$0xff]  }
 0x2f8   : > { %6037 = vmatprep.subr.bf16.mxu0 %v9064_v27  ;;  %v9114_v23 = vld [vmem:[%s9528_s6 + $0x169c] ss:$12 sps:$4 sm:$0xff]   ;;  %v10408_v27 = vpack.c.bf16 %v268_v25, %v236_v17  ;;  %v9119_v33 = vld [vmem:[%s9528_s6 + $0x16b4] ss:$12 sps:$4 sm:$0xff]  }
 0x2f9   : > { %v9171_v17 = vld [vmem:[%s9528_s6 + $0x16e8] ss:$12 sps:$4 sm:$0xff]  }
 0x2fa   : > { %7946 = vmatpush3.bf16.msra.mxu1 %v9066_v5  ;;  %v9124_v5 = vld [vmem:[%s9528_s6 + $0x16cc] ss:$12 sps:$4 sm:$0xff]   ;;  %v9174_v25 = vld [vmem:[%s9528_s6 + $0x17bc] ss:$12 sps:$4 sm:$0xff]  }
 0x2fb   : > { %6038 = vmatpush1.bf16.msra.mxu0 %v9062_v58  ;;  %7953 = vmatprep.subr.bf16.mxu1 %v9070_v35  ;;  %v9121_v58 = vld [vmem:[%s9528_s6 + $0x1538] ss:$12 sps:$4 sm:$0xff]   ;;  %v9122_v35 = vld [vmem:[%s9528_s6 + $0x16c8] ss:$12 sps:$4 sm:$0xff]  }
 0x2fc   : > { %6039 = vmatprep.subr.bf16.mxu0 %v9069_v31  ;;  %v9125_v31 = vld [vmem:[%s9528_s6 + $0x1610] ss:$12 sps:$4 sm:$0xff]  }
 0x2fd   : > { %6634 = vmatmul.mubr.bf16.vlgmr.msra.gmra.mrb[52].mxu1 %v10230_v19  ;;  %v9081_v19 = vld [vmem:[%s9528_s6 + $0x13b8] ss:$12 sps:$4 sm:$0xff]  }
 0x2fe   : > { %7954 = vmatpush3.bf16.msra.mxu1 %v9071_v9  ;;  %6674 = vmatprep.mubr.bf16.mxu1 %v10237_v29  ;;  %v9089_v29 = vld [vmem:[%s9528_s6 + $0x1624] ss:$12 sps:$4 sm:$0xff]   ;;  %v9130_v9 = vld [vmem:[%s9528_s6 + $0x1628] ss:$12 sps:$4 sm:$0xff]  }
 0x2ff   : > { %6040 = vmatpush1.bf16.msra.mxu0 %v9067_v36  ;;  %7955 = vmatprep.subr.bf16.mxu1 %v9075_v37  ;;  %v9129_v36 = vld [vmem:[%s9528_s6 + $0x16e4] ss:$12 sps:$4 sm:$0xff]   ;;  %v9131_v37 = vld [vmem:[%s9528_s6 + $0x1568] ss:$12 sps:$4 sm:$0xff]  }
 0x300   : > { %6041 = vmatprep.subr.bf16.mxu0 %v9074_v46  ;;  %v9127_v46 = vld [vmem:[%s9528_s6 + $0x16e0] ss:$12 sps:$4 sm:$0xff]  }
 0x302   : > { %7956 = vmatpush3.bf16.msra.mxu1 %v9076_v38  ;;  %v9135_v38 = vld [vmem:[%s9528_s6 + $0x1640] ss:$12 sps:$4 sm:$0xff]  }
 0x303   : > { %6042 = vmatpush1.bf16.msra.mxu0 %v9072_v0  ;;  %7957 = vmatprep.subr.bf16.mxu1 %v9080_v39  ;;  %v9134_v0 = vld [vmem:[%s9528_s6 + $0x16fc] ss:$12 sps:$4 sm:$0xff]   ;;  %v9136_v39 = vld [vmem:[%s9528_s6 + $0x1580] ss:$12 sps:$4 sm:$0xff]  }
 0x304   : > { %6043 = vmatprep.subr.bf16.mxu0 %v9079_v52  ;;  %v9132_v52 = vld [vmem:[%s9528_s6 + $0x16f8] ss:$12 sps:$4 sm:$0xff]  }
 0x306   : > { %7958 = vmatpush3.bf16.msra.mxu1 %v9081_v19  ;;  %v9140_v19 = vld [vmem:[%s9528_s6 + $0x1658] ss:$12 sps:$4 sm:$0xff]  }
 0x307   : > { %6044 = vmatpush1.bf16.msra.mxu0 %v9077_v43  ;;  %7959 = vmatprep.subr.bf16.mxu1 %v9085_v42  ;;  %v9139_v43 = vld [vmem:[%s9528_s6 + $0x1714] ss:$12 sps:$4 sm:$0xff]  }
 0x308   : > { %6045 = vmatprep.subr.bf16.mxu0 %v9084_v41 }
 0x30a   : > { %7960 = vmatpush3.bf16.msra.mxu1 %v9086_v50 }
 0x30b   : > { %6046 = vmatpush1.bf16.msra.mxu0 %v9082_v48  ;;  %7961 = vmatprep.subr.bf16.mxu1 %v9090_v53  ;;  %v9141_v53 = vld [vmem:[%s9528_s6 + $0x1598] ss:$12 sps:$4 sm:$0xff]  }
 0x30c   : > { %6047 = vmatprep.subr.bf16.mxu0 %v9089_v29  ;;  %v9137_v29 = vld [vmem:[%s9528_s6 + $0x1710] ss:$12 sps:$4 sm:$0xff]  }
 0x30e   : > { %7962 = vmatpush3.bf16.msra.mxu1 %v9091_v57  ;;  %v9144_v57 = vld [vmem:[%s9528_s6 + $0x172c] ss:$12 sps:$4 sm:$0xff]  }
 0x30f   : > { %6048 = vmatpush1.bf16.msra.mxu0 %v9087_v56  ;;  %7963 = vmatprep.subr.bf16.mxu1 %v9095_v61 }
 0x310   : > { %6049 = vmatprep.subr.bf16.mxu0 %v9094_v30  ;;  %v7815_v3 = vpop.f32.mrb[28].mxu1  ;;  %v9145_v30 = vld [vmem:[%s9528_s6 + $0x1670] ss:$12 sps:$4 sm:$0xff]  }
 0x311   : > { %v7816_v26 = vpop.f32.mrb[29].mxu1 }
 0x312   : > { %v7817_v45 = vadd.f32 %v7816_v26, %v7815_v3  ;;  %v7818_v4 = vpop.f32.mrb[30].mxu1  ;;  %7964 = vmatpush3.bf16.msra.mxu1 %v9096_v63  ;;  %v9149_v3 = vld [vmem:[%s9528_s6 + $0x1744] ss:$12 sps:$4 sm:$0xff]   ;;  %v9150_v26 = vld [vmem:[%s9528_s6 + $0x1748] ss:$12 sps:$4 sm:$0xff]  }
 0x313   : > { %6050 = vmatpush1.bf16.msra.mxu0 %v9092_v62  ;;  %v7819_v8 = vpop.f32.mrb[31].mxu1  ;;  %7965 = vmatprep.subr.bf16.mxu1 %v9100_v40  ;;  %v9146_v40 = vld [vmem:[%s9528_s6 + $0x15b0] ss:$12 sps:$4 sm:$0xff]  }
 0x314   : > { %6051 = vmatprep.subr.bf16.mxu0 %v9099_v2  ;;  %v10393_v11 = vadd.f32 %v7817_v45, %v10353_v32  ;;  %v7820_v59 = vadd.f32 %v7819_v8, %v7818_v4  ;;  %v9116_v32 = vld [vmem:[%s9528_s6 + $0x1520] ss:$12 sps:$4 sm:$0xff]   ;;  %v9142_v2 = vld [vmem:[%s9528_s6 + $0x1728] ss:$12 sps:$4 sm:$0xff]   ;;  %v9152_v8 = vld [vmem:[%s9528_s6 + $0x1758] ss:$12 sps:$4 sm:$0xff]  }
 0x315   : > { %v9147_v45 = vld [vmem:[%s9528_s6 + $0x1740] ss:$12 sps:$4 sm:$0xff]   ;;  %v9151_v4 = vld [vmem:[%s9528_s6 + $0x1688] ss:$12 sps:$4 sm:$0xff]  }
 0x316   : > { %v10397_v12 = vadd.f32 %v7820_v59, %v10356_v34  ;;  %7966 = vmatpush3.bf16.msra.mxu1 %v9101_v7  ;;  %v9120_v34 = vld [vmem:[%s9528_s6 + $0x15f8] ss:$12 sps:$4 sm:$0xff]   ;;  %v9155_v7 = vld [vmem:[%s9528_s6 + $0x1760] ss:$12 sps:$4 sm:$0xff]   ;;  %v9157_v59 = vld [vmem:[%s9528_s6 + $0x1770] ss:$12 sps:$4 sm:$0xff]  }
 0x317   : > { %6052 = vmatpush1.bf16.msra.mxu0 %v9097_v6  ;;  %7967 = vmatprep.subr.bf16.mxu1 %v9105_v10  ;;  %v9154_v6 = vld [vmem:[%s9528_s6 + $0x175c] ss:$12 sps:$4 sm:$0xff]   ;;  %v9159_v10 = vld [vmem:[%s9528_s6 + $0x1774] ss:$12 sps:$4 sm:$0xff]  }
 0x318   : > { %6053 = vmatprep.subr.bf16.mxu0 %v9104_v47  ;;  %v9156_v47 = vld [vmem:[%s9528_s6 + $0x16a0] ss:$12 sps:$4 sm:$0xff]  }
 0x31a   : > { %7968 = vmatpush3.bf16.msra.mxu1 %v9106_v13  ;;  %v9165_v13 = vld [vmem:[%s9528_s6 + $0x1790] ss:$12 sps:$4 sm:$0xff]  }
 0x31b   : > { %6054 = vmatpush1.bf16.msra.mxu0 %v9102_v14  ;;  %7975 = vmatprep.subr.bf16.mxu1 %v9110_v16  ;;  %v9161_v14 = vld [vmem:[%s9528_s6 + $0x16b8] ss:$12 sps:$4 sm:$0xff]   ;;  %v9170_v16 = vld [vmem:[%s9528_s6 + $0x17a8] ss:$12 sps:$4 sm:$0xff]  }
 0x31c   : > { %6066 = vmatprep.subr.bf16.mxu0 %v9109_v1  ;;  %v9169_v1 = vld [vmem:[%s9528_s6 + $0x17a4] ss:$12 sps:$4 sm:$0xff]  }
 0x31d   : > { %6675 = vmatmul.mubr.bf16.vlgmr.msra.gmra.mrb[56].mxu1 %v10316_v15  ;;  %v9117_v15 = vld [vmem:[%s9528_s6 + $0x16b0] ss:$12 sps:$4 sm:$0xff]  }
 0x31e   : > { %6056 = vmatmul.mubr.bf16.vlgmr.msra.gmra.mrb[0].mxu0 %v10402_v44  ;;  %7976 = vmatpush3.bf16.msra.mxu1 %v9111_v20  ;;  %v9172_v20 = vld [vmem:[%s9528_s6 + $0x17b8] ss:$12 sps:$4 sm:$0xff]  }
 0x31f   : > { %6067 = vmatpush1.bf16.msra.mxu0 %v9107_v18  ;;  %7977 = vmatprep.subr.bf16.mxu1 %v9115_v24  ;;  %v9175_v18 = vld [vmem:[%s9528_s6 + $0x17c0] ss:$12 sps:$4 sm:$0xff]  }
 0x320   : > { %6068 = vmatprep.subr.bf16.mxu0 %v9114_v23  ;;  %6715 = vmatprep.mubr.bf16.mxu1 %v10322_v22  ;;  %v9126_v22 = vld [vmem:[%s9528_s6 + $0x1550] ss:$12 sps:$4 sm:$0xff]   ;;  %v9176_v23 = vld [vmem:[%s9528_s6 + $0x1700] ss:$12 sps:$4 sm:$0xff]  }
 0x321   : > { %6098 = vmatprep.mubr.bf16.mxu0 %v10408_v27  ;;  %v9179_v24 = vld [vmem:[%s9528_s6 + $0x17d4] ss:$12 sps:$4 sm:$0xff]  }
 0x322   : > { %7978 = vmatpush3.bf16.msra.mxu1 %v9116_v32 }
 0x323   : > { %6069 = vmatpush1.bf16.msra.mxu0 %v9112_v28  ;;  %7979 = vmatprep.subr.bf16.mxu1 %v9120_v34 }
 0x324   : > { %6070 = vmatprep.subr.bf16.mxu0 %v9119_v33 }
 0x326   : > { %7980 = vmatpush3.bf16.msra.mxu1 %v9121_v58  ;;  %v9181_v58 = vld [vmem:[%s9528_s6 + $0x1718] ss:$12 sps:$4 sm:$0xff]  }
 0x327   : > { %6071 = vmatpush1.bf16.msra.mxu0 %v9117_v15  ;;  %7981 = vmatprep.subr.bf16.mxu1 %v9125_v31  ;;  %v9177_v15 = vld [vmem:[%s9528_s6 + $0x17d0] ss:$12 sps:$4 sm:$0xff]   ;;  %v9184_v31 = vld [vmem:[%s9528_s6 + $0x17ec] ss:$12 sps:$4 sm:$0xff]  }
 0x328   : > { %6072 = vmatprep.subr.bf16.mxu0 %v9124_v5 }
 0x32a   : > { %7982 = vmatpush3.bf16.msra.mxu1 %v9126_v22 }
 0x32b   : > { %6073 = vmatpush1.bf16.msra.mxu0 %v9122_v35  ;;  %7983 = vmatprep.subr.bf16.mxu1 %v9130_v9  ;;  %v9185_v35 = vld [vmem:[%s9528_s6 + $0x17f0] ss:$12 sps:$4 sm:$0xff]   ;;  %v9182_v9 = vld [vmem:[%s9528_s6 + $0x17e8] ss:$12 sps:$4 sm:$0xff]  }
 0x32c   : > { %6074 = vmatprep.subr.bf16.mxu0 %v9129_v36 }
 0x32e   : > { %7984 = vmatpush3.bf16.msra.mxu1 %v9131_v37  ;;  %v9186_v37 = vld [vmem:[%s9528_s6 + $0x1730] ss:$12 sps:$4 sm:$0xff]  }
 0x32f   : > { %6075 = vmatpush1.bf16.msra.mxu0 %v9127_v46  ;;  %7985 = vmatprep.subr.bf16.mxu1 %v9135_v38  ;;  %v267_v38 = vld [vmem:[#allocation2 + $0x1f0] sm:$0xff] }
 0x330   : > { %6076 = vmatprep.subr.bf16.mxu0 %v9134_v0  ;;  %v7837_v41 = vpop.f32.mrb[32].mxu1  ;;  %v235_v0 = vld [vmem:[#allocation2 + $0xf0] sm:$0xff] }
 0x331   : > { %v7838_v42 = vpop.f32.mrb[33].mxu1 }
 0x332   : > { %v7839_v48 = vadd.f32 %v7838_v42, %v7837_v41  ;;  %v7840_v50 = vpop.f32.mrb[34].mxu1  ;;  %7986 = vmatpush3.bf16.msra.mxu1 %v9136_v39 }
 0x333   : > { %6077 = vmatpush1.bf16.msra.mxu0 %v9132_v52  ;;  %v7841_v56 = vpop.f32.mrb[35].mxu1  ;;  %7987 = vmatprep.subr.bf16.mxu1 %v9140_v19  ;;  %v299_v52 = vpack.c.bf16 %v267_v38, %v235_v0 }
 0x334   : > { %6078 = vmatprep.subr.bf16.mxu0 %v9139_v43  ;;  %v10439_v61 = vadd.f32 %v7839_v48, %v10393_v11  ;;  %v7842_v62 = vadd.f32 %v7841_v56, %v7840_v50  ;;  %v9160_v11 = vld [vmem:[%s9528_s6 + $0x1778] ss:$12 sps:$4 sm:$0xff]  }
 0x336   : > { %v10442_v63 = vadd.f32 %v7842_v62, %v10397_v12  ;;  %7988 = vmatpush3.bf16.msra.mxu1 %v9141_v53  ;;  %v9164_v12 = vld [vmem:[%s9528_s6 + $0x178c] ss:$12 sps:$4 sm:$0xff]  }
 0x337   : > { %6079 = vmatpush1.bf16.msra.mxu0 %v9137_v29  ;;  %7989 = vmatprep.subr.bf16.mxu1 %v9145_v30 }
 0x338   : > { %6080 = vmatprep.subr.bf16.mxu0 %v9144_v57 }
 0x33a   : > { %7990 = vmatpush3.bf16.msra.mxu1 %v9146_v40 }
 0x33b   : > { %6081 = vmatpush1.bf16.msra.mxu0 %v9142_v2  ;;  %7997 = vmatprep.subr.bf16.mxu1 %v9150_v26 }
 0x33c   : > { %6082 = vmatprep.subr.bf16.mxu0 %v9149_v3 }
 0x33d   : > { %6716 = vmatmul.mubr.bf16.vlgmr.msra.gmra.mrb[60].mxu1 %v10402_v44  ;;  %v9167_v44 = vld [vmem:[%s9528_s6 + $0x17a0] ss:$12 sps:$4 sm:$0xff]  }
 0x33e   : > { %7998 = vmatpush3.bf16.msra.mxu1 %v9151_v4  ;;  %6756 = vmatprep.mubr.bf16.mxu1 %v10408_v27  ;;  %v9180_v27 = vld [vmem:[%s9528_s6 + $0x17d8] ss:$12 sps:$4 sm:$0xff]  }
 0x33f   : > { %6083 = vmatpush1.bf16.msra.mxu0 %v9147_v45  ;;  %7999 = vmatprep.subr.bf16.mxu1 %v9155_v7 }
 0x340   : > { %6084 = vmatprep.subr.bf16.mxu0 %v9154_v6 }
 0x342   : > { %8000 = vmatpush3.bf16.msra.mxu1 %v9156_v47 }
 0x343   : > { %6085 = vmatpush1.bf16.msra.mxu0 %v9152_v8  ;;  %8001 = vmatprep.subr.bf16.mxu1 %v9160_v11 }
 0x344   : > { %6086 = vmatprep.subr.bf16.mxu0 %v9159_v10 }
 0x346   : > { %8002 = vmatpush3.bf16.msra.mxu1 %v9161_v14 }
 0x347   : > { %6087 = vmatpush1.bf16.msra.mxu0 %v9157_v59  ;;  %8003 = vmatprep.subr.bf16.mxu1 %v9165_v13 }
 0x348   : > { %6088 = vmatprep.subr.bf16.mxu0 %v9164_v12 }
 0x34a   : > { %8004 = vmatpush3.bf16.msra.mxu1 %v9166_v55 }
 0x34b   : > { %6089 = vmatpush1.bf16.msra.mxu0 %v9162_v21  ;;  %8005 = vmatprep.subr.bf16.mxu1 %v9170_v16 }
 0x34c   : > { %6090 = vmatprep.subr.bf16.mxu0 %v9169_v1 }
 0x34e   : > { %8006 = vmatpush3.bf16.msra.mxu1 %v9171_v17 }
 0x34f   : > { %6091 = vmatpush1.bf16.msra.mxu0 %v9167_v44  ;;  %8007 = vmatprep.subr.bf16.mxu1 %v9175_v18 }
 0x350   : > { %6092 = vmatprep.subr.bf16.mxu0 %v9174_v25  ;;  %v7859_v28 = vpop.f32.mrb[36].mxu1 }
 0x351   : > { %v7860_v32 = vpop.f32.mrb[37].mxu1 }
 0x352   : > { %v7861_v33 = vadd.f32 %v7860_v32, %v7859_v28  ;;  %v7862_v34 = vpop.f32.mrb[38].mxu1  ;;  %8008 = vmatpush3.bf16.msra.mxu1 %v9176_v23 }
 0x353   : > { %6093 = vmatpush1.bf16.msra.mxu0 %v9172_v20  ;;  %v7863_v5 = vpop.f32.mrb[39].mxu1  ;;  %8009 = vmatprep.subr.bf16.mxu1 %v9180_v27 }
 0x354   : > { %6094 = vmatprep.subr.bf16.mxu0 %v9179_v24  ;;  %v6472_v22 = vadd.f32 %v7861_v33, %v10439_v61  ;;  %v7864_v36 = vadd.f32 %v7863_v5, %v7862_v34 }
 0x356   : > { %v6475_v46 = vadd.f32 %v7864_v36, %v10442_v63  ;;  %8010 = vmatpush3.bf16.msra.mxu1 %v9181_v58 }
 0x357   : > { %6095 = vmatpush1.bf16.msra.mxu0 %v9177_v15  ;;  %8011 = vmatprep.subr.bf16.mxu1 %v9185_v35 }
 0x358   : > { %6096 = vmatprep.subr.bf16.mxu0 %v9184_v31 }
 0x35a   : > { %8012 = vmatpush3.bf16.msra.mxu1 %v9186_v37 }
 0x35b   : > { %6097 = vmatpush1.bf16.msra.mxu0 %v9182_v9 }
 0x35d   : > { %6757 = vmatmul.mubr.bf16.vlgmr.msra.gmra.mrb[64].mxu1 %v299_v52 }
 0x35e   : > { %6099 = vmatmul.mubr.bf16.vlgmr.msra.gmra.mrb[0].mxu0 %v299_v52 }
 0x370   : > { %v7881_v39 = vpop.f32.mrb[40].mxu1 }
 0x371   : > { %v7882_v43 = vpop.f32.mrb[41].mxu1 }
 0x372   : > { %v7883_v19 = vadd.f32 %v7882_v43, %v7881_v39  ;;  %v7884_v41 = vpop.f32.mrb[42].mxu1 }
 0x373   : > { %v7885_v42 = vpop.f32.mrb[43].mxu1 }
 0x374   : > { %v6513_v48 = vadd.f32 %v7883_v19, %v6472_v22  ;;  %v7886_v50 = vadd.f32 %v7885_v42, %v7884_v41 }
 0x376   : > { %v6516_v29 = vadd.f32 %v7886_v50, %v6475_v46 }
 0x390   : > { %v7903_v53 = vpop.f32.mrb[44].mxu1 }
 0x391   : > { %v7904_v56 = vpop.f32.mrb[45].mxu1 }
 0x392   : > { %v7905_v57 = vadd.f32 %v7904_v56, %v7903_v53  ;;  %v7906_v30 = vpop.f32.mrb[46].mxu1 }
 0x393   : > { %v7907_v61 = vpop.f32.mrb[47].mxu1 }
 0x394   : > { %v6554_v62 = vadd.f32 %v7905_v57, %v6513_v48  ;;  %v7908_v63 = vadd.f32 %v7907_v61, %v7906_v30 }
 0x396   : > { %v6557_v2 = vadd.f32 %v7908_v63, %v6516_v29 }
 0x3b0   : > { %v7925_v40 = vpop.f32.mrb[48].mxu1 }
 0x3b1   : > { %v7926_v3 = vpop.f32.mrb[49].mxu1 }
 0x3b2   : > { %v7927_v26 = vadd.f32 %v7926_v3, %v7925_v40  ;;  %v7928_v45 = vpop.f32.mrb[50].mxu1 }
 0x3b3   : > { %v7929_v4 = vpop.f32.mrb[51].mxu1 }
 0x3b4   : > { %v6595_v6 = vadd.f32 %v7927_v26, %v6554_v62  ;;  %v7930_v7 = vadd.f32 %v7929_v4, %v7928_v45 }
 0x3b6   : > { %v6598_v8 = vadd.f32 %v7930_v7, %v6557_v2 }
 0x3d0   : > { %v7947_v47 = vpop.f32.mrb[52].mxu1 }
 0x3d1   : > { %v7948_v10 = vpop.f32.mrb[53].mxu1 }
 0x3d2   : > { %v7949_v11 = vadd.f32 %v7948_v10, %v7947_v47  ;;  %v7950_v59 = vpop.f32.mrb[54].mxu1 }
 0x3d3   : > { %v7951_v14 = vpop.f32.mrb[55].mxu1 }
 0x3d4   : > { %v6636_v12 = vadd.f32 %v7949_v11, %v6595_v6  ;;  %v7952_v13 = vadd.f32 %v7951_v14, %v7950_v59 }
 0x3d6   : > { %v6639_v21 = vadd.f32 %v7952_v13, %v6598_v8 }
 0x3f0   : > { %v7969_v55 = vpop.f32.mrb[56].mxu1 }
 0x3f1   : > { %v7970_v1 = vpop.f32.mrb[57].mxu1 }
 0x3f2   : > { %v7971_v16 = vadd.f32 %v7970_v1, %v7969_v55  ;;  %v7972_v44 = vpop.f32.mrb[58].mxu1 }
 0x3f3   : > { %v7973_v17 = vpop.f32.mrb[59].mxu1 }
 0x3f4   : > { %v6677_v25 = vadd.f32 %v7971_v16, %v6636_v12  ;;  %v7974_v18 = vadd.f32 %v7973_v17, %v7972_v44 }
 0x3f6   : > { %v6680_v20 = vadd.f32 %v7974_v18, %v6639_v21 }
 0x410   : > { %v7991_v23 = vpop.f32.mrb[60].mxu1 }
 0x411   : > { %v7992_v24 = vpop.f32.mrb[61].mxu1 }
 0x412   : > { %v7993_v27 = vadd.f32 %v7992_v24, %v7991_v23  ;;  %v7994_v28 = vpop.f32.mrb[62].mxu1 }
 0x413   : > { %v7995_v32 = vpop.f32.mrb[63].mxu1 }
 0x414   : > { %v6718_v33 = vadd.f32 %v7993_v27, %v6677_v25  ;;  %v7996_v34 = vadd.f32 %v7995_v32, %v7994_v28 }
 0x416   : > { %v6721_v15 = vadd.f32 %v7996_v34, %v6680_v20 }
 0x430   : > { %v8013_v5 = vpop.f32.mrb[64].mxu1 }
 0x431   : > { %v6100_v58 = vpop.f32.mrb[0].mxu0  ;;  %v8014_v22 = vpop.f32.mrb[65].mxu1 }
 0x432   : > { %v8019_v31 = vadd.f32 %v6100_v58, %v10090_v49  ;;  %v6102_v35 = vpop.f32.mrb[1].mxu0  ;;  %v8015_v9 = vadd.f32 %v8014_v22, %v8013_v5  ;;  %v8016_v37 = vpop.f32.mrb[66].mxu1 }
 0x433   : > { %v8020_v36 = vadd.f32 %v6102_v35, %v10093_v51  ;;  %v6104_v46 = vpop.f32.mrb[2].mxu0  ;;  %v8017_v52 = vpop.f32.mrb[67].mxu1 }
 0x434   : > { %6765 = vst [vmem:[%s199_s20] sm:$0xff] %v8019_v31  ;;  %v8021_v0 = vadd.f32 %v6104_v46, %v10096_v54  ;;  %v6106_v38 = vpop.f32.mrb[3].mxu0  ;;  %v6759_v49 = vadd.f32 %v8015_v9, %v6718_v33  ;;  %v8018_v43 = vadd.f32 %v8017_v52, %v8016_v37 }
 0x435   : > { %6766 = vst [vmem:[%s199_s20 + $0x8] sm:$0xff] %v8020_v36  ;;  %v8022_v39 = vadd.f32 %v6106_v38, %v10100_v60 }
 0x436   : > { %6768 = vst [vmem:[%s199_s20 + $0x18] sm:$0xff] %v8021_v0  ;;  %6767 = vst [vmem:[%s199_s20 + $0x10] sm:$0xff] %v6759_v49  ;;  %v6762_v51 = vadd.f32 %v8018_v43, %v6721_v15 }
 0x437   : > { %6769 = vst [vmem:[%s199_s20 + $0x20] sm:$0xff] %v8022_v39 }
 0x438   : > { %6770 = vst [vmem:[%s199_s20 + $0x28] sm:$0xff] %v6762_v51 }
 0x439   : > { %9258 = shalt.err (!%p9255_p8)
}
 0x43a   : > { %s9259_s25 = scalar_lea.hbm %s10493_s26, 768  ;;  %s9263_s4 = scalar_lea.hbm %s10544_s2, 1536 }
 0x43b   : > { %p9260_p0 = scmp.ne.s32.totalorder %s10493_s26, %s9259_s25  ;;  %p9264_p12 = scmp.lt.u32.totalorder %s10493_s26, %s10544_s2 }
 0x43c   : > { %p9265_p2 = scmp.lt.u32.totalorder %s9263_s4, %s9259_s25  ;;  %p9267_p10 = scmp.lt.u32.totalorder %s9259_s25, %s10493_s26 }
 0x43d   : > { %p9261_p4 = pnand %p9260_p0, %p10565_p11 }
 0x43e   : > { %p9266_p9 = por %p9265_p2, %p9264_p12 }
 0x43f   : > { %p9262_p6 = pneg %p9261_p4 }
 0x440   : > { %p9268_p13 = por %p9267_p10, %p9266_p9 }
 0x442   : > { %p9269_p5 = pnand %p9268_p13, %p9262_p6 }
 0x444   : > { %9272 = shalt.err (!%p9269_p5)
}
 0x445   : > { %s9341_s18 = smov 384   ;;  %s9342_s20 = smov 768  }
 0x446   : > { %s9343_s27 = smov 24  }
 0x447   : > { %8088 = dma.vmem_to_hbm [thread:$0]  (%p10565_p11), %s10487_s23, 768, %s10493_s26, %s6772_s16, %s9341_s18, %s9342_s20, %s9343_s27  }
 0x448 PF: > { %s6803_s12 = sand.u32 1, %s9311_s9   ;;  %p10566_p1 = scmp.ne.s32.totalorder %s10555_s22, 0 }
 0x449   : > { %p10567_p3 = scmp.ge.s32.totalorder %s9331_s14, 2  ;;  %s6804_s15 = scalar_lea.sflag [#allocation4], %s6803_s12 }
 0x44b   : > { %p8099_p7 = pnand %p10567_p3, %p10566_p1 }
 0x44d   : > { %9306 = dma.done.wait (!%p8099_p7), %s6804_s15, 768  }
 0x44e   : > { %9308 = vsyncadd (!%p8099_p7), %s6804_s15, 4294966528  ;;  %s19_s14 = sadd.s32 1, %s9331_s14   ;;  %s10568_s9 = smov %s9315_s10 }
 0x44f   : > { %p16_p8 = scmp.ge.s32.totalorder %s19_s14, 4   ;;  %s10569_s10 = smov %s9319_s11 }
 0x450   : > { %s10570_s11 = smov %s9485_s29  ;;  %s10571_s12 = smov %s9327_s13 }
 0x451   : > { %s10572_s13 = smov %s10574_s28  ;;  %18 = sbr.rel (!%p16_p8) target bundleno = 7 (0x7), region = 79 }
 0x458   :  { %6809 = vsyncpa [#allocation3], 1 }
 0x459   :  { %6811 = vsyncpa [#allocation3 + $0x1], 1 }
 0x45a   :  { %6812 = vsyncpa [#allocation6], 1 }
 0x45b   :  { %6814 = vsyncpa [#allocation6 + $0x1], 1 }
 0x45c   :  { %6815 = vsyncpa [#allocation4], 1 }
 0x45d   :  { %6817 = vsyncpa [#allocation4 + $0x1], 1 }

</bundles_post_ra>
